<compile_context>
chip_gen: v5e
topology: v5e:2x2
jax: 0.10.0
libtpu: 0.0.40
codegen_flags: <defaults>
</compile_context>

<pallas_src>
import numpy as np
import jax
import jax.numpy as jnp
from jax.experimental import pallas as pl
from jax.experimental.pallas import tpu as pltpu

# ---- problem sizes (small, consistent with the module's __init__) ----
SEQ_LEN = 8
BATCH = 2
HIDDEN = 32
NUM_ACTIVITIES = 16
NUM_GRU_LAYERS = 2
NUM_CLASSES = 5

GATE_PAD = 128            # per-gate lane padding (vreg-aligned gate slices)
G3 = 3 * GATE_PAD


def gru_classifier_kernel(x_ref, gw_ref, gb_ref, cw_ref, cb_ref, out_ref, seq_scr):
    """Whole forward pass after the embedding gather.

    x_ref  : [T*B, H]            embedded activities, t-major rows (f32)
    gw_ref : [L, 2, H, 3*128]    bf16 gate-fused weights; [:,0]=W_ih^T, [:,1]=W_hh^T
                                 (gate g lives in lanes [g*128, g*128+H); rest zero)
    gb_ref : [L, 2, 1, 3*128]    f32 biases; [:,0]=(b_ir+b_hr | b_iz+b_hz | b_in),
                                 [:,1]=(0 | 0 | b_hn)  (b_hn stays inside r*(...))
    cw_ref : [2, H, H]           bf16 classifier weights (W1^T, W2^T padded to H cols)
    cb_ref : [2, 1, H]           f32 classifier biases (b1, b2 zero-padded)
    out_ref: [B, H]              logits; lanes [0, C) valid (sliced by wrapper)
    seq_scr: VMEM [T*B, H] f32   current layer's output sequence
    """
    T, B, H, GP = SEQ_LEN, BATCH, HIDDEN, GATE_PAD
    L = gw_ref.shape[0]

    seq = x_ref[...]                                       # [T*B, H] f32
    for layer in range(L):                                 # static: 2 layers
        wih = gw_ref[layer, 0]                             # [H, 3*GP] bf16
        whh = gw_ref[layer, 1]                             # [H, 3*GP] bf16
        b_i = gb_ref[layer, 0]                             # [1, 3*GP] f32
        b_hn = gb_ref[layer, 1]                            # [1, 3*GP] f32

        # Hoisted input->hidden projection for all T steps (off the serial path).
        xp = jnp.dot(seq.astype(jnp.bfloat16), wih,
                     preferred_element_type=jnp.float32) + b_i     # [T*B, 3*GP]

        h = jnp.zeros((B, H), jnp.float32)
        for t in range(T):                                 # fully unrolled (T=8)
            gh = jnp.dot(h.astype(jnp.bfloat16), whh,
                         preferred_element_type=jnp.float32) + b_hn   # [B, 3*GP]
            gx = xp[t * B:(t + 1) * B]                                 # [B, 3*GP]
            # gate slices start at 128-lane boundaries -> no cross-lane shuffles
            r = jax.nn.sigmoid(gx[:, 0:H] + gh[:, 0:H])
            z = jax.nn.sigmoid(gx[:, GP:GP + H] + gh[:, GP:GP + H])
            n = jnp.tanh(gx[:, 2 * GP:2 * GP + H]
                         + r * gh[:, 2 * GP:2 * GP + H])
            h = (1.0 - z) * n + z * h
            seq_scr[t * B:(t + 1) * B, :] = h              # layer output
        seq = seq_scr[...]                                 # next layer's input

    # torch.mean(embeddings, dim=0): mean over time per batch row (t-major rows).
    mean = seq[0:B]
    for t in range(1, T):
        mean = mean + seq[t * B:(t + 1) * B]
    mean = mean * (1.0 / T)

    # classifier: Linear -> ReLU -> Linear (output lanes padded to H).
    hid = jnp.maximum(
        jnp.dot(mean.astype(jnp.bfloat16), cw_ref[0],
                preferred_element_type=jnp.float32) + cb_ref[0], 0.0)
    out_ref[...] = (jnp.dot(hid.astype(jnp.bfloat16), cw_ref[1],
                            preferred_element_type=jnp.float32) + cb_ref[1])


def init_params(key):
    ks = jax.random.split(key, 10)
    bound = 1.0 / np.sqrt(HIDDEN)

    def u(k, shape):
        return jax.random.uniform(k, shape, jnp.float32, -bound, bound)

    return {
        # nn.Embedding(num_activities, hidden)
        "emb": jax.random.normal(ks[0], (NUM_ACTIVITIES, HIDDEN), jnp.float32),
        # nn.GRU weights, PyTorch layout per gate: [L, 3, out(H), in(H)], gate order r,z,n
        "wih": u(ks[1], (NUM_GRU_LAYERS, 3, HIDDEN, HIDDEN)),
        "whh": u(ks[2], (NUM_GRU_LAYERS, 3, HIDDEN, HIDDEN)),
        "bih": u(ks[3], (NUM_GRU_LAYERS, 3, HIDDEN)),
        "bhh": u(ks[4], (NUM_GRU_LAYERS, 3, HIDDEN)),
        # classifier: Linear(H,H) -> ReLU -> Linear(H,C), PyTorch layout [out, in]
        "w1": u(ks[5], (HIDDEN, HIDDEN)),
        "b1": u(ks[6], (HIDDEN,)),
        "w2": u(ks[7], (NUM_CLASSES, HIDDEN)),
        "b2": u(ks[8], (NUM_CLASSES,)),
    }


def pack_params(params):
    """Host-side repacking: gate fusion, lane padding, bias folding, bf16 weights."""
    H, GP, L, C = HIDDEN, GATE_PAD, NUM_GRU_LAYERS, NUM_CLASSES

    wih = np.asarray(params["wih"], np.float32)
    whh = np.asarray(params["whh"], np.float32)
    bih = np.asarray(params["bih"], np.float32)
    bhh = np.asarray(params["bhh"], np.float32)

    gru_w = np.zeros((L, 2, H, G3), np.float32)
    gru_b = np.zeros((L, 2, 1, G3), np.float32)
    for l in range(L):
        for g in range(3):
            gru_w[l, 0, :, g * GP:g * GP + H] = wih[l, g].T    # x @ W_ih^T layout
            gru_w[l, 1, :, g * GP:g * GP + H] = whh[l, g].T    # h @ W_hh^T layout
        # r, z: fold b_ih + b_hh into the hoisted input projection.
        gru_b[l, 0, 0, 0 * GP:0 * GP + H] = bih[l, 0] + bhh[l, 0]
        gru_b[l, 0, 0, 1 * GP:1 * GP + H] = bih[l, 1] + bhh[l, 1]
        # n: b_in goes with the input projection, b_hn must stay on the h side.
        gru_b[l, 0, 0, 2 * GP:2 * GP + H] = bih[l, 2]
        gru_b[l, 1, 0, 2 * GP:2 * GP + H] = bhh[l, 2]

    cls_w = np.zeros((2, H, H), np.float32)
    cls_b = np.zeros((2, 1, H), np.float32)
    cls_w[0] = np.asarray(params["w1"], np.float32).T
    cls_w[1, :, :C] = np.asarray(params["w2"], np.float32).T
    cls_b[0, 0] = np.asarray(params["b1"], np.float32)
    cls_b[1, 0, :C] = np.asarray(params["b2"], np.float32)

    return {
        "emb": jnp.asarray(params["emb"], jnp.float32),
        "gru_w": jnp.asarray(gru_w, jnp.bfloat16),
        "gru_b": jnp.asarray(gru_b, jnp.float32),
        "cls_w": jnp.asarray(cls_w, jnp.bfloat16),
        "cls_b": jnp.asarray(cls_b, jnp.float32),
    }


@jax.jit
def gru_classifier_forward(tokens, packed):
    # Embedding lookup (gather) stays in plain JAX glue.
    x = packed["emb"][tokens].astype(jnp.float32)          # [T, B, H]
    x = x.reshape(SEQ_LEN * BATCH, HIDDEN)                 # t-major rows

    vmem = pl.BlockSpec(memory_space=pltpu.MemorySpace.VMEM)
    out = pl.pallas_call(
        gru_classifier_kernel,
        out_shape=jax.ShapeDtypeStruct((BATCH, HIDDEN), jnp.float32),
        in_specs=[vmem] * 5,
        out_specs=vmem,
        scratch_shapes=[
            pltpu.VMEM((SEQ_LEN * BATCH, HIDDEN), jnp.float32),
        ],
    )(x, packed["gru_w"], packed["gru_b"], packed["cls_w"], packed["cls_b"])
    return out[:, :NUM_CLASSES]


def reference_forward(tokens, params):
    """Pure-JAX reference mirroring the PyTorch module (eval mode).

    Matmul operands are cast to bf16 with f32 accumulation to mirror the
    kernel's MXU operand precision (everything else is f32).
    """
    def bdot(a, b):
        return jnp.dot(a.astype(jnp.bfloat16), b.astype(jnp.bfloat16),
                       preferred_element_type=jnp.float32)

    x = params["emb"][tokens].astype(jnp.float32)          # [T, B, H]
    T, B, H = x.shape
    for layer in range(NUM_GRU_LAYERS):
        h = jnp.zeros((B, H), jnp.float32)
        w_ir, w_iz, w_in = params["wih"][layer]
        w_hr, w_hz, w_hn = params["whh"][layer]
        b_ir, b_iz, b_in = params["bih"][layer]
        b_hr, b_hz, b_hn = params["bhh"][layer]
        outs = []
        for t in range(T):
            xt = x[t]
            r = jax.nn.sigmoid(bdot(xt, w_ir.T) + b_ir + bdot(h, w_hr.T) + b_hr)
            z = jax.nn.sigmoid(bdot(xt, w_iz.T) + b_iz + bdot(h, w_hz.T) + b_hz)
            n = jnp.tanh(bdot(xt, w_in.T) + b_in + r * (bdot(h, w_hn.T) + b_hn))
            h = (1.0 - z) * n + z * h
            outs.append(h)
        x = jnp.stack(outs, axis=0)
    mean = jnp.mean(x, axis=0)
    hid = jnp.maximum(bdot(mean, params["w1"].T) + params["b1"], 0.0)
    return bdot(hid, params["w2"].T) + params["b2"]


if __name__ == "__main__":
    key = jax.random.PRNGKey(0)
    pkey, tkey = jax.random.split(key)
    params = init_params(pkey)
    tokens = jax.random.randint(tkey, (SEQ_LEN, BATCH), 0, NUM_ACTIVITIES,
                                dtype=jnp.int32)

    packed = pack_params(params)
    logits = gru_classifier_forward(tokens, packed)
    logits = jax.block_until_ready(logits)

    ref = reference_forward(tokens, params)
    np.testing.assert_allclose(np.asarray(logits), np.asarray(ref),
                               rtol=1e-3, atol=1e-3)
    print("KERNEL_OK")
</pallas_src>

<mosaic_0001>
module attributes {stable_mosaic.version = 11 : i64} {
  func.func @gru_classifier_kernel(%arg0: memref<16x32xf32, #tpu.memory_space<vmem>>, %arg1: memref<2x2x32x384xbf16, #tpu.memory_space<vmem>>, %arg2: memref<2x2x1x384xf32, #tpu.memory_space<vmem>>, %arg3: memref<2x32x32xbf16, #tpu.memory_space<vmem>>, %arg4: memref<2x1x32xf32, #tpu.memory_space<vmem>>, %arg5: memref<2x32xf32, #tpu.memory_space<vmem>>, %arg6: memref<16x32xf32, #tpu.memory_space<vmem>>) attributes {dimension_semantics = [], scalar_prefetch = 0 : i64, scratch_operands = 1 : i64, tpu.core_type = #tpu.core_type<tc>} {
    %c0 = arith.constant 0 : index
    %c0_0 = arith.constant 0 : index
    %0 = vector.load %arg0[%c0, %c0_0] : memref<16x32xf32, #tpu.memory_space<vmem>>, vector<16x32xf32>
    %c0_1 = arith.constant 0 : index
    %c0_2 = arith.constant 0 : index
    %c0_3 = arith.constant 0 : index
    %c0_4 = arith.constant 0 : index
    %1 = vector.load %arg1[%c0_1, %c0_2, %c0_3, %c0_4] : memref<2x2x32x384xbf16, #tpu.memory_space<vmem>>, vector<1x1x32x384xbf16>
    %2 = vector.shape_cast %1 : vector<1x1x32x384xbf16> to vector<32x384xbf16>
    %c0_5 = arith.constant 0 : index
    %c1 = arith.constant 1 : index
    %c0_6 = arith.constant 0 : index
    %c0_7 = arith.constant 0 : index
    %3 = vector.load %arg1[%c0_5, %c1, %c0_6, %c0_7] : memref<2x2x32x384xbf16, #tpu.memory_space<vmem>>, vector<1x1x32x384xbf16>
    %4 = vector.shape_cast %3 : vector<1x1x32x384xbf16> to vector<32x384xbf16>
    %c0_8 = arith.constant 0 : index
    %c0_9 = arith.constant 0 : index
    %c0_10 = arith.constant 0 : index
    %c0_11 = arith.constant 0 : index
    %5 = vector.load %arg2[%c0_8, %c0_9, %c0_10, %c0_11] : memref<2x2x1x384xf32, #tpu.memory_space<vmem>>, vector<1x1x1x384xf32>
    %6 = vector.shape_cast %5 : vector<1x1x1x384xf32> to vector<1x384xf32>
    %c0_12 = arith.constant 0 : index
    %c1_13 = arith.constant 1 : index
    %c0_14 = arith.constant 0 : index
    %c0_15 = arith.constant 0 : index
    %7 = vector.load %arg2[%c0_12, %c1_13, %c0_14, %c0_15] : memref<2x2x1x384xf32, #tpu.memory_space<vmem>>, vector<1x1x1x384xf32>
    %8 = vector.shape_cast %7 : vector<1x1x1x384xf32> to vector<1x384xf32>
    %9 = arith.truncf %0 : vector<16x32xf32> to vector<16x32xbf16>
    %cst = arith.constant dense<0.000000e+00> : vector<16x384xf32>
    %10 = tpu.matmul %9, %2, %cst {dimension_numbers = #tpu.dot_dimension_numbers<[1], [0], [0], [1], [0, 0, 1, 1], [], []>} : vector<16x32xbf16>, vector<32x384xbf16>, vector<16x384xf32> -> vector<16x384xf32>
    %11 = vector.broadcast %6 : vector<1x384xf32> to vector<16x384xf32>
    %12 = arith.addf %10, %11 : vector<16x384xf32>
    %cst_16 = arith.constant 0.000000e+00 : f32
    %13 = vector.broadcast %cst_16 : f32 to vector<2x32xf32>
    %14 = arith.truncf %13 : vector<2x32xf32> to vector<2x32xbf16>
    %cst_17 = arith.constant dense<0.000000e+00> : vector<2x384xf32>
    %15 = tpu.matmul %14, %4, %cst_17 {dimension_numbers = #tpu.dot_dimension_numbers<[1], [0], [0], [1], [0, 0, 1, 1], [], []>} : vector<2x32xbf16>, vector<32x384xbf16>, vector<2x384xf32> -> vector<2x384xf32>
    %16 = vector.broadcast %8 : vector<1x384xf32> to vector<2x384xf32>
    %17 = arith.addf %15, %16 : vector<2x384xf32>
    %18 = vector.extract_strided_slice %12 {offsets = [0, 0], sizes = [2, 384], strides = [1, 1]} : vector<16x384xf32> to vector<2x384xf32>
    %19 = vector.extract_strided_slice %18 {offsets = [0, 0], sizes = [2, 32], strides = [1, 1]} : vector<2x384xf32> to vector<2x32xf32>
    %20 = vector.extract_strided_slice %17 {offsets = [0, 0], sizes = [2, 32], strides = [1, 1]} : vector<2x384xf32> to vector<2x32xf32>
    %21 = arith.addf %19, %20 : vector<2x32xf32>
    %22 = arith.negf %21 : vector<2x32xf32>
    %23 = math.exp %22 : vector<2x32xf32>
    %cst_18 = arith.constant 1.000000e+00 : f32
    %24 = vector.broadcast %cst_18 : f32 to vector<2x32xf32>
    %25 = arith.addf %24, %23 : vector<2x32xf32>
    %26 = arith.divf %24, %25 : vector<2x32xf32>
    %27 = vector.extract_strided_slice %18 {offsets = [0, 128], sizes = [2, 32], strides = [1, 1]} : vector<2x384xf32> to vector<2x32xf32>
    %28 = vector.extract_strided_slice %17 {offsets = [0, 128], sizes = [2, 32], strides = [1, 1]} : vector<2x384xf32> to vector<2x32xf32>
    %29 = arith.addf %27, %28 : vector<2x32xf32>
    %30 = arith.negf %29 : vector<2x32xf32>
    %31 = math.exp %30 : vector<2x32xf32>
    %cst_19 = arith.constant 1.000000e+00 : f32
    %32 = vector.broadcast %cst_19 : f32 to vector<2x32xf32>
    %33 = arith.addf %32, %31 : vector<2x32xf32>
    %34 = arith.divf %32, %33 : vector<2x32xf32>
    %35 = vector.extract_strided_slice %18 {offsets = [0, 256], sizes = [2, 32], strides = [1, 1]} : vector<2x384xf32> to vector<2x32xf32>
    %36 = vector.extract_strided_slice %17 {offsets = [0, 256], sizes = [2, 32], strides = [1, 1]} : vector<2x384xf32> to vector<2x32xf32>
    %37 = arith.mulf %26, %36 : vector<2x32xf32>
    %38 = arith.addf %35, %37 : vector<2x32xf32>
    %39 = math.tanh %38 : vector<2x32xf32>
    %cst_20 = arith.constant 1.000000e+00 : f32
    %40 = vector.broadcast %cst_20 : f32 to vector<2x32xf32>
    %41 = arith.subf %40, %34 : vector<2x32xf32>
    %42 = arith.mulf %41, %39 : vector<2x32xf32>
    %43 = arith.mulf %34, %13 : vector<2x32xf32>
    %44 = arith.addf %42, %43 : vector<2x32xf32>
    %c0_21 = arith.constant 0 : index
    %c0_22 = arith.constant 0 : index
    %45 = vector.load %arg6[%c0_21, %c0_22] : memref<16x32xf32, #tpu.memory_space<vmem>>, vector<2x32xf32>
    tpu.vector_store %arg6[%c0_21, %c0_22], %44 {strides = array<i32>} : memref<16x32xf32, #tpu.memory_space<vmem>>, vector<2x32xf32>,
    %46 = arith.truncf %44 : vector<2x32xf32> to vector<2x32xbf16>
    %cst_23 = arith.constant dense<0.000000e+00> : vector<2x384xf32>
    %47 = tpu.matmul %46, %4, %cst_23 {dimension_numbers = #tpu.dot_dimension_numbers<[1], [0], [0], [1], [0, 0, 1, 1], [], []>} : vector<2x32xbf16>, vector<32x384xbf16>, vector<2x384xf32> -> vector<2x384xf32>
    %48 = vector.broadcast %8 : vector<1x384xf32> to vector<2x384xf32>
    %49 = arith.addf %47, %48 : vector<2x384xf32>
    %50 = vector.extract_strided_slice %12 {offsets = [2, 0], sizes = [2, 384], strides = [1, 1]} : vector<16x384xf32> to vector<2x384xf32>
    %51 = vector.extract_strided_slice %50 {offsets = [0, 0], sizes = [2, 32], strides = [1, 1]} : vector<2x384xf32> to vector<2x32xf32>
    %52 = vector.extract_strided_slice %49 {offsets = [0, 0], sizes = [2, 32], strides = [1, 1]} : vector<2x384xf32> to vector<2x32xf32>
    %53 = arith.addf %51, %52 : vector<2x32xf32>
    %54 = arith.negf %53 : vector<2x32xf32>
    %55 = math.exp %54 : vector<2x32xf32>
    %cst_24 = arith.constant 1.000000e+00 : f32
    %56 = vector.broadcast %cst_24 : f32 to vector<2x32xf32>
    %57 = arith.addf %56, %55 : vector<2x32xf32>
    %58 = arith.divf %56, %57 : vector<2x32xf32>
    %59 = vector.extract_strided_slice %50 {offsets = [0, 128], sizes = [2, 32], strides = [1, 1]} : vector<2x384xf32> to vector<2x32xf32>
    %60 = vector.extract_strided_slice %49 {offsets = [0, 128], sizes = [2, 32], strides = [1, 1]} : vector<2x384xf32> to vector<2x32xf32>
    %61 = arith.addf %59, %60 : vector<2x32xf32>
    %62 = arith.negf %61 : vector<2x32xf32>
    %63 = math.exp %62 : vector<2x32xf32>
    %cst_25 = arith.constant 1.000000e+00 : f32
    %64 = vector.broadcast %cst_25 : f32 to vector<2x32xf32>
    %65 = arith.addf %64, %63 : vector<2x32xf32>
    %66 = arith.divf %64, %65 : vector<2x32xf32>
    %67 = vector.extract_strided_slice %50 {offsets = [0, 256], sizes = [2, 32], strides = [1, 1]} : vector<2x384xf32> to vector<2x32xf32>
    %68 = vector.extract_strided_slice %49 {offsets = [0, 256], sizes = [2, 32], strides = [1, 1]} : vector<2x384xf32> to vector<2x32xf32>
    %69 = arith.mulf %58, %68 : vector<2x32xf32>
    %70 = arith.addf %67, %69 : vector<2x32xf32>
    %71 = math.tanh %70 : vector<2x32xf32>
    %cst_26 = arith.constant 1.000000e+00 : f32
    %72 = vector.broadcast %cst_26 : f32 to vector<2x32xf32>
    %73 = arith.subf %72, %66 : vector<2x32xf32>
    %74 = arith.mulf %73, %71 : vector<2x32xf32>
    %75 = arith.mulf %66, %44 : vector<2x32xf32>
    %76 = arith.addf %74, %75 : vector<2x32xf32>
    %c2 = arith.constant 2 : index
    %c0_27 = arith.constant 0 : index
    %77 = vector.load %arg6[%c2, %c0_27] : memref<16x32xf32, #tpu.memory_space<vmem>>, vector<2x32xf32>
    tpu.vector_store %arg6[%c2, %c0_27], %76 {strides = array<i32>} : memref<16x32xf32, #tpu.memory_space<vmem>>, vector<2x32xf32>,
    %78 = arith.truncf %76 : vector<2x32xf32> to vector<2x32xbf16>
    %cst_28 = arith.constant dense<0.000000e+00> : vector<2x384xf32>
    %79 = tpu.matmul %78, %4, %cst_28 {dimension_numbers = #tpu.dot_dimension_numbers<[1], [0], [0], [1], [0, 0, 1, 1], [], []>} : vector<2x32xbf16>, vector<32x384xbf16>, vector<2x384xf32> -> vector<2x384xf32>
    %80 = vector.broadcast %8 : vector<1x384xf32> to vector<2x384xf32>
    %81 = arith.addf %79, %80 : vector<2x384xf32>
    %82 = vector.extract_strided_slice %12 {offsets = [4, 0], sizes = [2, 384], strides = [1, 1]} : vector<16x384xf32> to vector<2x384xf32>
    %83 = vector.extract_strided_slice %82 {offsets = [0, 0], sizes = [2, 32], strides = [1, 1]} : vector<2x384xf32> to vector<2x32xf32>
    %84 = vector.extract_strided_slice %81 {offsets = [0, 0], sizes = [2, 32], strides = [1, 1]} : vector<2x384xf32> to vector<2x32xf32>
    %85 = arith.addf %83, %84 : vector<2x32xf32>
    %86 = arith.negf %85 : vector<2x32xf32>
    %87 = math.exp %86 : vector<2x32xf32>
    %cst_29 = arith.constant 1.000000e+00 : f32
    %88 = vector.broadcast %cst_29 : f32 to vector<2x32xf32>
    %89 = arith.addf %88, %87 : vector<2x32xf32>
    %90 = arith.divf %88, %89 : vector<2x32xf32>
    %91 = vector.extract_strided_slice %82 {offsets = [0, 128], sizes = [2, 32], strides = [1, 1]} : vector<2x384xf32> to vector<2x32xf32>
    %92 = vector.extract_strided_slice %81 {offsets = [0, 128], sizes = [2, 32], strides = [1, 1]} : vector<2x384xf32> to vector<2x32xf32>
    %93 = arith.addf %91, %92 : vector<2x32xf32>
    %94 = arith.negf %93 : vector<2x32xf32>
    %95 = math.exp %94 : vector<2x32xf32>
    %cst_30 = arith.constant 1.000000e+00 : f32
    %96 = vector.broadcast %cst_30 : f32 to vector<2x32xf32>
    %97 = arith.addf %96, %95 : vector<2x32xf32>
    %98 = arith.divf %96, %97 : vector<2x32xf32>
    %99 = vector.extract_strided_slice %82 {offsets = [0, 256], sizes = [2, 32], strides = [1, 1]} : vector<2x384xf32> to vector<2x32xf32>
    %100 = vector.extract_strided_slice %81 {offsets = [0, 256], sizes = [2, 32], strides = [1, 1]} : vector<2x384xf32> to vector<2x32xf32>
    %101 = arith.mulf %90, %100 : vector<2x32xf32>
    %102 = arith.addf %99, %101 : vector<2x32xf32>
    %103 = math.tanh %102 : vector<2x32xf32>
    %cst_31 = arith.constant 1.000000e+00 : f32
    %104 = vector.broadcast %cst_31 : f32 to vector<2x32xf32>
    %105 = arith.subf %104, %98 : vector<2x32xf32>
    %106 = arith.mulf %105, %103 : vector<2x32xf32>
    %107 = arith.mulf %98, %76 : vector<2x32xf32>
    %108 = arith.addf %106, %107 : vector<2x32xf32>
    %c4 = arith.constant 4 : index
    %c0_32 = arith.constant 0 : index
    %109 = vector.load %arg6[%c4, %c0_32] : memref<16x32xf32, #tpu.memory_space<vmem>>, vector<2x32xf32>
    tpu.vector_store %arg6[%c4, %c0_32], %108 {strides = array<i32>} : memref<16x32xf32, #tpu.memory_space<vmem>>, vector<2x32xf32>,
    %110 = arith.truncf %108 : vector<2x32xf32> to vector<2x32xbf16>
    %cst_33 = arith.constant dense<0.000000e+00> : vector<2x384xf32>
    %111 = tpu.matmul %110, %4, %cst_33 {dimension_numbers = #tpu.dot_dimension_numbers<[1], [0], [0], [1], [0, 0, 1, 1], [], []>} : vector<2x32xbf16>, vector<32x384xbf16>, vector<2x384xf32> -> vector<2x384xf32>
    %112 = vector.broadcast %8 : vector<1x384xf32> to vector<2x384xf32>
    %113 = arith.addf %111, %112 : vector<2x384xf32>
    %114 = vector.extract_strided_slice %12 {offsets = [6, 0], sizes = [2, 384], strides = [1, 1]} : vector<16x384xf32> to vector<2x384xf32>
    %115 = vector.extract_strided_slice %114 {offsets = [0, 0], sizes = [2, 32], strides = [1, 1]} : vector<2x384xf32> to vector<2x32xf32>
    %116 = vector.extract_strided_slice %113 {offsets = [0, 0], sizes = [2, 32], strides = [1, 1]} : vector<2x384xf32> to vector<2x32xf32>
    %117 = arith.addf %115, %116 : vector<2x32xf32>
    %118 = arith.negf %117 : vector<2x32xf32>
    %119 = math.exp %118 : vector<2x32xf32>
    %cst_34 = arith.constant 1.000000e+00 : f32
    %120 = vector.broadcast %cst_34 : f32 to vector<2x32xf32>
    %121 = arith.addf %120, %119 : vector<2x32xf32>
    %122 = arith.divf %120, %121 : vector<2x32xf32>
    %123 = vector.extract_strided_slice %114 {offsets = [0, 128], sizes = [2, 32], strides = [1, 1]} : vector<2x384xf32> to vector<2x32xf32>
    %124 = vector.extract_strided_slice %113 {offsets = [0, 128], sizes = [2, 32], strides = [1, 1]} : vector<2x384xf32> to vector<2x32xf32>
    %125 = arith.addf %123, %124 : vector<2x32xf32>
    %126 = arith.negf %125 : vector<2x32xf32>
    %127 = math.exp %126 : vector<2x32xf32>
    %cst_35 = arith.constant 1.000000e+00 : f32
    %128 = vector.broadcast %cst_35 : f32 to vector<2x32xf32>
    %129 = arith.addf %128, %127 : vector<2x32xf32>
    %130 = arith.divf %128, %129 : vector<2x32xf32>
    %131 = vector.extract_strided_slice %114 {offsets = [0, 256], sizes = [2, 32], strides = [1, 1]} : vector<2x384xf32> to vector<2x32xf32>
    %132 = vector.extract_strided_slice %113 {offsets = [0, 256], sizes = [2, 32], strides = [1, 1]} : vector<2x384xf32> to vector<2x32xf32>
    %133 = arith.mulf %122, %132 : vector<2x32xf32>
    %134 = arith.addf %131, %133 : vector<2x32xf32>
    %135 = math.tanh %134 : vector<2x32xf32>
    %cst_36 = arith.constant 1.000000e+00 : f32
    %136 = vector.broadcast %cst_36 : f32 to vector<2x32xf32>
    %137 = arith.subf %136, %130 : vector<2x32xf32>
    %138 = arith.mulf %137, %135 : vector<2x32xf32>
    %139 = arith.mulf %130, %108 : vector<2x32xf32>
    %140 = arith.addf %138, %139 : vector<2x32xf32>
    %c6 = arith.constant 6 : index
    %c0_37 = arith.constant 0 : index
    %141 = vector.load %arg6[%c6, %c0_37] : memref<16x32xf32, #tpu.memory_space<vmem>>, vector<2x32xf32>
    tpu.vector_store %arg6[%c6, %c0_37], %140 {strides = array<i32>} : memref<16x32xf32, #tpu.memory_space<vmem>>, vector<2x32xf32>,
    %142 = arith.truncf %140 : vector<2x32xf32> to vector<2x32xbf16>
    %cst_38 = arith.constant dense<0.000000e+00> : vector<2x384xf32>
    %143 = tpu.matmul %142, %4, %cst_38 {dimension_numbers = #tpu.dot_dimension_numbers<[1], [0], [0], [1], [0, 0, 1, 1], [], []>} : vector<2x32xbf16>, vector<32x384xbf16>, vector<2x384xf32> -> vector<2x384xf32>
    %144 = vector.broadcast %8 : vector<1x384xf32> to vector<2x384xf32>
    %145 = arith.addf %143, %144 : vector<2x384xf32>
    %146 = vector.extract_strided_slice %12 {offsets = [8, 0], sizes = [2, 384], strides = [1, 1]} : vector<16x384xf32> to vector<2x384xf32>
    %147 = vector.extract_strided_slice %146 {offsets = [0, 0], sizes = [2, 32], strides = [1, 1]} : vector<2x384xf32> to vector<2x32xf32>
    %148 = vector.extract_strided_slice %145 {offsets = [0, 0], sizes = [2, 32], strides = [1, 1]} : vector<2x384xf32> to vector<2x32xf32>
    %149 = arith.addf %147, %148 : vector<2x32xf32>
    %150 = arith.negf %149 : vector<2x32xf32>
    %151 = math.exp %150 : vector<2x32xf32>
    %cst_39 = arith.constant 1.000000e+00 : f32
    %152 = vector.broadcast %cst_39 : f32 to vector<2x32xf32>
    %153 = arith.addf %152, %151 : vector<2x32xf32>
    %154 = arith.divf %152, %153 : vector<2x32xf32>
    %155 = vector.extract_strided_slice %146 {offsets = [0, 128], sizes = [2, 32], strides = [1, 1]} : vector<2x384xf32> to vector<2x32xf32>
    %156 = vector.extract_strided_slice %145 {offsets = [0, 128], sizes = [2, 32], strides = [1, 1]} : vector<2x384xf32> to vector<2x32xf32>
    %157 = arith.addf %155, %156 : vector<2x32xf32>
    %158 = arith.negf %157 : vector<2x32xf32>
    %159 = math.exp %158 : vector<2x32xf32>
    %cst_40 = arith.constant 1.000000e+00 : f32
    %160 = vector.broadcast %cst_40 : f32 to vector<2x32xf32>
    %161 = arith.addf %160, %159 : vector<2x32xf32>
    %162 = arith.divf %160, %161 : vector<2x32xf32>
    %163 = vector.extract_strided_slice %146 {offsets = [0, 256], sizes = [2, 32], strides = [1, 1]} : vector<2x384xf32> to vector<2x32xf32>
    %164 = vector.extract_strided_slice %145 {offsets = [0, 256], sizes = [2, 32], strides = [1, 1]} : vector<2x384xf32> to vector<2x32xf32>
    %165 = arith.mulf %154, %164 : vector<2x32xf32>
    %166 = arith.addf %163, %165 : vector<2x32xf32>
    %167 = math.tanh %166 : vector<2x32xf32>
    %cst_41 = arith.constant 1.000000e+00 : f32
    %168 = vector.broadcast %cst_41 : f32 to vector<2x32xf32>
    %169 = arith.subf %168, %162 : vector<2x32xf32>
    %170 = arith.mulf %169, %167 : vector<2x32xf32>
    %171 = arith.mulf %162, %140 : vector<2x32xf32>
    %172 = arith.addf %170, %171 : vector<2x32xf32>
    %c8 = arith.constant 8 : index
    %c0_42 = arith.constant 0 : index
    %173 = vector.load %arg6[%c8, %c0_42] : memref<16x32xf32, #tpu.memory_space<vmem>>, vector<2x32xf32>
    tpu.vector_store %arg6[%c8, %c0_42], %172 {strides = array<i32>} : memref<16x32xf32, #tpu.memory_space<vmem>>, vector<2x32xf32>,
    %174 = arith.truncf %172 : vector<2x32xf32> to vector<2x32xbf16>
    %cst_43 = arith.constant dense<0.000000e+00> : vector<2x384xf32>
    %175 = tpu.matmul %174, %4, %cst_43 {dimension_numbers = #tpu.dot_dimension_numbers<[1], [0], [0], [1], [0, 0, 1, 1], [], []>} : vector<2x32xbf16>, vector<32x384xbf16>, vector<2x384xf32> -> vector<2x384xf32>
    %176 = vector.broadcast %8 : vector<1x384xf32> to vector<2x384xf32>
    %177 = arith.addf %175, %176 : vector<2x384xf32>
    %178 = vector.extract_strided_slice %12 {offsets = [10, 0], sizes = [2, 384], strides = [1, 1]} : vector<16x384xf32> to vector<2x384xf32>
    %179 = vector.extract_strided_slice %178 {offsets = [0, 0], sizes = [2, 32], strides = [1, 1]} : vector<2x384xf32> to vector<2x32xf32>
    %180 = vector.extract_strided_slice %177 {offsets = [0, 0], sizes = [2, 32], strides = [1, 1]} : vector<2x384xf32> to vector<2x32xf32>
    %181 = arith.addf %179, %180 : vector<2x32xf32>
    %182 = arith.negf %181 : vector<2x32xf32>
    %183 = math.exp %182 : vector<2x32xf32>
    %cst_44 = arith.constant 1.000000e+00 : f32
    %184 = vector.broadcast %cst_44 : f32 to vector<2x32xf32>
    %185 = arith.addf %184, %183 : vector<2x32xf32>
    %186 = arith.divf %184, %185 : vector<2x32xf32>
    %187 = vector.extract_strided_slice %178 {offsets = [0, 128], sizes = [2, 32], strides = [1, 1]} : vector<2x384xf32> to vector<2x32xf32>
    %188 = vector.extract_strided_slice %177 {offsets = [0, 128], sizes = [2, 32], strides = [1, 1]} : vector<2x384xf32> to vector<2x32xf32>
    %189 = arith.addf %187, %188 : vector<2x32xf32>
    %190 = arith.negf %189 : vector<2x32xf32>
    %191 = math.exp %190 : vector<2x32xf32>
    %cst_45 = arith.constant 1.000000e+00 : f32
    %192 = vector.broadcast %cst_45 : f32 to vector<2x32xf32>
    %193 = arith.addf %192, %191 : vector<2x32xf32>
    %194 = arith.divf %192, %193 : vector<2x32xf32>
    %195 = vector.extract_strided_slice %178 {offsets = [0, 256], sizes = [2, 32], strides = [1, 1]} : vector<2x384xf32> to vector<2x32xf32>
    %196 = vector.extract_strided_slice %177 {offsets = [0, 256], sizes = [2, 32], strides = [1, 1]} : vector<2x384xf32> to vector<2x32xf32>
    %197 = arith.mulf %186, %196 : vector<2x32xf32>
    %198 = arith.addf %195, %197 : vector<2x32xf32>
    %199 = math.tanh %198 : vector<2x32xf32>
    %cst_46 = arith.constant 1.000000e+00 : f32
    %200 = vector.broadcast %cst_46 : f32 to vector<2x32xf32>
    %201 = arith.subf %200, %194 : vector<2x32xf32>
    %202 = arith.mulf %201, %199 : vector<2x32xf32>
    %203 = arith.mulf %194, %172 : vector<2x32xf32>
    %204 = arith.addf %202, %203 : vector<2x32xf32>
    %c10 = arith.constant 10 : index
    %c0_47 = arith.constant 0 : index
    %205 = vector.load %arg6[%c10, %c0_47] : memref<16x32xf32, #tpu.memory_space<vmem>>, vector<2x32xf32>
    tpu.vector_store %arg6[%c10, %c0_47], %204 {strides = array<i32>} : memref<16x32xf32, #tpu.memory_space<vmem>>, vector<2x32xf32>,
    %206 = arith.truncf %204 : vector<2x32xf32> to vector<2x32xbf16>
    %cst_48 = arith.constant dense<0.000000e+00> : vector<2x384xf32>
    %207 = tpu.matmul %206, %4, %cst_48 {dimension_numbers = #tpu.dot_dimension_numbers<[1], [0], [0], [1], [0, 0, 1, 1], [], []>} : vector<2x32xbf16>, vector<32x384xbf16>, vector<2x384xf32> -> vector<2x384xf32>
    %208 = vector.broadcast %8 : vector<1x384xf32> to vector<2x384xf32>
    %209 = arith.addf %207, %208 : vector<2x384xf32>
    %210 = vector.extract_strided_slice %12 {offsets = [12, 0], sizes = [2, 384], strides = [1, 1]} : vector<16x384xf32> to vector<2x384xf32>
    %211 = vector.extract_strided_slice %210 {offsets = [0, 0], sizes = [2, 32], strides = [1, 1]} : vector<2x384xf32> to vector<2x32xf32>
    %212 = vector.extract_strided_slice %209 {offsets = [0, 0], sizes = [2, 32], strides = [1, 1]} : vector<2x384xf32> to vector<2x32xf32>
    %213 = arith.addf %211, %212 : vector<2x32xf32>
    %214 = arith.negf %213 : vector<2x32xf32>
    %215 = math.exp %214 : vector<2x32xf32>
    %cst_49 = arith.constant 1.000000e+00 : f32
    %216 = vector.broadcast %cst_49 : f32 to vector<2x32xf32>
    %217 = arith.addf %216, %215 : vector<2x32xf32>
    %218 = arith.divf %216, %217 : vector<2x32xf32>
    %219 = vector.extract_strided_slice %210 {offsets = [0, 128], sizes = [2, 32], strides = [1, 1]} : vector<2x384xf32> to vector<2x32xf32>
    %220 = vector.extract_strided_slice %209 {offsets = [0, 128], sizes = [2, 32], strides = [1, 1]} : vector<2x384xf32> to vector<2x32xf32>
    %221 = arith.addf %219, %220 : vector<2x32xf32>
    %222 = arith.negf %221 : vector<2x32xf32>
    %223 = math.exp %222 : vector<2x32xf32>
    %cst_50 = arith.constant 1.000000e+00 : f32
    %224 = vector.broadcast %cst_50 : f32 to vector<2x32xf32>
    %225 = arith.addf %224, %223 : vector<2x32xf32>
    %226 = arith.divf %224, %225 : vector<2x32xf32>
    %227 = vector.extract_strided_slice %210 {offsets = [0, 256], sizes = [2, 32], strides = [1, 1]} : vector<2x384xf32> to vector<2x32xf32>
    %228 = vector.extract_strided_slice %209 {offsets = [0, 256], sizes = [2, 32], strides = [1, 1]} : vector<2x384xf32> to vector<2x32xf32>
    %229 = arith.mulf %218, %228 : vector<2x32xf32>
    %230 = arith.addf %227, %229 : vector<2x32xf32>
    %231 = math.tanh %230 : vector<2x32xf32>
    %cst_51 = arith.constant 1.000000e+00 : f32
    %232 = vector.broadcast %cst_51 : f32 to vector<2x32xf32>
    %233 = arith.subf %232, %226 : vector<2x32xf32>
    %234 = arith.mulf %233, %231 : vector<2x32xf32>
    %235 = arith.mulf %226, %204 : vector<2x32xf32>
    %236 = arith.addf %234, %235 : vector<2x32xf32>
    %c12 = arith.constant 12 : index
    %c0_52 = arith.constant 0 : index
    %237 = vector.load %arg6[%c12, %c0_52] : memref<16x32xf32, #tpu.memory_space<vmem>>, vector<2x32xf32>
    tpu.vector_store %arg6[%c12, %c0_52], %236 {strides = array<i32>} : memref<16x32xf32, #tpu.memory_space<vmem>>, vector<2x32xf32>,
    %238 = arith.truncf %236 : vector<2x32xf32> to vector<2x32xbf16>
    %cst_53 = arith.constant dense<0.000000e+00> : vector<2x384xf32>
    %239 = tpu.matmul %238, %4, %cst_53 {dimension_numbers = #tpu.dot_dimension_numbers<[1], [0], [0], [1], [0, 0, 1, 1], [], []>} : vector<2x32xbf16>, vector<32x384xbf16>, vector<2x384xf32> -> vector<2x384xf32>
    %240 = vector.broadcast %8 : vector<1x384xf32> to vector<2x384xf32>
    %241 = arith.addf %239, %240 : vector<2x384xf32>
    %242 = vector.extract_strided_slice %12 {offsets = [14, 0], sizes = [2, 384], strides = [1, 1]} : vector<16x384xf32> to vector<2x384xf32>
    %243 = vector.extract_strided_slice %242 {offsets = [0, 0], sizes = [2, 32], strides = [1, 1]} : vector<2x384xf32> to vector<2x32xf32>
    %244 = vector.extract_strided_slice %241 {offsets = [0, 0], sizes = [2, 32], strides = [1, 1]} : vector<2x384xf32> to vector<2x32xf32>
    %245 = arith.addf %243, %244 : vector<2x32xf32>
    %246 = arith.negf %245 : vector<2x32xf32>
    %247 = math.exp %246 : vector<2x32xf32>
    %cst_54 = arith.constant 1.000000e+00 : f32
    %248 = vector.broadcast %cst_54 : f32 to vector<2x32xf32>
    %249 = arith.addf %248, %247 : vector<2x32xf32>
    %250 = arith.divf %248, %249 : vector<2x32xf32>
    %251 = vector.extract_strided_slice %242 {offsets = [0, 128], sizes = [2, 32], strides = [1, 1]} : vector<2x384xf32> to vector<2x32xf32>
    %252 = vector.extract_strided_slice %241 {offsets = [0, 128], sizes = [2, 32], strides = [1, 1]} : vector<2x384xf32> to vector<2x32xf32>
    %253 = arith.addf %251, %252 : vector<2x32xf32>
    %254 = arith.negf %253 : vector<2x32xf32>
    %255 = math.exp %254 : vector<2x32xf32>
    %cst_55 = arith.constant 1.000000e+00 : f32
    %256 = vector.broadcast %cst_55 : f32 to vector<2x32xf32>
    %257 = arith.addf %256, %255 : vector<2x32xf32>
    %258 = arith.divf %256, %257 : vector<2x32xf32>
    %259 = vector.extract_strided_slice %242 {offsets = [0, 256], sizes = [2, 32], strides = [1, 1]} : vector<2x384xf32> to vector<2x32xf32>
    %260 = vector.extract_strided_slice %241 {offsets = [0, 256], sizes = [2, 32], strides = [1, 1]} : vector<2x384xf32> to vector<2x32xf32>
    %261 = arith.mulf %250, %260 : vector<2x32xf32>
    %262 = arith.addf %259, %261 : vector<2x32xf32>
    %263 = math.tanh %262 : vector<2x32xf32>
    %cst_56 = arith.constant 1.000000e+00 : f32
    %264 = vector.broadcast %cst_56 : f32 to vector<2x32xf32>
    %265 = arith.subf %264, %258 : vector<2x32xf32>
    %266 = arith.mulf %265, %263 : vector<2x32xf32>
    %267 = arith.mulf %258, %236 : vector<2x32xf32>
    %268 = arith.addf %266, %267 : vector<2x32xf32>
    %c14 = arith.constant 14 : index
    %c0_57 = arith.constant 0 : index
    %269 = vector.load %arg6[%c14, %c0_57] : memref<16x32xf32, #tpu.memory_space<vmem>>, vector<2x32xf32>
    tpu.vector_store %arg6[%c14, %c0_57], %268 {strides = array<i32>} : memref<16x32xf32, #tpu.memory_space<vmem>>, vector<2x32xf32>,
    %c0_58 = arith.constant 0 : index
    %c0_59 = arith.constant 0 : index
    %270 = vector.load %arg6[%c0_58, %c0_59] : memref<16x32xf32, #tpu.memory_space<vmem>>, vector<16x32xf32>
    %c1_60 = arith.constant 1 : index
    %c0_61 = arith.constant 0 : index
    %c0_62 = arith.constant 0 : index
    %c0_63 = arith.constant 0 : index
    %271 = vector.load %arg1[%c1_60, %c0_61, %c0_62, %c0_63] : memref<2x2x32x384xbf16, #tpu.memory_space<vmem>>, vector<1x1x32x384xbf16>
    %272 = vector.shape_cast %271 : vector<1x1x32x384xbf16> to vector<32x384xbf16>
    %c1_64 = arith.constant 1 : index
    %c1_65 = arith.constant 1 : index
    %c0_66 = arith.constant 0 : index
    %c0_67 = arith.constant 0 : index
    %273 = vector.load %arg1[%c1_64, %c1_65, %c0_66, %c0_67] : memref<2x2x32x384xbf16, #tpu.memory_space<vmem>>, vector<1x1x32x384xbf16>
    %274 = vector.shape_cast %273 : vector<1x1x32x384xbf16> to vector<32x384xbf16>
    %c1_68 = arith.constant 1 : index
    %c0_69 = arith.constant 0 : index
    %c0_70 = arith.constant 0 : index
    %c0_71 = arith.constant 0 : index
    %275 = vector.load %arg2[%c1_68, %c0_69, %c0_70, %c0_71] : memref<2x2x1x384xf32, #tpu.memory_space<vmem>>, vector<1x1x1x384xf32>
    %276 = vector.shape_cast %275 : vector<1x1x1x384xf32> to vector<1x384xf32>
    %c1_72 = arith.constant 1 : index
    %c1_73 = arith.constant 1 : index
    %c0_74 = arith.constant 0 : index
    %c0_75 = arith.constant 0 : index
    %277 = vector.load %arg2[%c1_72, %c1_73, %c0_74, %c0_75] : memref<2x2x1x384xf32, #tpu.memory_space<vmem>>, vector<1x1x1x384xf32>
    %278 = vector.shape_cast %277 : vector<1x1x1x384xf32> to vector<1x384xf32>
    %279 = arith.truncf %270 : vector<16x32xf32> to vector<16x32xbf16>
    %cst_76 = arith.constant dense<0.000000e+00> : vector<16x384xf32>
    %280 = tpu.matmul %279, %272, %cst_76 {dimension_numbers = #tpu.dot_dimension_numbers<[1], [0], [0], [1], [0, 0, 1, 1], [], []>} : vector<16x32xbf16>, vector<32x384xbf16>, vector<16x384xf32> -> vector<16x384xf32>
    %281 = vector.broadcast %276 : vector<1x384xf32> to vector<16x384xf32>
    %282 = arith.addf %280, %281 : vector<16x384xf32>
    %cst_77 = arith.constant 0.000000e+00 : f32
    %283 = vector.broadcast %cst_77 : f32 to vector<2x32xf32>
    %284 = arith.truncf %283 : vector<2x32xf32> to vector<2x32xbf16>
    %cst_78 = arith.constant dense<0.000000e+00> : vector<2x384xf32>
    %285 = tpu.matmul %284, %274, %cst_78 {dimension_numbers = #tpu.dot_dimension_numbers<[1], [0], [0], [1], [0, 0, 1, 1], [], []>} : vector<2x32xbf16>, vector<32x384xbf16>, vector<2x384xf32> -> vector<2x384xf32>
    %286 = vector.broadcast %278 : vector<1x384xf32> to vector<2x384xf32>
    %287 = arith.addf %285, %286 : vector<2x384xf32>
    %288 = vector.extract_strided_slice %282 {offsets = [0, 0], sizes = [2, 384], strides = [1, 1]} : vector<16x384xf32> to vector<2x384xf32>
    %289 = vector.extract_strided_slice %288 {offsets = [0, 0], sizes = [2, 32], strides = [1, 1]} : vector<2x384xf32> to vector<2x32xf32>
    %290 = vector.extract_strided_slice %287 {offsets = [0, 0], sizes = [2, 32], strides = [1, 1]} : vector<2x384xf32> to vector<2x32xf32>
    %291 = arith.addf %289, %290 : vector<2x32xf32>
    %292 = arith.negf %291 : vector<2x32xf32>
    %293 = math.exp %292 : vector<2x32xf32>
    %cst_79 = arith.constant 1.000000e+00 : f32
    %294 = vector.broadcast %cst_79 : f32 to vector<2x32xf32>
    %295 = arith.addf %294, %293 : vector<2x32xf32>
    %296 = arith.divf %294, %295 : vector<2x32xf32>
    %297 = vector.extract_strided_slice %288 {offsets = [0, 128], sizes = [2, 32], strides = [1, 1]} : vector<2x384xf32> to vector<2x32xf32>
    %298 = vector.extract_strided_slice %287 {offsets = [0, 128], sizes = [2, 32], strides = [1, 1]} : vector<2x384xf32> to vector<2x32xf32>
    %299 = arith.addf %297, %298 : vector<2x32xf32>
    %300 = arith.negf %299 : vector<2x32xf32>
    %301 = math.exp %300 : vector<2x32xf32>
    %cst_80 = arith.constant 1.000000e+00 : f32
    %302 = vector.broadcast %cst_80 : f32 to vector<2x32xf32>
    %303 = arith.addf %302, %301 : vector<2x32xf32>
    %304 = arith.divf %302, %303 : vector<2x32xf32>
    %305 = vector.extract_strided_slice %288 {offsets = [0, 256], sizes = [2, 32], strides = [1, 1]} : vector<2x384xf32> to vector<2x32xf32>
    %306 = vector.extract_strided_slice %287 {offsets = [0, 256], sizes = [2, 32], strides = [1, 1]} : vector<2x384xf32> to vector<2x32xf32>
    %307 = arith.mulf %296, %306 : vector<2x32xf32>
    %308 = arith.addf %305, %307 : vector<2x32xf32>
    %309 = math.tanh %308 : vector<2x32xf32>
    %cst_81 = arith.constant 1.000000e+00 : f32
    %310 = vector.broadcast %cst_81 : f32 to vector<2x32xf32>
    %311 = arith.subf %310, %304 : vector<2x32xf32>
    %312 = arith.mulf %311, %309 : vector<2x32xf32>
    %313 = arith.mulf %304, %283 : vector<2x32xf32>
    %314 = arith.addf %312, %313 : vector<2x32xf32>
    %c0_82 = arith.constant 0 : index
    %c0_83 = arith.constant 0 : index
    %315 = vector.load %arg6[%c0_82, %c0_83] : memref<16x32xf32, #tpu.memory_space<vmem>>, vector<2x32xf32>
    tpu.vector_store %arg6[%c0_82, %c0_83], %314 {strides = array<i32>} : memref<16x32xf32, #tpu.memory_space<vmem>>, vector<2x32xf32>,
    %316 = arith.truncf %314 : vector<2x32xf32> to vector<2x32xbf16>
    %cst_84 = arith.constant dense<0.000000e+00> : vector<2x384xf32>
    %317 = tpu.matmul %316, %274, %cst_84 {dimension_numbers = #tpu.dot_dimension_numbers<[1], [0], [0], [1], [0, 0, 1, 1], [], []>} : vector<2x32xbf16>, vector<32x384xbf16>, vector<2x384xf32> -> vector<2x384xf32>
    %318 = vector.broadcast %278 : vector<1x384xf32> to vector<2x384xf32>
    %319 = arith.addf %317, %318 : vector<2x384xf32>
    %320 = vector.extract_strided_slice %282 {offsets = [2, 0], sizes = [2, 384], strides = [1, 1]} : vector<16x384xf32> to vector<2x384xf32>
    %321 = vector.extract_strided_slice %320 {offsets = [0, 0], sizes = [2, 32], strides = [1, 1]} : vector<2x384xf32> to vector<2x32xf32>
    %322 = vector.extract_strided_slice %319 {offsets = [0, 0], sizes = [2, 32], strides = [1, 1]} : vector<2x384xf32> to vector<2x32xf32>
    %323 = arith.addf %321, %322 : vector<2x32xf32>
    %324 = arith.negf %323 : vector<2x32xf32>
    %325 = math.exp %324 : vector<2x32xf32>
    %cst_85 = arith.constant 1.000000e+00 : f32
    %326 = vector.broadcast %cst_85 : f32 to vector<2x32xf32>
    %327 = arith.addf %326, %325 : vector<2x32xf32>
    %328 = arith.divf %326, %327 : vector<2x32xf32>
    %329 = vector.extract_strided_slice %320 {offsets = [0, 128], sizes = [2, 32], strides = [1, 1]} : vector<2x384xf32> to vector<2x32xf32>
    %330 = vector.extract_strided_slice %319 {offsets = [0, 128], sizes = [2, 32], strides = [1, 1]} : vector<2x384xf32> to vector<2x32xf32>
    %331 = arith.addf %329, %330 : vector<2x32xf32>
    %332 = arith.negf %331 : vector<2x32xf32>
    %333 = math.exp %332 : vector<2x32xf32>
    %cst_86 = arith.constant 1.000000e+00 : f32
    %334 = vector.broadcast %cst_86 : f32 to vector<2x32xf32>
    %335 = arith.addf %334, %333 : vector<2x32xf32>
    %336 = arith.divf %334, %335 : vector<2x32xf32>
    %337 = vector.extract_strided_slice %320 {offsets = [0, 256], sizes = [2, 32], strides = [1, 1]} : vector<2x384xf32> to vector<2x32xf32>
    %338 = vector.extract_strided_slice %319 {offsets = [0, 256], sizes = [2, 32], strides = [1, 1]} : vector<2x384xf32> to vector<2x32xf32>
    %339 = arith.mulf %328, %338 : vector<2x32xf32>
    %340 = arith.addf %337, %339 : vector<2x32xf32>
    %341 = math.tanh %340 : vector<2x32xf32>
    %cst_87 = arith.constant 1.000000e+00 : f32
    %342 = vector.broadcast %cst_87 : f32 to vector<2x32xf32>
    %343 = arith.subf %342, %336 : vector<2x32xf32>
    %344 = arith.mulf %343, %341 : vector<2x32xf32>
    %345 = arith.mulf %336, %314 : vector<2x32xf32>
    %346 = arith.addf %344, %345 : vector<2x32xf32>
    %c2_88 = arith.constant 2 : index
    %c0_89 = arith.constant 0 : index
    %347 = vector.load %arg6[%c2_88, %c0_89] : memref<16x32xf32, #tpu.memory_space<vmem>>, vector<2x32xf32>
    tpu.vector_store %arg6[%c2_88, %c0_89], %346 {strides = array<i32>} : memref<16x32xf32, #tpu.memory_space<vmem>>, vector<2x32xf32>,
    %348 = arith.truncf %346 : vector<2x32xf32> to vector<2x32xbf16>
    %cst_90 = arith.constant dense<0.000000e+00> : vector<2x384xf32>
    %349 = tpu.matmul %348, %274, %cst_90 {dimension_numbers = #tpu.dot_dimension_numbers<[1], [0], [0], [1], [0, 0, 1, 1], [], []>} : vector<2x32xbf16>, vector<32x384xbf16>, vector<2x384xf32> -> vector<2x384xf32>
    %350 = vector.broadcast %278 : vector<1x384xf32> to vector<2x384xf32>
    %351 = arith.addf %349, %350 : vector<2x384xf32>
    %352 = vector.extract_strided_slice %282 {offsets = [4, 0], sizes = [2, 384], strides = [1, 1]} : vector<16x384xf32> to vector<2x384xf32>
    %353 = vector.extract_strided_slice %352 {offsets = [0, 0], sizes = [2, 32], strides = [1, 1]} : vector<2x384xf32> to vector<2x32xf32>
    %354 = vector.extract_strided_slice %351 {offsets = [0, 0], sizes = [2, 32], strides = [1, 1]} : vector<2x384xf32> to vector<2x32xf32>
    %355 = arith.addf %353, %354 : vector<2x32xf32>
    %356 = arith.negf %355 : vector<2x32xf32>
    %357 = math.exp %356 : vector<2x32xf32>
    %cst_91 = arith.constant 1.000000e+00 : f32
    %358 = vector.broadcast %cst_91 : f32 to vector<2x32xf32>
    %359 = arith.addf %358, %357 : vector<2x32xf32>
    %360 = arith.divf %358, %359 : vector<2x32xf32>
    %361 = vector.extract_strided_slice %352 {offsets = [0, 128], sizes = [2, 32], strides = [1, 1]} : vector<2x384xf32> to vector<2x32xf32>
    %362 = vector.extract_strided_slice %351 {offsets = [0, 128], sizes = [2, 32], strides = [1, 1]} : vector<2x384xf32> to vector<2x32xf32>
    %363 = arith.addf %361, %362 : vector<2x32xf32>
    %364 = arith.negf %363 : vector<2x32xf32>
    %365 = math.exp %364 : vector<2x32xf32>
    %cst_92 = arith.constant 1.000000e+00 : f32
    %366 = vector.broadcast %cst_92 : f32 to vector<2x32xf32>
    %367 = arith.addf %366, %365 : vector<2x32xf32>
    %368 = arith.divf %366, %367 : vector<2x32xf32>
    %369 = vector.extract_strided_slice %352 {offsets = [0, 256], sizes = [2, 32], strides = [1, 1]} : vector<2x384xf32> to vector<2x32xf32>
    %370 = vector.extract_strided_slice %351 {offsets = [0, 256], sizes = [2, 32], strides = [1, 1]} : vector<2x384xf32> to vector<2x32xf32>
    %371 = arith.mulf %360, %370 : vector<2x32xf32>
    %372 = arith.addf %369, %371 : vector<2x32xf32>
    %373 = math.tanh %372 : vector<2x32xf32>
    %cst_93 = arith.constant 1.000000e+00 : f32
    %374 = vector.broadcast %cst_93 : f32 to vector<2x32xf32>
    %375 = arith.subf %374, %368 : vector<2x32xf32>
    %376 = arith.mulf %375, %373 : vector<2x32xf32>
    %377 = arith.mulf %368, %346 : vector<2x32xf32>
    %378 = arith.addf %376, %377 : vector<2x32xf32>
    %c4_94 = arith.constant 4 : index
    %c0_95 = arith.constant 0 : index
    %379 = vector.load %arg6[%c4_94, %c0_95] : memref<16x32xf32, #tpu.memory_space<vmem>>, vector<2x32xf32>
    tpu.vector_store %arg6[%c4_94, %c0_95], %378 {strides = array<i32>} : memref<16x32xf32, #tpu.memory_space<vmem>>, vector<2x32xf32>,
    %380 = arith.truncf %378 : vector<2x32xf32> to vector<2x32xbf16>
    %cst_96 = arith.constant dense<0.000000e+00> : vector<2x384xf32>
    %381 = tpu.matmul %380, %274, %cst_96 {dimension_numbers = #tpu.dot_dimension_numbers<[1], [0], [0], [1], [0, 0, 1, 1], [], []>} : vector<2x32xbf16>, vector<32x384xbf16>, vector<2x384xf32> -> vector<2x384xf32>
    %382 = vector.broadcast %278 : vector<1x384xf32> to vector<2x384xf32>
    %383 = arith.addf %381, %382 : vector<2x384xf32>
    %384 = vector.extract_strided_slice %282 {offsets = [6, 0], sizes = [2, 384], strides = [1, 1]} : vector<16x384xf32> to vector<2x384xf32>
    %385 = vector.extract_strided_slice %384 {offsets = [0, 0], sizes = [2, 32], strides = [1, 1]} : vector<2x384xf32> to vector<2x32xf32>
    %386 = vector.extract_strided_slice %383 {offsets = [0, 0], sizes = [2, 32], strides = [1, 1]} : vector<2x384xf32> to vector<2x32xf32>
    %387 = arith.addf %385, %386 : vector<2x32xf32>
    %388 = arith.negf %387 : vector<2x32xf32>
    %389 = math.exp %388 : vector<2x32xf32>
    %cst_97 = arith.constant 1.000000e+00 : f32
    %390 = vector.broadcast %cst_97 : f32 to vector<2x32xf32>
    %391 = arith.addf %390, %389 : vector<2x32xf32>
    %392 = arith.divf %390, %391 : vector<2x32xf32>
    %393 = vector.extract_strided_slice %384 {offsets = [0, 128], sizes = [2, 32], strides = [1, 1]} : vector<2x384xf32> to vector<2x32xf32>
    %394 = vector.extract_strided_slice %383 {offsets = [0, 128], sizes = [2, 32], strides = [1, 1]} : vector<2x384xf32> to vector<2x32xf32>
    %395 = arith.addf %393, %394 : vector<2x32xf32>
    %396 = arith.negf %395 : vector<2x32xf32>
    %397 = math.exp %396 : vector<2x32xf32>
    %cst_98 = arith.constant 1.000000e+00 : f32
    %398 = vector.broadcast %cst_98 : f32 to vector<2x32xf32>
    %399 = arith.addf %398, %397 : vector<2x32xf32>
    %400 = arith.divf %398, %399 : vector<2x32xf32>
    %401 = vector.extract_strided_slice %384 {offsets = [0, 256], sizes = [2, 32], strides = [1, 1]} : vector<2x384xf32> to vector<2x32xf32>
    %402 = vector.extract_strided_slice %383 {offsets = [0, 256], sizes = [2, 32], strides = [1, 1]} : vector<2x384xf32> to vector<2x32xf32>
    %403 = arith.mulf %392, %402 : vector<2x32xf32>
    %404 = arith.addf %401, %403 : vector<2x32xf32>
    %405 = math.tanh %404 : vector<2x32xf32>
    %cst_99 = arith.constant 1.000000e+00 : f32
    %406 = vector.broadcast %cst_99 : f32 to vector<2x32xf32>
    %407 = arith.subf %406, %400 : vector<2x32xf32>
    %408 = arith.mulf %407, %405 : vector<2x32xf32>
    %409 = arith.mulf %400, %378 : vector<2x32xf32>
    %410 = arith.addf %408, %409 : vector<2x32xf32>
    %c6_100 = arith.constant 6 : index
    %c0_101 = arith.constant 0 : index
    %411 = vector.load %arg6[%c6_100, %c0_101] : memref<16x32xf32, #tpu.memory_space<vmem>>, vector<2x32xf32>
    tpu.vector_store %arg6[%c6_100, %c0_101], %410 {strides = array<i32>} : memref<16x32xf32, #tpu.memory_space<vmem>>, vector<2x32xf32>,
    %412 = arith.truncf %410 : vector<2x32xf32> to vector<2x32xbf16>
    %cst_102 = arith.constant dense<0.000000e+00> : vector<2x384xf32>
    %413 = tpu.matmul %412, %274, %cst_102 {dimension_numbers = #tpu.dot_dimension_numbers<[1], [0], [0], [1], [0, 0, 1, 1], [], []>} : vector<2x32xbf16>, vector<32x384xbf16>, vector<2x384xf32> -> vector<2x384xf32>
    %414 = vector.broadcast %278 : vector<1x384xf32> to vector<2x384xf32>
    %415 = arith.addf %413, %414 : vector<2x384xf32>
    %416 = vector.extract_strided_slice %282 {offsets = [8, 0], sizes = [2, 384], strides = [1, 1]} : vector<16x384xf32> to vector<2x384xf32>
    %417 = vector.extract_strided_slice %416 {offsets = [0, 0], sizes = [2, 32], strides = [1, 1]} : vector<2x384xf32> to vector<2x32xf32>
    %418 = vector.extract_strided_slice %415 {offsets = [0, 0], sizes = [2, 32], strides = [1, 1]} : vector<2x384xf32> to vector<2x32xf32>
    %419 = arith.addf %417, %418 : vector<2x32xf32>
    %420 = arith.negf %419 : vector<2x32xf32>
    %421 = math.exp %420 : vector<2x32xf32>
    %cst_103 = arith.constant 1.000000e+00 : f32
    %422 = vector.broadcast %cst_103 : f32 to vector<2x32xf32>
    %423 = arith.addf %422, %421 : vector<2x32xf32>
    %424 = arith.divf %422, %423 : vector<2x32xf32>
    %425 = vector.extract_strided_slice %416 {offsets = [0, 128], sizes = [2, 32], strides = [1, 1]} : vector<2x384xf32> to vector<2x32xf32>
    %426 = vector.extract_strided_slice %415 {offsets = [0, 128], sizes = [2, 32], strides = [1, 1]} : vector<2x384xf32> to vector<2x32xf32>
    %427 = arith.addf %425, %426 : vector<2x32xf32>
    %428 = arith.negf %427 : vector<2x32xf32>
    %429 = math.exp %428 : vector<2x32xf32>
    %cst_104 = arith.constant 1.000000e+00 : f32
    %430 = vector.broadcast %cst_104 : f32 to vector<2x32xf32>
    %431 = arith.addf %430, %429 : vector<2x32xf32>
    %432 = arith.divf %430, %431 : vector<2x32xf32>
    %433 = vector.extract_strided_slice %416 {offsets = [0, 256], sizes = [2, 32], strides = [1, 1]} : vector<2x384xf32> to vector<2x32xf32>
    %434 = vector.extract_strided_slice %415 {offsets = [0, 256], sizes = [2, 32], strides = [1, 1]} : vector<2x384xf32> to vector<2x32xf32>
    %435 = arith.mulf %424, %434 : vector<2x32xf32>
    %436 = arith.addf %433, %435 : vector<2x32xf32>
    %437 = math.tanh %436 : vector<2x32xf32>
    %cst_105 = arith.constant 1.000000e+00 : f32
    %438 = vector.broadcast %cst_105 : f32 to vector<2x32xf32>
    %439 = arith.subf %438, %432 : vector<2x32xf32>
    %440 = arith.mulf %439, %437 : vector<2x32xf32>
    %441 = arith.mulf %432, %410 : vector<2x32xf32>
    %442 = arith.addf %440, %441 : vector<2x32xf32>
    %c8_106 = arith.constant 8 : index
    %c0_107 = arith.constant 0 : index
    %443 = vector.load %arg6[%c8_106, %c0_107] : memref<16x32xf32, #tpu.memory_space<vmem>>, vector<2x32xf32>
    tpu.vector_store %arg6[%c8_106, %c0_107], %442 {strides = array<i32>} : memref<16x32xf32, #tpu.memory_space<vmem>>, vector<2x32xf32>,
    %444 = arith.truncf %442 : vector<2x32xf32> to vector<2x32xbf16>
    %cst_108 = arith.constant dense<0.000000e+00> : vector<2x384xf32>
    %445 = tpu.matmul %444, %274, %cst_108 {dimension_numbers = #tpu.dot_dimension_numbers<[1], [0], [0], [1], [0, 0, 1, 1], [], []>} : vector<2x32xbf16>, vector<32x384xbf16>, vector<2x384xf32> -> vector<2x384xf32>
    %446 = vector.broadcast %278 : vector<1x384xf32> to vector<2x384xf32>
    %447 = arith.addf %445, %446 : vector<2x384xf32>
    %448 = vector.extract_strided_slice %282 {offsets = [10, 0], sizes = [2, 384], strides = [1, 1]} : vector<16x384xf32> to vector<2x384xf32>
    %449 = vector.extract_strided_slice %448 {offsets = [0, 0], sizes = [2, 32], strides = [1, 1]} : vector<2x384xf32> to vector<2x32xf32>
    %450 = vector.extract_strided_slice %447 {offsets = [0, 0], sizes = [2, 32], strides = [1, 1]} : vector<2x384xf32> to vector<2x32xf32>
    %451 = arith.addf %449, %450 : vector<2x32xf32>
    %452 = arith.negf %451 : vector<2x32xf32>
    %453 = math.exp %452 : vector<2x32xf32>
    %cst_109 = arith.constant 1.000000e+00 : f32
    %454 = vector.broadcast %cst_109 : f32 to vector<2x32xf32>
    %455 = arith.addf %454, %453 : vector<2x32xf32>
    %456 = arith.divf %454, %455 : vector<2x32xf32>
    %457 = vector.extract_strided_slice %448 {offsets = [0, 128], sizes = [2, 32], strides = [1, 1]} : vector<2x384xf32> to vector<2x32xf32>
    %458 = vector.extract_strided_slice %447 {offsets = [0, 128], sizes = [2, 32], strides = [1, 1]} : vector<2x384xf32> to vector<2x32xf32>
    %459 = arith.addf %457, %458 : vector<2x32xf32>
    %460 = arith.negf %459 : vector<2x32xf32>
    %461 = math.exp %460 : vector<2x32xf32>
    %cst_110 = arith.constant 1.000000e+00 : f32
    %462 = vector.broadcast %cst_110 : f32 to vector<2x32xf32>
    %463 = arith.addf %462, %461 : vector<2x32xf32>
    %464 = arith.divf %462, %463 : vector<2x32xf32>
    %465 = vector.extract_strided_slice %448 {offsets = [0, 256], sizes = [2, 32], strides = [1, 1]} : vector<2x384xf32> to vector<2x32xf32>
    %466 = vector.extract_strided_slice %447 {offsets = [0, 256], sizes = [2, 32], strides = [1, 1]} : vector<2x384xf32> to vector<2x32xf32>
    %467 = arith.mulf %456, %466 : vector<2x32xf32>
    %468 = arith.addf %465, %467 : vector<2x32xf32>
    %469 = math.tanh %468 : vector<2x32xf32>
    %cst_111 = arith.constant 1.000000e+00 : f32
    %470 = vector.broadcast %cst_111 : f32 to vector<2x32xf32>
    %471 = arith.subf %470, %464 : vector<2x32xf32>
    %472 = arith.mulf %471, %469 : vector<2x32xf32>
    %473 = arith.mulf %464, %442 : vector<2x32xf32>
    %474 = arith.addf %472, %473 : vector<2x32xf32>
    %c10_112 = arith.constant 10 : index
    %c0_113 = arith.constant 0 : index
    %475 = vector.load %arg6[%c10_112, %c0_113] : memref<16x32xf32, #tpu.memory_space<vmem>>, vector<2x32xf32>
    tpu.vector_store %arg6[%c10_112, %c0_113], %474 {strides = array<i32>} : memref<16x32xf32, #tpu.memory_space<vmem>>, vector<2x32xf32>,
    %476 = arith.truncf %474 : vector<2x32xf32> to vector<2x32xbf16>
    %cst_114 = arith.constant dense<0.000000e+00> : vector<2x384xf32>
    %477 = tpu.matmul %476, %274, %cst_114 {dimension_numbers = #tpu.dot_dimension_numbers<[1], [0], [0], [1], [0, 0, 1, 1], [], []>} : vector<2x32xbf16>, vector<32x384xbf16>, vector<2x384xf32> -> vector<2x384xf32>
    %478 = vector.broadcast %278 : vector<1x384xf32> to vector<2x384xf32>
    %479 = arith.addf %477, %478 : vector<2x384xf32>
    %480 = vector.extract_strided_slice %282 {offsets = [12, 0], sizes = [2, 384], strides = [1, 1]} : vector<16x384xf32> to vector<2x384xf32>
    %481 = vector.extract_strided_slice %480 {offsets = [0, 0], sizes = [2, 32], strides = [1, 1]} : vector<2x384xf32> to vector<2x32xf32>
    %482 = vector.extract_strided_slice %479 {offsets = [0, 0], sizes = [2, 32], strides = [1, 1]} : vector<2x384xf32> to vector<2x32xf32>
    %483 = arith.addf %481, %482 : vector<2x32xf32>
    %484 = arith.negf %483 : vector<2x32xf32>
    %485 = math.exp %484 : vector<2x32xf32>
    %cst_115 = arith.constant 1.000000e+00 : f32
    %486 = vector.broadcast %cst_115 : f32 to vector<2x32xf32>
    %487 = arith.addf %486, %485 : vector<2x32xf32>
    %488 = arith.divf %486, %487 : vector<2x32xf32>
    %489 = vector.extract_strided_slice %480 {offsets = [0, 128], sizes = [2, 32], strides = [1, 1]} : vector<2x384xf32> to vector<2x32xf32>
    %490 = vector.extract_strided_slice %479 {offsets = [0, 128], sizes = [2, 32], strides = [1, 1]} : vector<2x384xf32> to vector<2x32xf32>
    %491 = arith.addf %489, %490 : vector<2x32xf32>
    %492 = arith.negf %491 : vector<2x32xf32>
    %493 = math.exp %492 : vector<2x32xf32>
    %cst_116 = arith.constant 1.000000e+00 : f32
    %494 = vector.broadcast %cst_116 : f32 to vector<2x32xf32>
    %495 = arith.addf %494, %493 : vector<2x32xf32>
    %496 = arith.divf %494, %495 : vector<2x32xf32>
    %497 = vector.extract_strided_slice %480 {offsets = [0, 256], sizes = [2, 32], strides = [1, 1]} : vector<2x384xf32> to vector<2x32xf32>
    %498 = vector.extract_strided_slice %479 {offsets = [0, 256], sizes = [2, 32], strides = [1, 1]} : vector<2x384xf32> to vector<2x32xf32>
    %499 = arith.mulf %488, %498 : vector<2x32xf32>
    %500 = arith.addf %497, %499 : vector<2x32xf32>
    %501 = math.tanh %500 : vector<2x32xf32>
    %cst_117 = arith.constant 1.000000e+00 : f32
    %502 = vector.broadcast %cst_117 : f32 to vector<2x32xf32>
    %503 = arith.subf %502, %496 : vector<2x32xf32>
    %504 = arith.mulf %503, %501 : vector<2x32xf32>
    %505 = arith.mulf %496, %474 : vector<2x32xf32>
    %506 = arith.addf %504, %505 : vector<2x32xf32>
    %c12_118 = arith.constant 12 : index
    %c0_119 = arith.constant 0 : index
    %507 = vector.load %arg6[%c12_118, %c0_119] : memref<16x32xf32, #tpu.memory_space<vmem>>, vector<2x32xf32>
    tpu.vector_store %arg6[%c12_118, %c0_119], %506 {strides = array<i32>} : memref<16x32xf32, #tpu.memory_space<vmem>>, vector<2x32xf32>,
    %508 = arith.truncf %506 : vector<2x32xf32> to vector<2x32xbf16>
    %cst_120 = arith.constant dense<0.000000e+00> : vector<2x384xf32>
    %509 = tpu.matmul %508, %274, %cst_120 {dimension_numbers = #tpu.dot_dimension_numbers<[1], [0], [0], [1], [0, 0, 1, 1], [], []>} : vector<2x32xbf16>, vector<32x384xbf16>, vector<2x384xf32> -> vector<2x384xf32>
    %510 = vector.broadcast %278 : vector<1x384xf32> to vector<2x384xf32>
    %511 = arith.addf %509, %510 : vector<2x384xf32>
    %512 = vector.extract_strided_slice %282 {offsets = [14, 0], sizes = [2, 384], strides = [1, 1]} : vector<16x384xf32> to vector<2x384xf32>
    %513 = vector.extract_strided_slice %512 {offsets = [0, 0], sizes = [2, 32], strides = [1, 1]} : vector<2x384xf32> to vector<2x32xf32>
    %514 = vector.extract_strided_slice %511 {offsets = [0, 0], sizes = [2, 32], strides = [1, 1]} : vector<2x384xf32> to vector<2x32xf32>
    %515 = arith.addf %513, %514 : vector<2x32xf32>
    %516 = arith.negf %515 : vector<2x32xf32>
    %517 = math.exp %516 : vector<2x32xf32>
    %cst_121 = arith.constant 1.000000e+00 : f32
    %518 = vector.broadcast %cst_121 : f32 to vector<2x32xf32>
    %519 = arith.addf %518, %517 : vector<2x32xf32>
    %520 = arith.divf %518, %519 : vector<2x32xf32>
    %521 = vector.extract_strided_slice %512 {offsets = [0, 128], sizes = [2, 32], strides = [1, 1]} : vector<2x384xf32> to vector<2x32xf32>
    %522 = vector.extract_strided_slice %511 {offsets = [0, 128], sizes = [2, 32], strides = [1, 1]} : vector<2x384xf32> to vector<2x32xf32>
    %523 = arith.addf %521, %522 : vector<2x32xf32>
    %524 = arith.negf %523 : vector<2x32xf32>
    %525 = math.exp %524 : vector<2x32xf32>
    %cst_122 = arith.constant 1.000000e+00 : f32
    %526 = vector.broadcast %cst_122 : f32 to vector<2x32xf32>
    %527 = arith.addf %526, %525 : vector<2x32xf32>
    %528 = arith.divf %526, %527 : vector<2x32xf32>
    %529 = vector.extract_strided_slice %512 {offsets = [0, 256], sizes = [2, 32], strides = [1, 1]} : vector<2x384xf32> to vector<2x32xf32>
    %530 = vector.extract_strided_slice %511 {offsets = [0, 256], sizes = [2, 32], strides = [1, 1]} : vector<2x384xf32> to vector<2x32xf32>
    %531 = arith.mulf %520, %530 : vector<2x32xf32>
    %532 = arith.addf %529, %531 : vector<2x32xf32>
    %533 = math.tanh %532 : vector<2x32xf32>
    %cst_123 = arith.constant 1.000000e+00 : f32
    %534 = vector.broadcast %cst_123 : f32 to vector<2x32xf32>
    %535 = arith.subf %534, %528 : vector<2x32xf32>
    %536 = arith.mulf %535, %533 : vector<2x32xf32>
    %537 = arith.mulf %528, %506 : vector<2x32xf32>
    %538 = arith.addf %536, %537 : vector<2x32xf32>
    %c14_124 = arith.constant 14 : index
    %c0_125 = arith.constant 0 : index
    %539 = vector.load %arg6[%c14_124, %c0_125] : memref<16x32xf32, #tpu.memory_space<vmem>>, vector<2x32xf32>
    tpu.vector_store %arg6[%c14_124, %c0_125], %538 {strides = array<i32>} : memref<16x32xf32, #tpu.memory_space<vmem>>, vector<2x32xf32>,
    %c0_126 = arith.constant 0 : index
    %c0_127 = arith.constant 0 : index
    %540 = vector.load %arg6[%c0_126, %c0_127] : memref<16x32xf32, #tpu.memory_space<vmem>>, vector<16x32xf32>
    %541 = vector.extract_strided_slice %540 {offsets = [0, 0], sizes = [2, 32], strides = [1, 1]} : vector<16x32xf32> to vector<2x32xf32>
    %542 = vector.extract_strided_slice %540 {offsets = [2, 0], sizes = [2, 32], strides = [1, 1]} : vector<16x32xf32> to vector<2x32xf32>
    %543 = arith.addf %541, %542 : vector<2x32xf32>
    %544 = vector.extract_strided_slice %540 {offsets = [4, 0], sizes = [2, 32], strides = [1, 1]} : vector<16x32xf32> to vector<2x32xf32>
    %545 = arith.addf %543, %544 : vector<2x32xf32>
    %546 = vector.extract_strided_slice %540 {offsets = [6, 0], sizes = [2, 32], strides = [1, 1]} : vector<16x32xf32> to vector<2x32xf32>
    %547 = arith.addf %545, %546 : vector<2x32xf32>
    %548 = vector.extract_strided_slice %540 {offsets = [8, 0], sizes = [2, 32], strides = [1, 1]} : vector<16x32xf32> to vector<2x32xf32>
    %549 = arith.addf %547, %548 : vector<2x32xf32>
    %550 = vector.extract_strided_slice %540 {offsets = [10, 0], sizes = [2, 32], strides = [1, 1]} : vector<16x32xf32> to vector<2x32xf32>
    %551 = arith.addf %549, %550 : vector<2x32xf32>
    %552 = vector.extract_strided_slice %540 {offsets = [12, 0], sizes = [2, 32], strides = [1, 1]} : vector<16x32xf32> to vector<2x32xf32>
    %553 = arith.addf %551, %552 : vector<2x32xf32>
    %554 = vector.extract_strided_slice %540 {offsets = [14, 0], sizes = [2, 32], strides = [1, 1]} : vector<16x32xf32> to vector<2x32xf32>
    %555 = arith.addf %553, %554 : vector<2x32xf32>
    %cst_128 = arith.constant 1.250000e-01 : f32
    %556 = vector.broadcast %cst_128 : f32 to vector<2x32xf32>
    %557 = arith.mulf %555, %556 : vector<2x32xf32>
    %558 = arith.truncf %557 : vector<2x32xf32> to vector<2x32xbf16>
    %c0_129 = arith.constant 0 : index
    %c0_130 = arith.constant 0 : index
    %c0_131 = arith.constant 0 : index
    %559 = vector.load %arg3[%c0_129, %c0_130, %c0_131] : memref<2x32x32xbf16, #tpu.memory_space<vmem>>, vector<1x32x32xbf16>
    %560 = vector.shape_cast %559 : vector<1x32x32xbf16> to vector<32x32xbf16>
    %cst_132 = arith.constant dense<0.000000e+00> : vector<2x32xf32>
    %561 = tpu.matmul %558, %560, %cst_132 {dimension_numbers = #tpu.dot_dimension_numbers<[1], [0], [0], [1], [0, 0, 1, 1], [], []>} : vector<2x32xbf16>, vector<32x32xbf16>, vector<2x32xf32> -> vector<2x32xf32>
    %c0_133 = arith.constant 0 : index
    %c0_134 = arith.constant 0 : index
    %c0_135 = arith.constant 0 : index
    %562 = vector.load %arg4[%c0_133, %c0_134, %c0_135] : memref<2x1x32xf32, #tpu.memory_space<vmem>>, vector<1x1x32xf32>
    %563 = vector.shape_cast %562 : vector<1x1x32xf32> to vector<1x32xf32>
    %564 = vector.broadcast %563 : vector<1x32xf32> to vector<2x32xf32>
    %565 = arith.addf %561, %564 : vector<2x32xf32>
    %cst_136 = arith.constant 0.000000e+00 : f32
    %566 = vector.broadcast %cst_136 : f32 to vector<2x32xf32>
    %567 = arith.maximumf %565, %566 : vector<2x32xf32>
    %568 = arith.truncf %567 : vector<2x32xf32> to vector<2x32xbf16>
    %c1_137 = arith.constant 1 : index
    %c0_138 = arith.constant 0 : index
    %c0_139 = arith.constant 0 : index
    %569 = vector.load %arg3[%c1_137, %c0_138, %c0_139] : memref<2x32x32xbf16, #tpu.memory_space<vmem>>, vector<1x32x32xbf16>
    %570 = vector.shape_cast %569 : vector<1x32x32xbf16> to vector<32x32xbf16>
    %cst_140 = arith.constant dense<0.000000e+00> : vector<2x32xf32>
    %571 = tpu.matmul %568, %570, %cst_140 {dimension_numbers = #tpu.dot_dimension_numbers<[1], [0], [0], [1], [0, 0, 1, 1], [], []>} : vector<2x32xbf16>, vector<32x32xbf16>, vector<2x32xf32> -> vector<2x32xf32>
    %c1_141 = arith.constant 1 : index
    %c0_142 = arith.constant 0 : index
    %c0_143 = arith.constant 0 : index
    %572 = vector.load %arg4[%c1_141, %c0_142, %c0_143] : memref<2x1x32xf32, #tpu.memory_space<vmem>>, vector<1x1x32xf32>
    %573 = vector.shape_cast %572 : vector<1x1x32xf32> to vector<1x32xf32>
    %574 = vector.broadcast %573 : vector<1x32xf32> to vector<2x32xf32>
    %575 = arith.addf %571, %574 : vector<2x32xf32>
    %c0_144 = arith.constant 0 : index
    %c0_145 = arith.constant 0 : index
    %576 = vector.load %arg5[%c0_144, %c0_145] : memref<2x32xf32, #tpu.memory_space<vmem>>, vector<2x32xf32>
    tpu.vector_store %arg5[%c0_144, %c0_145], %575 {strides = array<i32>} : memref<2x32xf32, #tpu.memory_space<vmem>>, vector<2x32xf32>,
    return
  }
}

</mosaic_0001>

<bundles_post_ra>
// kernel: gru_classifier_forward.1
= control target key start
LH: loop header
LB: loop body
LE: loop exit
PB: predicated region body
PF: predicated region fallthrough
CT: control target
= control target key end

     0   :  { %10 = vsyncpa [#allocation4], 0  ;;  %s3064_s0 = inlined_call_operand.vmem [shape: f32[16,32], index: 0, kind: input, shape index: {}]   ;;  %s3065_s1 = inlined_call_operand.hbm [shape: bf16[2,2,32,384], index: 1, kind: input, shape index: {}]   ;;  %s3066_s2 = inlined_call_operand.vmem [shape: f32[2,2,1,384], index: 2, kind: input, shape index: {}]   ;;  %s3067_s3 = inlined_call_operand.vmem [shape: bf16[2,32,32], index: 3, kind: input, shape index: {}]   ;;  %s3068_s4 = inlined_call_operand.vmem [shape: f32[2,1,32], index: 4, kind: input, shape index: {}]   ;;  %s3069_s5 = inlined_call_operand.hbm [shape: f32[2,32], index: 5, kind: output, shape index: {}]  }
   0x1   :  { %11 = vsyncpa [#allocation5], 0  ;;  %s18_s20 = sshll.u32 %s3065_s1, 4  ;;  %s2526_s21 = smov [#allocation3]   ;;  %s19_s20 = int_to_ptr.hbm [resolvable:$true] %s18_s20 }
   0x2   :  { %s20_s22 = sshll.u32 %s2526_s21, 4  ;;  %s2527_s23 = smov 192   ;;  %s21_s22 = int_to_ptr.vmem [resolvable:$true] %s20_s22 }
   0x3   :  { %s2528_s24 = smov 12  }
   0x4   :  { %26 = dma.hbm_to_vmem [thread:$0]  %s19_s20, 3072, %s21_s22, [#allocation4], %s2527_s23, %s2527_s23, %s2528_s24  }
   0x5   :  { %2522 = dma.done.wait [#allocation4], 3072  }
   0x6   :  { %2523 = vsyncadd [#allocation4], 4294964224  ;;  %v2092_v0 = vld [vmem:[#allocation3 + $0x18] sm:$0xf]  ;;  %v2283_v1 = vld [vmem:[#allocation3 + $0x20] sm:$0xf0] }
   0x7   :  { %v2119_v2 = vld [vmem:[#allocation3 + $0x48] sm:$0xf]  ;;  %v2093_v3 = vor.u32 %v2283_v1, %v2092_v0  ;;  %v2289_v4 = vld [vmem:[#allocation3 + $0x50] sm:$0xf0]  ;;  %v2080_v5 = vld [vmem:[#allocation3] sm:$0xf] }
   0x8   :  { %v2280_v6 = vld [vmem:[#allocation3 + $0x8] sm:$0xf0]  ;;  %v2564_v7 = vor.u32 %v2289_v4, %v2119_v2  ;;  %v2107_v8 = vld [vmem:[#allocation3 + $0x30] sm:$0xf]  ;;  %v2286_v9 = vld [vmem:[#allocation3 + $0x38] sm:$0xf0] }
   0x9   :  { %v38_v10 = vld [vmem:[%s3064_s0] sm:$0xff]  ;;  %110 = vmatpush.bf16.msra.mxu0 %v2093_v3  ;;  %v2081_v11 = vor.u32 %v2280_v6, %v2080_v5  ;;  %v39_v12 = vld [vmem:[%s3064_s0 + $0x8] sm:$0xff]  ;;  %vm100_vm0 = vcmask 261120   ;;  %v2288_v13 = vld [vmem:[#allocation3 + $0x4c] sm:$0xf]  ;;  %v2573_v15 = vor.u32 %v2286_v9, %v2107_v8  ;;  %v2529_v38 = vmov 0  }
   0xa   :  { %v2121_v14 = vld [vmem:[#allocation3 + $0x54] sm:$0xf0]  ;;  %194 = vmatpush.bf16.msra.mxu3 %v2564_v7  ;;  %v2282_v17 = vld [vmem:[#allocation3 + $0x1c] sm:$0xf]  ;;  %v2094_v18 = vld [vmem:[#allocation3 + $0x24] sm:$0xf0]  ;;  %v60_v24 = vpack.c.bf16 %v39_v12, %v38_v10 }
   0xb   :  { %v2575_v16 = vor.u32 %v2288_v13, %v2121_v14  ;;  %v2279_v19 = vld [vmem:[#allocation3 + $0x4] sm:$0xf]  ;;  %v2097_v20 = vor.u32 %v2282_v17, %v2094_v18  ;;  %v2082_v21 = vld [vmem:[#allocation3 + $0xc] sm:$0xf0]  ;;  %v2285_v22 = vld [vmem:[#allocation3 + $0x34] sm:$0xf] }
   0xc   :  { %v2109_v23 = vld [vmem:[#allocation3 + $0x3c] sm:$0xf0]  ;;  %v2284_v26 = vld [vmem:[#allocation3 + $0x28] sm:$0xf0]  ;;  %v2127_v27 = vld [vmem:[#allocation3 + $0x50] sm:$0xf]  ;;  %v2085_v28 = vor.u32 %v2279_v19, %v2082_v21 }
   0xd   :  { %v2100_v25 = vld [vmem:[#allocation3 + $0x20] sm:$0xf]  ;;  %111 = vmatpush.bf16.msra.mxu0 %v2081_v11  ;;  %124 = vmatpush.bf16.msra.mxu1 %v2097_v20  ;;  %v2290_v30 = vld [vmem:[#allocation3 + $0x58] sm:$0xf0]  ;;  %v2088_v31 = vld [vmem:[#allocation3 + $0x8] sm:$0xf]  ;;  %v2579_v33 = vor.u32 %v2285_v22, %v2109_v23 }
   0xe   :  { %v2101_v29 = vor.u32 %v2284_v26, %v2100_v25  ;;  %v2281_v32 = vld [vmem:[#allocation3 + $0x10] sm:$0xf0]  ;;  %195 = vmatpush.bf16.msra.mxu3 %v2573_v15  ;;  %v2581_v34 = vor.u32 %v2290_v30, %v2127_v27  ;;  %v2115_v35 = vld [vmem:[#allocation3 + $0x38] sm:$0xf]  ;;  %v2287_v37 = vld [vmem:[#allocation3 + $0x40] sm:$0xf0] }
   0xf   :  { %v2089_v36 = vor.u32 %v2281_v32, %v2088_v31  ;;  %v2588_v39 = vor.u32 %v2287_v37, %v2115_v35  ;;  %v2613_v41 = vld [vmem:[%s3066_s2] sm:$0x7]  ;;  %v2077_v42 = vld [vmem:[%s3066_s2 + $0x3] sm:$0x7]  ;;  %vm274_vm9 = vcmask 254976   ;;  %s2530_s20 = smov [#allocation6]  }
  0x10   :  { %138 = vmatpush.bf16.msra.mxu2 %v2101_v29  ;;  %2102 = vmatmul.msk.bf16.vlgmr.msra.gmra.mxu0 %vm100_vm0, %v60_v24  ;;  %v62_v43 = vperm.slane %v2613_v41, 0  ;;  %v2619_v44 = vperm.slane %v2077_v42, 0  ;;  %v63_v51 = vperm.slane %v2613_v41, 1  ;;  %v2632_v54 = vperm.slane %v2077_v42, 1  ;;  %s2065_s21 = sshll.u32 %s2530_s20, 4  ;;  %s2067_s24 = sshll.u32 %s3069_s5, 4  ;;  %s2066_s21 = int_to_ptr.vmem [resolvable:$true] %s2065_s21  ;;  %s2068_s24 = int_to_ptr.hbm [resolvable:$true] %s2067_s24 }
  0x11   :  { %207 = vmatpush.bf16.msrb.mxu0 %v2575_v16  ;;  %196 = vmatmul.bf16.vlgmr.msra.gmra.mxu3 %v2529_v38  ;;  %v2640_v6 = vperm.slane %v2077_v42, 2  ;;  %v64_v12 = vperm.slane %v2613_v41, 2 }
  0x12   :  { %299 = vmatpush.bf16.msrb.mxu3 %v2575_v16  ;;  %125 = vmatpush.bf16.msra.mxu1 %v2085_v28 }
  0x14   :  { %139 = vmatpush.bf16.msra.mxu2 %v2089_v36 }
  0x15   :  { %208 = vmatpush.bf16.msrb.mxu0 %v2579_v33  ;;  %2103 = vmatmul.msk.bf16.vlgmr.msra.gmra.mxu1 %vm100_vm0, %v60_v24 }
  0x16   :  { %220 = vmatpush.bf16.msrb.mxu1 %v2581_v34  ;;  %300 = vmatpush.bf16.msrb.mxu3 %v2579_v33 }
  0x17   :  { %2104 = vmatmul.msk.bf16.vlgmr.msra.gmra.mxu2 %vm100_vm0, %v60_v24 }
  0x18   :  { %286 = vmatpush.bf16.msrb.mxu2 %v2564_v7 }
  0x19   :  { %312 = vmatpush.bf16.msra.mxu0 %v2581_v34 }
  0x1a   :  { %221 = vmatpush.bf16.msrb.mxu1 %v2588_v39  ;;  %418 = vmatpush.bf16.msra.mxu3 %v2581_v34 }
  0x1c   :  { %287 = vmatpush.bf16.msrb.mxu2 %v2573_v15 }
  0x1d   :  { %313 = vmatpush.bf16.msra.mxu0 %v2588_v39 }
  0x1e   :  { %392 = vmatpush.bf16.msra.mxu1 %v2564_v7  ;;  %419 = vmatpush.bf16.msra.mxu3 %v2588_v39 }
  0x20   :  { %405 = vmatpush.bf16.msra.mxu2 %v2575_v16  ;;  %209 = vmatmul.bf16.vlgmr.msrb.gmra.mxu0 %v2529_v38 }
  0x21   :  { %498 = vmatpush.bf16.msrb.mxu0 %v2564_v7 }
  0x22   :  { %393 = vmatpush.bf16.msra.mxu1 %v2573_v15 }
  0x24   :  { %406 = vmatpush.bf16.msra.mxu2 %v2579_v33 }
  0x25   :  { %222 = vmatmul.bf16.vlgmr.msrb.gmra.mxu1 %v2529_v38  ;;  %499 = vmatpush.bf16.msrb.mxu0 %v2573_v15 }
  0x26   :  { %511 = vmatpush.bf16.msrb.mxu1 %v2575_v16 }
  0x2a   :  { %512 = vmatpush.bf16.msrb.mxu1 %v2579_v33 }
  0x8d   :  { %v113_v40 = vpop.f32.mrf.mxu0 }
  0x8e   :  { %v2623_v47 = vadd.f32 %v113_v40, %v62_v43 }
  0x92   :  { %v127_v45 = vpop.f32.mrf.mxu1 }
  0x93   :  { %v2636_v55 = vadd.f32 %v127_v45, %v63_v51 }
  0x94   :  { %v197_v46 = vpop.f32.mrf.mxu3 }
  0x95   :  { %v198_v48 = vadd.f32 %v197_v46, %v2619_v44  ;;  %v2626_v49 = vpop.f32.mrf.mxu0 }
  0x97   :  { %v227_v50 = vadd.f32 %v198_v48, %v2623_v47 }
  0x99   :  { %v2129_v52 = vmul.f32 -1.442695, %v227_v50 }
  0x9a   :  { %v2630_v53 = vpop.f32.mrf.mxu1  ;;  %v141_v18 = vpop.f32.mrf.mxu2 }
  0x9b   :  { %2314 = vpow2.f32 %v2129_v52  ;;  %v2646_v20 = vadd.f32 %v141_v18, %v64_v12 }
  0x9c   :  { %v199_v56 = vpop.f32.mrf.mxu3 }
  0x9d   :  { %v210_v57 = vpop.f32.mrf.mxu0 }
  0x9e   :  { %v211_v58 = vadd.f32 %v210_v57, %v2632_v54 }
  0xa0   :  { %v247_v59 = vadd.f32 %v211_v58, %v2636_v55 }
  0xa1   :  { %v2315_v60 = vpop.eup %2314 }
  0xa2   :  { %v223_v61 = vpop.f32.mrf.mxu1  ;;  %v231_v62 = vadd.f32 1.0, %v2315_v60  ;;  %v2130_v63 = vmul.f32 -1.442695, %v247_v59  ;;  %v2664_v48 = vpop.f32.mrf.mxu2 }
  0xa3   :  { %v224_v13 = vadd.f32 %v223_v61, %v2640_v6 }
  0xa4   :  { %2316 = vrcp.f32 %v231_v62  ;;  %v243_v9 = vand.u32 2147483648, %v231_v62  ;;  %v241_v11 = vand.u32 2147483647, %v231_v62  ;;  %vm237_vm2 = vweird.f32 %v231_v62 }
  0xa5   :  { %2318 = vpow2.f32 %v2130_v63  ;;  %v212_v0 = vpop.f32.mrf.mxu0 }
  0xa6   :  { %v244_v17 = vor.u32 1.1754944e-38, %v243_v9  ;;  %vm242_vm4 = vcmp.eq.f32.partialorder %v241_v11, 8.507059e+37 }
  0xaa   :  { %v225_v1 = vpop.f32.mrf.mxu1  ;;  %v2317_v2 = vpop.eup %2316 }
  0xab   :  { %v2319_v3 = vpop.eup %2318  ;;  %v233_v4 = vmul.f32 %v2317_v2, %v231_v62  ;;  %vm238_vm1 = vweird.f32 %v2317_v2 }
  0xac   :  { %v251_v5 = vadd.f32 1.0, %v2319_v3  ;;  %vm239_vm3 = vmor %vm237_vm2, %vm238_vm1 }
  0xad   :  { %v234_v8 = vsub.f32 1.0, %v233_v4 }
  0xae   :  { %2320 = vrcp.f32 %v251_v5  ;;  %v263_v27 = vand.u32 2147483648, %v251_v5  ;;  %v261_v29 = vand.u32 2147483647, %v251_v5  ;;  %vm257_vm6 = vweird.f32 %v251_v5 }
  0xaf   :  { %v235_v10 = vmul.f32 %v2317_v2, %v234_v8 }
  0xb0   :  { %v264_v31 = vor.u32 1.1754944e-38, %v263_v27  ;;  %vm262_vm8 = vcmp.eq.f32.partialorder %v261_v29, 8.507059e+37 }
  0xb1   :  { %v236_v14 = vadd.f32 %v2317_v2, %v235_v10 }
  0xb3   :  { %v240_v19 = vsel %vm239_vm3, %v2317_v2, %v236_v14  ;;  %vm378_vm3 = vcmask 257026  }
  0xb4   :  { %v2321_v21 = vpop.eup %2320  ;;  %v245_v22 = vsel %vm242_vm4, %v244_v17, %v240_v19 }
  0xb5   :  { %v253_v23 = vmul.f32 %v2321_v21, %v251_v5  ;;  %v267_v24 = vmul.f32 %v245_v22, %v224_v13  ;;  %vm258_vm5 = vweird.f32 %v2321_v21 }
  0xb6   :  { %vm259_vm7 = vmor %vm257_vm6, %vm258_vm5 }
  0xb7   :  { %v254_v25 = vsub.f32 1.0, %v253_v23  ;;  %v268_v26 = vadd.f32 %v267_v24, %v2646_v20 }
  0xb9   :  { %v255_v28 = vmul.f32 %v2321_v21, %v254_v25  ;;  %2322 = vtanh.f32 %v268_v26 }
  0xbb   :  { %v256_v30 = vadd.f32 %v2321_v21, %v255_v28 }
  0xbd   :  { %v260_v32 = vsel %vm259_vm7, %v2321_v21, %v256_v30 }
  0xbe   :  { %v265_v35 = vsel %vm262_vm8, %v264_v31, %v260_v32 }
  0xbf   :  { %v2323_v36 = vpop.eup %2322  ;;  %v270_v37 = vsub.f32 1.0, %v265_v35  ;;  %v272_v42 = vmul.f32 0.0, %v265_v35 }
  0xc1   :  { %v271_v40 = vmul.f32 %v2323_v36, %v270_v37 }
  0xc3   :  { %v2649_v45 = vadd.f32 %v272_v42, %v271_v40 }
  0xc5   :  { %275 = vst.msk [vmem:[#allocation2] sm:$0x3] %vm274_vm9, %v2649_v45  ;;  %v276_v46 = vpack.c.bf16 %v2649_v45, %v2649_v45 }
  0xc7   :  { %2131 = vmatmul.msk.bf16.vlgmr.msrb.gmra.mxu2 %vm100_vm0, %v276_v46  ;;  %2132 = vmatmul.msk.bf16.vlgmr.msrb.gmra.mxu3 %vm100_vm0, %v276_v46 }
  0xc8   :  { %2133 = vmatmul.msk.bf16.vlgmr.msra.gmra.mxu0 %vm100_vm0, %v276_v46  ;;  %524 = vmatpush.bf16.msrb.mxu2 %v2581_v34  ;;  %v374_v46 = vrot.slane %v2649_v45, 6 }
  0xc9   :  { %604 = vmatpush.bf16.msrb.mxu3 %v2564_v7  ;;  %617 = vmatpush.bf16.msra.mxu0 %v2575_v16 }
  0xcc   :  { %525 = vmatpush.bf16.msrb.mxu2 %v2588_v39 }
  0xcd   :  { %605 = vmatpush.bf16.msrb.mxu3 %v2573_v15  ;;  %618 = vmatpush.bf16.msra.mxu0 %v2579_v33 }
 0x145   :  { %v315_v50 = vpop.f32.mrf.mxu0 }
 0x146   :  { %v316_v21 = vadd.f32 %v315_v50, %v2640_v6 }
 0x148   :  { %v366_v27 = vrot.slane %v316_v21, 6 }
 0x14a   :  { %v289_v52 = vpop.f32.mrf.mxu2  ;;  %v302_v56 = vpop.f32.mrf.mxu3 }
 0x14b   :  { %v290_v57 = vadd.f32 %v289_v52, %v2619_v44  ;;  %v303_v58 = vadd.f32 %v302_v56, %v2632_v54 }
 0x14d   :  { %v320_v59 = vrot.slane %v290_v57, 6  ;;  %v343_v60 = vrot.slane %v303_v58, 6  ;;  %v317_v61 = vpop.f32.mrf.mxu0 }
 0x14f   :  { %v322_v62 = vadd.f32 %v320_v59, %v2623_v47  ;;  %v345_v63 = vadd.f32 %v343_v60, %v2636_v55 }
 0x151   :  { %v2134_v0 = vmul.f32 -1.442695, %v322_v62  ;;  %v2135_v1 = vmul.f32 -1.442695, %v345_v63 }
 0x152   :  { %v291_v2 = vpop.f32.mrf.mxu2  ;;  %v304_v3 = vpop.f32.mrf.mxu3 }
 0x153   :  { %2324 = vpow2.f32 %v2134_v0 }
 0x154   :  { %2326 = vpow2.f32 %v2135_v1 }
 0x159   :  { %v2325_v4 = vpop.eup %2324 }
 0x15a   :  { %v2327_v5 = vpop.eup %2326  ;;  %v326_v8 = vadd.f32 1.0, %v2325_v4 }
 0x15b   :  { %v349_v9 = vadd.f32 1.0, %v2327_v5 }
 0x15c   :  { %2328 = vrcp.f32 %v326_v8  ;;  %v338_v18 = vand.u32 2147483648, %v326_v8  ;;  %v336_v23 = vand.u32 2147483647, %v326_v8  ;;  %vm332_vm11 = vweird.f32 %v326_v8 }
 0x15d   :  { %2330 = vrcp.f32 %v349_v9  ;;  %v361_v32 = vand.u32 2147483648, %v349_v9  ;;  %vm355_vm15 = vweird.f32 %v349_v9  ;;  %v359_v35 = vand.u32 2147483647, %v349_v9 }
 0x15e   :  { %v339_v26 = vor.u32 1.1754944e-38, %v338_v18  ;;  %vm337_vm13 = vcmp.eq.f32.partialorder %v336_v23, 8.507059e+37 }
 0x15f   :  { %v362_v40 = vor.u32 1.1754944e-38, %v361_v32  ;;  %vm360_vm2 = vcmp.eq.f32.partialorder %v359_v35, 8.507059e+37 }
 0x162   :  { %v2329_v10 = vpop.eup %2328 }
 0x163   :  { %v2331_v11 = vpop.eup %2330  ;;  %v328_v13 = vmul.f32 %v2329_v10, %v326_v8  ;;  %vm333_vm10 = vweird.f32 %v2329_v10 }
 0x164   :  { %v351_v14 = vmul.f32 %v2331_v11, %v349_v9  ;;  %vm334_vm12 = vmor %vm332_vm11, %vm333_vm10  ;;  %vm356_vm14 = vweird.f32 %v2331_v11 }
 0x165   :  { %v329_v17 = vsub.f32 1.0, %v328_v13  ;;  %vm357_vm1 = vmor %vm355_vm15, %vm356_vm14 }
 0x166   :  { %v352_v19 = vsub.f32 1.0, %v351_v14 }
 0x167   :  { %v330_v22 = vmul.f32 %v2329_v10, %v329_v17 }
 0x168   :  { %v353_v24 = vmul.f32 %v2331_v11, %v352_v19 }
 0x169   :  { %v331_v25 = vadd.f32 %v2329_v10, %v330_v22 }
 0x16a   :  { %v354_v30 = vadd.f32 %v2331_v11, %v353_v24 }
 0x16b   :  { %v335_v28 = vsel %vm334_vm12, %v2329_v10, %v331_v25 }
 0x16c   :  { %v340_v29 = vsel %vm337_vm13, %v339_v26, %v335_v28  ;;  %v358_v37 = vsel %vm357_vm1, %v2331_v11, %v354_v30  ;;  %vm484_vm13 = vcmask 259076  }
 0x16d   :  { %v368_v31 = vmul.f32 %v366_v27, %v340_v29  ;;  %v363_v42 = vsel %vm360_vm2, %v362_v40, %v358_v37 }
 0x16e   :  { %v371_v50 = vsub.f32 1.0, %v363_v42  ;;  %v376_v57 = vmul.f32 %v374_v46, %v363_v42 }
 0x16f   :  { %v369_v36 = vadd.f32 %v368_v31, %v2646_v20 }
 0x171   :  { %2332 = vtanh.f32 %v369_v36 }
 0x177   :  { %v2333_v52 = vpop.eup %2332 }
 0x178   :  { %v372_v56 = vmul.f32 %v2333_v52, %v371_v50 }
 0x17a   :  { %v2673_v58 = vadd.f32 %v376_v57, %v372_v56 }
 0x17c   :  { %379 = vst.msk [vmem:[#allocation2] sm:$0xc] %vm378_vm3, %v2673_v58  ;;  %v380_v59 = vpack.c.bf16 %v2673_v58, %v2673_v58 }
 0x17e   :  { %v382_v60 = vrot.slane %v380_v59, 1 }
 0x180   :  { %2136 = vmatmul.msk.bf16.vlgmr.msra.gmra.mxu1 %vm100_vm0, %v382_v60  ;;  %2137 = vmatmul.msk.bf16.vlgmr.msra.gmra.mxu2 %vm100_vm0, %v382_v60 }
 0x181   :  { %2138 = vmatmul.msk.bf16.vlgmr.msra.gmra.mxu3 %vm100_vm0, %v382_v60  ;;  %630 = vmatpush.bf16.msra.mxu1 %v2581_v34 }
 0x182   :  { %698 = vmatpush.bf16.msra.mxu2 %v2564_v7  ;;  %711 = vmatpush.bf16.msra.mxu3 %v2575_v16 }
 0x185   :  { %631 = vmatpush.bf16.msra.mxu1 %v2588_v39 }
 0x186   :  { %699 = vmatpush.bf16.msra.mxu2 %v2573_v15  ;;  %712 = vmatpush.bf16.msra.mxu3 %v2579_v33 }
 0x1fd   :  { %v395_v45 = vpop.f32.mrf.mxu1 }
 0x1fe   :  { %v396_v61 = vadd.f32 %v395_v45, %v2619_v44  ;;  %v480_v45 = vrot.slane %v2673_v58, 6 }
 0x200   :  { %v426_v62 = vrot.slane %v396_v61, 4 }
 0x202   :  { %v428_v63 = vadd.f32 %v426_v62, %v2623_v47 }
 0x203   :  { %v408_v0 = vpop.f32.mrf.mxu2 }
 0x204   :  { %v2139_v1 = vmul.f32 -1.442695, %v428_v63  ;;  %v409_v2 = vadd.f32 %v408_v0, %v2632_v54  ;;  %v421_v3 = vpop.f32.mrf.mxu3 }
 0x205   :  { %v397_v4 = vpop.f32.mrf.mxu1  ;;  %v422_v24 = vadd.f32 %v421_v3, %v2640_v6 }
 0x206   :  { %2334 = vpow2.f32 %v2139_v1  ;;  %v449_v5 = vrot.slane %v409_v2, 4 }
 0x207   :  { %v472_v35 = vrot.slane %v422_v24, 4 }
 0x208   :  { %v451_v8 = vadd.f32 %v449_v5, %v2636_v55 }
 0x20a   :  { %v2140_v9 = vmul.f32 -1.442695, %v451_v8 }
 0x20b   :  { %v410_v10 = vpop.f32.mrf.mxu2 }
 0x20c   :  { %v2335_v11 = vpop.eup %2334  ;;  %2336 = vpow2.f32 %v2140_v9  ;;  %v423_v13 = vpop.f32.mrf.mxu3 }
 0x20d   :  { %v432_v14 = vadd.f32 1.0, %v2335_v11 }
 0x20f   :  { %2338 = vrcp.f32 %v432_v14  ;;  %v444_v23 = vand.u32 2147483648, %v432_v14  ;;  %v442_v26 = vand.u32 2147483647, %v432_v14  ;;  %vm438_vm5 = vweird.f32 %v432_v14 }
 0x211   :  { %v445_v30 = vor.u32 1.1754944e-38, %v444_v23  ;;  %vm443_vm7 = vcmp.eq.f32.partialorder %v442_v26, 8.507059e+37 }
 0x212   :  { %v2337_v17 = vpop.eup %2336 }
 0x213   :  { %v455_v18 = vadd.f32 1.0, %v2337_v17 }
 0x215   :  { %v2339_v19 = vpop.eup %2338  ;;  %2340 = vrcp.f32 %v455_v18  ;;  %v467_v40 = vand.u32 2147483648, %v455_v18  ;;  %v465_v46 = vand.u32 2147483647, %v455_v18  ;;  %vm461_vm10 = vweird.f32 %v455_v18 }
 0x216   :  { %v434_v21 = vmul.f32 %v2339_v19, %v432_v14  ;;  %vm439_vm4 = vweird.f32 %v2339_v19 }
 0x217   :  { %vm440_vm6 = vmor %vm438_vm5, %vm439_vm4  ;;  %v468_v56 = vor.u32 1.1754944e-38, %v467_v40  ;;  %vm466_vm12 = vcmp.eq.f32.partialorder %v465_v46, 8.507059e+37 }
 0x218   :  { %v435_v22 = vsub.f32 1.0, %v434_v21 }
 0x21a   :  { %v436_v25 = vmul.f32 %v2339_v19, %v435_v22 }
 0x21b   :  { %v2341_v27 = vpop.eup %2340 }
 0x21c   :  { %v457_v28 = vmul.f32 %v2341_v27, %v455_v18  ;;  %v437_v29 = vadd.f32 %v2339_v19, %v436_v25  ;;  %vm462_vm8 = vweird.f32 %v2341_v27 }
 0x21d   :  { %vm463_vm11 = vmor %vm461_vm10, %vm462_vm8  ;;  %vm590_vm8 = vcmask 261126  }
 0x21e   :  { %v458_v31 = vsub.f32 1.0, %v457_v28  ;;  %v441_v32 = vsel %vm440_vm6, %v2339_v19, %v437_v29 }
 0x21f   :  { %v446_v36 = vsel %vm443_vm7, %v445_v30, %v441_v32 }
 0x220   :  { %v459_v37 = vmul.f32 %v2341_v27, %v458_v31  ;;  %v474_v42 = vmul.f32 %v472_v35, %v446_v36 }
 0x222   :  { %v460_v50 = vadd.f32 %v2341_v27, %v459_v37  ;;  %v475_v52 = vadd.f32 %v474_v42, %v2646_v20 }
 0x224   :  { %v464_v57 = vsel %vm463_vm11, %v2341_v27, %v460_v50  ;;  %2342 = vtanh.f32 %v475_v52 }
 0x225   :  { %v469_v59 = vsel %vm466_vm12, %v468_v56, %v464_v57 }
 0x226   :  { %v477_v60 = vsub.f32 1.0, %v469_v59  ;;  %v482_v63 = vmul.f32 %v480_v45, %v469_v59 }
 0x22a   :  { %v2343_v61 = vpop.eup %2342 }
 0x22b   :  { %v478_v62 = vmul.f32 %v2343_v61, %v477_v60 }
 0x22d   :  { %v2695_v0 = vadd.f32 %v482_v63, %v478_v62 }
 0x22f   :  { %485 = vst.msk [vmem:[#allocation2] sm:$0x30] %vm484_vm13, %v2695_v0  ;;  %v486_v1 = vpack.c.bf16 %v2695_v0, %v2695_v0 }
 0x231   :  { %v488_v2 = vrot.slane %v486_v1, 2  ;;  %v586_v1 = vrot.slane %v2695_v0, 6 }
 0x233   :  { %2141 = vmatmul.msk.bf16.vlgmr.msrb.gmra.mxu0 %vm100_vm0, %v488_v2  ;;  %2142 = vmatmul.msk.bf16.vlgmr.msrb.gmra.mxu1 %vm100_vm0, %v488_v2 }
 0x234   :  { %2143 = vmatmul.msk.bf16.vlgmr.msrb.gmra.mxu2 %vm100_vm0, %v488_v2  ;;  %724 = vmatpush.bf16.msrb.mxu0 %v2581_v34 }
 0x235   :  { %803 = vmatpush.bf16.msrb.mxu1 %v2564_v7  ;;  %816 = vmatpush.bf16.msrb.mxu2 %v2575_v16 }
 0x238   :  { %725 = vmatpush.bf16.msrb.mxu0 %v2588_v39 }
 0x239   :  { %804 = vmatpush.bf16.msrb.mxu1 %v2573_v15  ;;  %817 = vmatpush.bf16.msrb.mxu2 %v2579_v33 }
 0x2b0   :  { %v501_v58 = vpop.f32.mrf.mxu0  ;;  %v514_v3 = vpop.f32.mrf.mxu1 }
 0x2b1   :  { %v502_v4 = vadd.f32 %v501_v58, %v2619_v44  ;;  %v515_v5 = vadd.f32 %v514_v3, %v2632_v54 }
 0x2b3   :  { %v532_v8 = vrot.slane %v502_v4, 2  ;;  %v555_v9 = vrot.slane %v515_v5, 2 }
 0x2b5   :  { %v534_v10 = vadd.f32 %v532_v8, %v2623_v47  ;;  %v557_v11 = vadd.f32 %v555_v9, %v2636_v55  ;;  %v2735_v8 = vadd.f32 %v2630_v53, %v63_v51 }
 0x2b7   :  { %v2144_v13 = vmul.f32 -1.442695, %v534_v10  ;;  %v2145_v14 = vmul.f32 -1.442695, %v557_v11  ;;  %v527_v17 = vpop.f32.mrf.mxu2 }
 0x2b8   :  { %v503_v18 = vpop.f32.mrf.mxu0  ;;  %v516_v19 = vpop.f32.mrf.mxu1  ;;  %v528_v31 = vadd.f32 %v527_v17, %v2640_v6 }
 0x2b9   :  { %2344 = vpow2.f32 %v2144_v13 }
 0x2ba   :  { %2346 = vpow2.f32 %v2145_v14  ;;  %v578_v46 = vrot.slane %v528_v31, 2 }
 0x2bf   :  { %v2345_v21 = vpop.eup %2344  ;;  %v529_v22 = vpop.f32.mrf.mxu2 }
 0x2c0   :  { %v2347_v23 = vpop.eup %2346  ;;  %v538_v24 = vadd.f32 1.0, %v2345_v21 }
 0x2c1   :  { %v561_v25 = vadd.f32 1.0, %v2347_v23 }
 0x2c2   :  { %2348 = vrcp.f32 %v538_v24  ;;  %v550_v30 = vand.u32 2147483648, %v538_v24  ;;  %v548_v35 = vand.u32 2147483647, %v538_v24  ;;  %vm544_vm15 = vweird.f32 %v538_v24 }
 0x2c3   :  { %2350 = vrcp.f32 %v561_v25  ;;  %v573_v56 = vand.u32 2147483648, %v561_v25  ;;  %vm567_vm5 = vweird.f32 %v561_v25  ;;  %v571_v59 = vand.u32 2147483647, %v561_v25 }
 0x2c4   :  { %v551_v40 = vor.u32 1.1754944e-38, %v550_v30  ;;  %vm549_vm2 = vcmp.eq.f32.partialorder %v548_v35, 8.507059e+37 }
 0x2c5   :  { %v574_v61 = vor.u32 1.1754944e-38, %v573_v56  ;;  %vm572_vm7 = vcmp.eq.f32.partialorder %v571_v59, 8.507059e+37 }
 0x2c8   :  { %v2349_v26 = vpop.eup %2348 }
 0x2c9   :  { %v2351_v27 = vpop.eup %2350  ;;  %v540_v28 = vmul.f32 %v2349_v26, %v538_v24  ;;  %vm545_vm14 = vweird.f32 %v2349_v26 }
 0x2ca   :  { %v563_v47 = vmul.f32 %v2351_v27, %v561_v25  ;;  %vm546_vm1 = vmor %vm544_vm15, %vm545_vm14  ;;  %vm568_vm4 = vweird.f32 %v2351_v27 }
 0x2cb   :  { %v541_v29 = vsub.f32 1.0, %v540_v28  ;;  %vm569_vm6 = vmor %vm567_vm5, %vm568_vm4 }
 0x2cc   :  { %v564_v55 = vsub.f32 1.0, %v563_v47 }
 0x2cd   :  { %v542_v32 = vmul.f32 %v2349_v26, %v541_v29 }
 0x2ce   :  { %v565_v36 = vmul.f32 %v2351_v27, %v564_v55 }
 0x2cf   :  { %v543_v37 = vadd.f32 %v2349_v26, %v542_v32 }
 0x2d0   :  { %v566_v52 = vadd.f32 %v2351_v27, %v565_v36 }
 0x2d1   :  { %v547_v42 = vsel %vm546_vm1, %v2349_v26, %v543_v37  ;;  %v2750_v37 = vadd.f32 %v2664_v48, %v64_v12 }
 0x2d2   :  { %v552_v50 = vsel %vm549_vm2, %v551_v40, %v547_v42  ;;  %v570_v45 = vsel %vm569_vm6, %v2351_v27, %v566_v52 }
 0x2d3   :  { %v580_v57 = vmul.f32 %v578_v46, %v552_v50  ;;  %v575_v62 = vsel %vm572_vm7, %v574_v61, %v570_v45 }
 0x2d4   :  { %v583_v63 = vsub.f32 1.0, %v575_v62  ;;  %v588_v3 = vmul.f32 %v586_v1, %v575_v62 }
 0x2d5   :  { %v581_v60 = vadd.f32 %v580_v57, %v2646_v20 }
 0x2d7   :  { %2352 = vtanh.f32 %v581_v60 }
 0x2dd   :  { %v2353_v2 = vpop.eup %2352 }
 0x2de   :  { %v584_v58 = vmul.f32 %v2353_v2, %v583_v63 }
 0x2e0   :  { %v2717_v4 = vadd.f32 %v588_v3, %v584_v58 }
 0x2e2   :  { %591 = vst.msk [vmem:[#allocation2] sm:$0xc0] %vm590_vm8, %v2717_v4  ;;  %v592_v20 = vpack.c.bf16 %v2717_v4, %v2717_v4  ;;  %v683_v59 = vrot.slane %v2717_v4, 6 }
 0x2e4   :  { %v594_v5 = vrot.slane %v592_v20, 3 }
 0x2e6   :  { %2146 = vmatmul.msk.bf16.vlgmr.msrb.gmra.mxu3 %vm100_vm0, %v594_v5  ;;  %2147 = vmatmul.msk.bf16.vlgmr.msra.gmra.mxu0 %vm100_vm0, %v594_v5 }
 0x2e7   :  { %2148 = vmatmul.msk.bf16.vlgmr.msra.gmra.mxu1 %vm100_vm0, %v594_v5  ;;  %829 = vmatpush.bf16.msrb.mxu3 %v2581_v34 }
 0x2e8   :  { %908 = vmatpush.bf16.msra.mxu0 %v2564_v7  ;;  %921 = vmatpush.bf16.msra.mxu1 %v2575_v16  ;;  %v2742_v16 = vadd.f32 %v2626_v49, %v62_v43 }
 0x2eb   :  { %830 = vmatpush.bf16.msrb.mxu3 %v2588_v39 }
 0x2ec   :  { %909 = vmatpush.bf16.msra.mxu0 %v2573_v15  ;;  %922 = vmatpush.bf16.msra.mxu1 %v2579_v33 }
 0x363   :  { %v620_v0 = vpop.f32.mrf.mxu0 }
 0x364   :  { %v621_v9 = vadd.f32 %v620_v0, %v2632_v54  ;;  %v633_v10 = vpop.f32.mrf.mxu1 }
 0x365   :  { %v634_v31 = vadd.f32 %v633_v10, %v2640_v6 }
 0x366   :  { %v657_v11 = vadd.f32 %v621_v9, %v2735_v8 }
 0x368   :  { %v2150_v7 = vmul.f32 -1.442695, %v657_v11 }
 0x369   :  { %v607_v13 = vpop.f32.mrf.mxu3 }
 0x36a   :  { %2354 = vpow2.f32 %v2150_v7  ;;  %v608_v15 = vadd.f32 %v607_v13, %v2619_v44 }
 0x36b   :  { %v622_v33 = vpop.f32.mrf.mxu0 }
 0x36c   :  { %v637_v14 = vadd.f32 %v608_v15, %v2742_v16  ;;  %v635_v51 = vpop.f32.mrf.mxu1 }
 0x36e   :  { %v2149_v53 = vmul.f32 -1.442695, %v637_v14 }
 0x370   :  { %v2355_v17 = vpop.eup %2354  ;;  %2356 = vpow2.f32 %v2149_v53 }
 0x371   :  { %v661_v18 = vadd.f32 1.0, %v2355_v17  ;;  %v609_v19 = vpop.f32.mrf.mxu3 }
 0x373   :  { %2358 = vrcp.f32 %v661_v18  ;;  %v673_v40 = vand.u32 2147483648, %v661_v18  ;;  %vm667_vm1 = vweird.f32 %v661_v18  ;;  %v671_v46 = vand.u32 2147483647, %v661_v18 }
 0x375   :  { %v674_v56 = vor.u32 1.1754944e-38, %v673_v40  ;;  %vm672_vm4 = vcmp.eq.f32.partialorder %v671_v46, 8.507059e+37 }
 0x376   :  { %v2357_v21 = vpop.eup %2356 }
 0x377   :  { %v641_v22 = vadd.f32 1.0, %v2357_v21 }
 0x379   :  { %2360 = vrcp.f32 %v641_v22  ;;  %v2359_v23 = vpop.eup %2358  ;;  %v653_v27 = vand.u32 2147483648, %v641_v22  ;;  %v651_v47 = vand.u32 2147483647, %v641_v22  ;;  %vm647_vm11 = vweird.f32 %v641_v22 }
 0x37a   :  { %v663_v24 = vmul.f32 %v2359_v23, %v661_v18  ;;  %vm668_vm15 = vweird.f32 %v2359_v23 }
 0x37b   :  { %v654_v30 = vor.u32 1.1754944e-38, %v653_v27  ;;  %vm652_vm14 = vcmp.eq.f32.partialorder %v651_v47, 8.507059e+37  ;;  %vm669_vm2 = vmor %vm667_vm1, %vm668_vm15 }
 0x37c   :  { %v664_v25 = vsub.f32 1.0, %v663_v24 }
 0x37e   :  { %v665_v29 = vmul.f32 %v2359_v23, %v664_v25 }
 0x37f   :  { %v2361_v43 = vpop.eup %2360 }
 0x380   :  { %v643_v49 = vmul.f32 %v2361_v43, %v641_v22  ;;  %vm648_vm10 = vweird.f32 %v2361_v43  ;;  %v666_v35 = vadd.f32 %v2359_v23, %v665_v29 }
 0x381   :  { %vm649_vm12 = vmor %vm647_vm11, %vm648_vm10 }
 0x382   :  { %v644_v26 = vsub.f32 1.0, %v643_v49  ;;  %v670_v52 = vsel %vm669_vm2, %v2359_v23, %v666_v35 }
 0x383   :  { %v675_v57 = vsel %vm672_vm4, %v674_v56, %v670_v52 }
 0x384   :  { %v645_v28 = vmul.f32 %v2361_v43, %v644_v26  ;;  %v680_v60 = vsub.f32 1.0, %v675_v57  ;;  %v685_v61 = vmul.f32 %v683_v59, %v675_v57 }
 0x386   :  { %v646_v55 = vadd.f32 %v2361_v43, %v645_v28 }
 0x388   :  { %v650_v32 = vsel %vm649_vm12, %v2361_v43, %v646_v55 }
 0x389   :  { %v655_v36 = vsel %vm652_vm14, %v654_v30, %v650_v32 }
 0x38a   :  { %v677_v42 = vmul.f32 %v655_v36, %v634_v31 }
 0x38c   :  { %v678_v50 = vadd.f32 %v677_v42, %v2750_v37 }
 0x38e   :  { %2362 = vtanh.f32 %v678_v50 }
 0x394   :  { %v2363_v45 = vpop.eup %2362 }
 0x395   :  { %v681_v41 = vmul.f32 %v2363_v45, %v680_v60 }
 0x397   :  { %v2754_v12 = vadd.f32 %v685_v61, %v681_v41 }
 0x399   :  { %687 = vst.msk [vmem:[#allocation2 + $0x8] sm:$0x3] %vm274_vm9, %v2754_v12  ;;  %v688_v48 = vpack.c.bf16 %v2754_v12, %v2754_v12  ;;  %v786_v40 = vrot.slane %v2754_v12, 6 }
 0x39b   :  { %2151 = vmatmul.msk.bf16.vlgmr.msra.gmra.mxu2 %vm100_vm0, %v688_v48  ;;  %2152 = vmatmul.msk.bf16.vlgmr.msra.gmra.mxu3 %vm100_vm0, %v688_v48 }
 0x39c   :  { %2153 = vmatmul.msk.bf16.vlgmr.msrb.gmra.mxu0 %vm100_vm0, %v688_v48  ;;  %934 = vmatpush.bf16.msra.mxu2 %v2581_v34 }
 0x3a0   :  { %935 = vmatpush.bf16.msra.mxu2 %v2588_v39 }
 0x419   :  { %v727_v62 = vpop.f32.mrf.mxu0 }
 0x41a   :  { %v728_v21 = vadd.f32 %v727_v62, %v2640_v6 }
 0x41c   :  { %v778_v25 = vrot.slane %v728_v21, 6 }
 0x41e   :  { %v701_v63 = vpop.f32.mrf.mxu2  ;;  %v714_v1 = vpop.f32.mrf.mxu3 }
 0x41f   :  { %v702_v2 = vadd.f32 %v701_v63, %v2619_v44  ;;  %v715_v58 = vadd.f32 %v714_v1, %v2632_v54 }
 0x421   :  { %v732_v3 = vrot.slane %v702_v2, 6  ;;  %v755_v4 = vrot.slane %v715_v58, 6  ;;  %v729_v20 = vpop.f32.mrf.mxu0 }
 0x423   :  { %v734_v5 = vadd.f32 %v732_v3, %v2742_v16  ;;  %v757_v0 = vadd.f32 %v755_v4, %v2735_v8 }
 0x425   :  { %v2154_v9 = vmul.f32 -1.442695, %v734_v5  ;;  %v2155_v10 = vmul.f32 -1.442695, %v757_v0 }
 0x426   :  { %v703_v11 = vpop.f32.mrf.mxu2  ;;  %v716_v34 = vpop.f32.mrf.mxu3 }
 0x427   :  { %2364 = vpow2.f32 %v2154_v9 }
 0x428   :  { %2366 = vpow2.f32 %v2155_v10 }
 0x42d   :  { %v2365_v39 = vpop.eup %2364 }
 0x42e   :  { %v2367_v7 = vpop.eup %2366  ;;  %v738_v13 = vadd.f32 1.0, %v2365_v39 }
 0x42f   :  { %v761_v15 = vadd.f32 1.0, %v2367_v7 }
 0x430   :  { %2368 = vrcp.f32 %v738_v13  ;;  %v750_v18 = vand.u32 2147483648, %v738_v13  ;;  %v748_v23 = vand.u32 2147483647, %v738_v13  ;;  %vm744_vm6 = vweird.f32 %v738_v13 }
 0x431   :  { %2370 = vrcp.f32 %v761_v15  ;;  %v773_v29 = vand.u32 2147483648, %v761_v15  ;;  %vm767_vm12 = vweird.f32 %v761_v15  ;;  %v771_v55 = vand.u32 2147483647, %v761_v15 }
 0x432   :  { %v751_v49 = vor.u32 1.1754944e-38, %v750_v18  ;;  %vm749_vm10 = vcmp.eq.f32.partialorder %v748_v23, 8.507059e+37 }
 0x433   :  { %v774_v32 = vor.u32 1.1754944e-38, %v773_v29  ;;  %vm772_vm15 = vcmp.eq.f32.partialorder %v771_v55, 8.507059e+37 }
 0x436   :  { %v2369_v33 = vpop.eup %2368 }
 0x437   :  { %v2371_v14 = vpop.eup %2370  ;;  %v740_v51 = vmul.f32 %v2369_v33, %v738_v13  ;;  %vm745_vm5 = vweird.f32 %v2369_v33 }
 0x438   :  { %v763_v53 = vmul.f32 %v2371_v14, %v761_v15  ;;  %vm746_vm7 = vmor %vm744_vm6, %vm745_vm5  ;;  %vm768_vm11 = vweird.f32 %v2371_v14 }
 0x439   :  { %v741_v17 = vsub.f32 1.0, %v740_v51  ;;  %vm769_vm14 = vmor %vm767_vm12, %vm768_vm11 }
 0x43a   :  { %v764_v19 = vsub.f32 1.0, %v763_v53 }
 0x43b   :  { %v742_v22 = vmul.f32 %v2369_v33, %v741_v17 }
 0x43c   :  { %v765_v24 = vmul.f32 %v2371_v14, %v764_v19 }
 0x43d   :  { %v743_v43 = vadd.f32 %v2369_v33, %v742_v22 }
 0x43e   :  { %v766_v28 = vadd.f32 %v2371_v14, %v765_v24 }
 0x43f   :  { %v747_v26 = vsel %vm746_vm7, %v2369_v33, %v743_v43 }
 0x440   :  { %v752_v27 = vsel %vm749_vm10, %v751_v49, %v747_v26  ;;  %v770_v31 = vsel %vm769_vm14, %v2371_v14, %v766_v28 }
 0x441   :  { %v780_v47 = vmul.f32 %v778_v25, %v752_v27  ;;  %v775_v35 = vsel %vm772_vm15, %v774_v32, %v770_v31 }
 0x442   :  { %v783_v36 = vsub.f32 1.0, %v775_v35  ;;  %v788_v50 = vmul.f32 %v786_v40, %v775_v35 }
 0x443   :  { %v781_v30 = vadd.f32 %v780_v47, %v2750_v37 }
 0x445   :  { %2372 = vtanh.f32 %v781_v30 }
 0x44b   :  { %v2373_v42 = vpop.eup %2372 }
 0x44c   :  { %v784_v46 = vmul.f32 %v2373_v42, %v783_v36 }
 0x44e   :  { %v2772_v52 = vadd.f32 %v788_v50, %v784_v46 }
 0x450   :  { %790 = vst.msk [vmem:[#allocation2 + $0x8] sm:$0xc] %vm378_vm3, %v2772_v52  ;;  %v791_v56 = vpack.c.bf16 %v2772_v52, %v2772_v52  ;;  %v891_v29 = vrot.slane %v2772_v52, 6 }
 0x452   :  { %v793_v57 = vrot.slane %v791_v56, 1 }
 0x454   :  { %2156 = vmatmul.msk.bf16.vlgmr.msrb.gmra.mxu1 %vm100_vm0, %v793_v57  ;;  %2157 = vmatmul.msk.bf16.vlgmr.msrb.gmra.mxu2 %vm100_vm0, %v793_v57 }
 0x455   :  { %2158 = vmatmul.msk.bf16.vlgmr.msrb.gmra.mxu3 %vm100_vm0, %v793_v57 }
 0x4d1   :  { %v806_v59 = vpop.f32.mrf.mxu1 }
 0x4d2   :  { %v807_v60 = vadd.f32 %v806_v59, %v2619_v44 }
 0x4d4   :  { %v837_v45 = vrot.slane %v807_v60, 4 }
 0x4d6   :  { %v839_v41 = vadd.f32 %v837_v45, %v2742_v16 }
 0x4d7   :  { %v819_v61 = vpop.f32.mrf.mxu2 }
 0x4d8   :  { %v2159_v12 = vmul.f32 -1.442695, %v839_v41  ;;  %v820_v48 = vadd.f32 %v819_v61, %v2632_v54  ;;  %v832_v62 = vpop.f32.mrf.mxu3 }
 0x4d9   :  { %v808_v63 = vpop.f32.mrf.mxu1  ;;  %v833_v7 = vadd.f32 %v832_v62, %v2640_v6 }
 0x4da   :  { %2374 = vpow2.f32 %v2159_v12  ;;  %v860_v1 = vrot.slane %v820_v48, 4 }
 0x4db   :  { %v883_v19 = vrot.slane %v833_v7, 4  ;;  %v2298_v7 = vld [vmem:[#allocation3 + $0x98] sm:$0xf0] }
 0x4dc   :  { %v862_v2 = vadd.f32 %v860_v1, %v2735_v8 }
 0x4de   :  { %v2160_v58 = vmul.f32 -1.442695, %v862_v2  ;;  %v2209_v2 = vld [vmem:[#allocation3 + $0xa8] sm:$0xf] }
 0x4df   :  { %v821_v3 = vpop.f32.mrf.mxu2 }
 0x4e0   :  { %v2375_v4 = vpop.eup %2374  ;;  %2376 = vpow2.f32 %v2160_v58  ;;  %v834_v20 = vpop.f32.mrf.mxu3  ;;  %v2301_v58 = vld [vmem:[#allocation3 + $0xb0] sm:$0xf0] }
 0x4e1   :  { %v843_v5 = vadd.f32 1.0, %v2375_v4  ;;  %v2807_v3 = vor.u32 %v2301_v58, %v2209_v2  ;;  %v2170_v4 = vld [vmem:[#allocation3 + $0x60] sm:$0xf]  ;;  %v2292_v20 = vld [vmem:[#allocation3 + $0x68] sm:$0xf0] }
 0x4e3   :  { %2378 = vrcp.f32 %v843_v5  ;;  %v855_v39 = vand.u32 2147483648, %v843_v5  ;;  %v853_v15 = vand.u32 2147483647, %v843_v5  ;;  %vm849_vm2 = vweird.f32 %v843_v5  ;;  %1155 = vmatpush.bf16.msrb.mxu2 %v2807_v3 }
 0x4e5   :  { %v856_v53 = vor.u32 1.1754944e-38, %v855_v39  ;;  %vm854_vm5 = vcmp.eq.f32.partialorder %v853_v15, 8.507059e+37  ;;  %v2197_v39 = vld [vmem:[#allocation3 + $0x90] sm:$0xf] }
 0x4e6   :  { %v2377_v0 = vpop.eup %2376 }
 0x4e7   :  { %v866_v9 = vadd.f32 1.0, %v2377_v0  ;;  %v2294_v0 = vld [vmem:[#allocation3 + $0x7c] sm:$0xf] }
 0x4e9   :  { %v2379_v10 = vpop.eup %2378  ;;  %2380 = vrcp.f32 %v866_v9  ;;  %v878_v23 = vand.u32 2147483648, %v866_v9  ;;  %v876_v43 = vand.u32 2147483647, %v866_v9  ;;  %vm872_vm7 = vweird.f32 %v866_v9 }
 0x4ea   :  { %v845_v11 = vmul.f32 %v2379_v10, %v843_v5  ;;  %vm850_vm1 = vweird.f32 %v2379_v10  ;;  %v2171_v5 = vor.u32 %v2292_v20, %v2170_v4 }
 0x4eb   :  { %vm851_vm4 = vmor %vm849_vm2, %vm850_vm1  ;;  %v879_v26 = vor.u32 1.1754944e-38, %v878_v23  ;;  %vm877_vm11 = vcmp.eq.f32.partialorder %v876_v43, 8.507059e+37 }
 0x4ec   :  { %v846_v34 = vsub.f32 1.0, %v845_v11 }
 0x4ee   :  { %v847_v13 = vmul.f32 %v2379_v10, %v846_v34  ;;  %v2296_v34 = vld [vmem:[#allocation3 + $0x88] sm:$0xf0] }
 0x4ef   :  { %v2381_v33 = vpop.eup %2380 }
 0x4f0   :  { %v868_v14 = vmul.f32 %v2381_v33, %v866_v9  ;;  %v848_v51 = vadd.f32 %v2379_v10, %v847_v13  ;;  %vm873_vm6 = vweird.f32 %v2381_v33  ;;  %v2184_v9 = vld [vmem:[#allocation3 + $0x84] sm:$0xf0] }
 0x4f1   :  { %vm874_vm10 = vmor %vm872_vm7, %vm873_vm6  ;;  %v2187_v11 = vor.u32 %v2294_v0, %v2184_v9  ;;  %v2167_v0 = vld [vmem:[%s3066_s2 + $0x9] sm:$0x7] }
 0x4f2   :  { %v869_v17 = vsub.f32 1.0, %v868_v14  ;;  %v852_v18 = vsel %vm851_vm4, %v2379_v10, %v848_v51  ;;  %v2190_v10 = vld [vmem:[#allocation3 + $0x80] sm:$0xf]  ;;  %v2291_v14 = vld [vmem:[#allocation3 + $0x64] sm:$0xf] }
 0x4f3   :  { %v857_v21 = vsel %vm854_vm5, %v856_v53, %v852_v18  ;;  %v2191_v15 = vor.u32 %v2296_v34, %v2190_v10  ;;  %v2172_v51 = vld [vmem:[#allocation3 + $0x6c] sm:$0xf0]  ;;  %v2178_v53 = vld [vmem:[#allocation3 + $0x68] sm:$0xf]  ;;  %1088 = vmatpush.bf16.msrb.mxu0 %v2187_v11  ;;  %v2862_v10 = vperm.slane %v2167_v0, 0 }
 0x4f4   :  { %v870_v22 = vmul.f32 %v2381_v33, %v869_v17  ;;  %v885_v24 = vmul.f32 %v883_v19, %v857_v21  ;;  %v2175_v19 = vor.u32 %v2291_v14, %v2172_v51  ;;  %v2293_v21 = vld [vmem:[#allocation3 + $0x70] sm:$0xf0] }
 0x4f5   :  { %1102 = vmatpush.bf16.msrb.mxu1 %v2191_v15  ;;  %v2179_v23 = vor.u32 %v2293_v21, %v2178_v53 }
 0x4f6   :  { %v871_v49 = vadd.f32 %v2381_v33, %v870_v22  ;;  %v886_v25 = vadd.f32 %v885_v24, %v2750_v37 }
 0x4f7   :  { %1089 = vmatpush.bf16.msrb.mxu0 %v2175_v19 }
 0x4f8   :  { %v875_v27 = vsel %vm874_vm10, %v2381_v33, %v871_v49  ;;  %2382 = vtanh.f32 %v886_v25  ;;  %v2810_v33 = vor.u32 %v2298_v7, %v2197_v39 }
 0x4f9   :  { %v880_v28 = vsel %vm877_vm11, %v879_v26, %v875_v27  ;;  %1103 = vmatpush.bf16.msrb.mxu1 %v2179_v23 }
 0x4fa   :  { %v888_v47 = vsub.f32 1.0, %v880_v28  ;;  %v893_v31 = vmul.f32 %v891_v29, %v880_v28  ;;  %1156 = vmatpush.bf16.msrb.mxu2 %v2810_v33  ;;  %v2300_v28 = vld [vmem:[#allocation3 + $0xac] sm:$0xf]  ;;  %v2297_v29 = vld [vmem:[#allocation3 + $0x94] sm:$0xf] }
 0x4fe   :  { %v2383_v55 = vpop.eup %2382 }
 0x4ff   :  { %v889_v30 = vmul.f32 %v2383_v55, %v888_v47  ;;  %v2211_v47 = vld [vmem:[#allocation3 + $0xb4] sm:$0xf0] }
 0x501   :  { %v2788_v32 = vadd.f32 %v893_v31, %v889_v30  ;;  %v2819_v30 = vor.u32 %v2300_v28, %v2211_v47  ;;  %v2199_v31 = vld [vmem:[#allocation3 + $0x9c] sm:$0xf0] }
 0x503   :  { %895 = vst.msk [vmem:[#allocation2 + $0x8] sm:$0x30] %vm484_vm13, %v2788_v32  ;;  %v896_v35 = vpack.c.bf16 %v2788_v32, %v2788_v32 }
 0x505   :  { %v898_v36 = vrot.slane %v896_v35, 2 }
 0x507   :  { %2161 = vmatmul.msk.bf16.vlgmr.msra.gmra.mxu0 %vm100_vm0, %v898_v36  ;;  %2162 = vmatmul.msk.bf16.vlgmr.msra.gmra.mxu1 %vm100_vm0, %v898_v36 }
 0x508   :  { %2163 = vmatmul.msk.bf16.vlgmr.msra.gmra.mxu2 %vm100_vm0, %v898_v36  ;;  %1246 = vmatpush.bf16.msra.mxu1 %v2807_v3 }
 0x509   :  { %1259 = vmatpush.bf16.msra.mxu2 %v2819_v30 }
 0x50c   :  { %1247 = vmatpush.bf16.msra.mxu1 %v2810_v33 }
 0x518   :  { %1157 = vmatmul.bf16.vlgmr.msrb.gmra.mxu2 %v2529_v38 }
 0x584   :  { %v911_v40 = vpop.f32.mrf.mxu0  ;;  %v924_v42 = vpop.f32.mrf.mxu1 }
 0x585   :  { %v912_v46 = vadd.f32 %v911_v40, %v2619_v44  ;;  %v925_v50 = vadd.f32 %v924_v42, %v2632_v54  ;;  %v2182_v54 = vld [vmem:[#allocation3 + $0x78] sm:$0xf]  ;;  %v2824_v40 = vor.u32 %v2297_v29, %v2199_v31 }
 0x587   :  { %v942_v52 = vrot.slane %v912_v46, 2  ;;  %v965_v56 = vrot.slane %v925_v50, 2  ;;  %1260 = vmatpush.bf16.msra.mxu2 %v2824_v40 }
 0x589   :  { %v944_v57 = vadd.f32 %v942_v52, %v2742_v16  ;;  %v967_v59 = vadd.f32 %v965_v56, %v2735_v8  ;;  %v2295_v8 = vld [vmem:[#allocation3 + $0x80] sm:$0xf0] }
 0x58a   :  { %v2183_v16 = vor.u32 %v2295_v8, %v2182_v54  ;;  %v2299_v54 = vld [vmem:[#allocation3 + $0xa0] sm:$0xf0] }
 0x58b   :  { %v2164_v60 = vmul.f32 -1.442695, %v944_v57  ;;  %v2165_v45 = vmul.f32 -1.442695, %v967_v59  ;;  %v937_v41 = vpop.f32.mrf.mxu2 }
 0x58c   :  { %v913_v61 = vpop.f32.mrf.mxu0  ;;  %v926_v12 = vpop.f32.mrf.mxu1  ;;  %1074 = vmatpush.bf16.msra.mxu3 %v2183_v16  ;;  %v938_v49 = vadd.f32 %v937_v41, %v2640_v6 }
 0x58d   :  { %2384 = vpow2.f32 %v2164_v60  ;;  %v996_v12 = vrot.slane %v2788_v32, 6  ;;  %v1001_v32 = vld [vmem:[#allocation2] sm:$0xff] }
 0x58e   :  { %2386 = vpow2.f32 %v2165_v45  ;;  %v988_v36 = vrot.slane %v938_v49, 2 }
 0x590   :  { %1075 = vmatpush.bf16.msra.mxu3 %v2171_v5 }
 0x593   :  { %v2385_v48 = vpop.eup %2384  ;;  %v939_v62 = vpop.f32.mrf.mxu2 }
 0x594   :  { %v2387_v63 = vpop.eup %2386  ;;  %v2801_v1 = vadd.f32 1.0, %v2385_v48  ;;  %1168 = vmatpush.bf16.msrb.mxu3 %v2819_v30  ;;  %v2217_v48 = vld [vmem:[#allocation3 + $0xb0] sm:$0xf]  ;;  %v2302_v62 = vld [vmem:[#allocation3 + $0xb8] sm:$0xf0] }
 0x595   :  { %v2803_v44 = vadd.f32 1.0, %v2387_v63  ;;  %v2205_v63 = vld [vmem:[#allocation3 + $0x98] sm:$0xf] }
 0x596   :  { %2388 = vrcp.f32 %v2801_v1  ;;  %v958_v25 = vand.u32 2147483647, %v2801_v1  ;;  %v960_v26 = vand.u32 2147483648, %v2801_v1  ;;  %vm954_vm14 = vweird.f32 %v2801_v1 }
 0x597   :  { %2390 = vrcp.f32 %v2803_v44  ;;  %v983_v50 = vand.u32 2147483648, %v2803_v44  ;;  %vm977_vm4 = vweird.f32 %v2803_v44  ;;  %v981_v56 = vand.u32 2147483647, %v2803_v44 }
 0x598   :  { %v961_v6 = vor.u32 1.1754944e-38, %v960_v26  ;;  %vm959_vm2 = vcmp.eq.f32.partialorder %v958_v25, 8.507059e+37  ;;  %1169 = vmatpush.bf16.msrb.mxu3 %v2824_v40  ;;  %v2838_v2 = vor.u32 %v2299_v54, %v2205_v63 }
 0x599   :  { %v984_v45 = vor.u32 1.1754944e-38, %v983_v50  ;;  %vm982_vm6 = vcmp.eq.f32.partialorder %v981_v56, 8.507059e+37 }
 0x59b   :  { %v1158_v20 = vpop.f32.mrf.mxu2 }
 0x59c   :  { %v2389_v13 = vpop.eup %2388  ;;  %v1159_v34 = vadd.f32 %v1158_v20, %v2862_v10 }
 0x59d   :  { %v2391_v17 = vpop.eup %2390  ;;  %v950_v18 = vmul.f32 %v2389_v13, %v2801_v1  ;;  %vm955_vm12 = vweird.f32 %v2389_v13 }
 0x59e   :  { %v973_v22 = vmul.f32 %v2391_v17, %v2803_v44  ;;  %vm956_vm15 = vmor %vm954_vm14, %vm955_vm12  ;;  %vm978_vm1 = vweird.f32 %v2391_v17  ;;  %v2835_v44 = vor.u32 %v2302_v62, %v2217_v48 }
 0x59f   :  { %v951_v24 = vsub.f32 1.0, %v950_v18  ;;  %vm979_vm5 = vmor %vm977_vm4, %vm978_vm1 }
 0x5a0   :  { %v974_v43 = vsub.f32 1.0, %v973_v22  ;;  %1181 = vmatpush.bf16.msra.mxu0 %v2835_v44  ;;  %1377 = vmatpush.bf16.msrb.mxu2 %v2835_v44  ;;  %v2879_v22 = vperm.slane %v2167_v0, 1 }
 0x5a1   :  { %v952_v27 = vmul.f32 %v2389_v13, %v951_v24 }
 0x5a2   :  { %v975_v55 = vmul.f32 %v2391_v17, %v974_v43 }
 0x5a3   :  { %v953_v35 = vadd.f32 %v2389_v13, %v952_v27  ;;  %v1160_v5 = vpop.f32.mrf.mxu2 }
 0x5a4   :  { %v976_v46 = vadd.f32 %v2391_v17, %v975_v55  ;;  %1182 = vmatpush.bf16.msra.mxu0 %v2838_v2  ;;  %1378 = vmatpush.bf16.msrb.mxu2 %v2838_v2 }
 0x5a5   :  { %v957_v42 = vsel %vm956_vm15, %v2389_v13, %v953_v35 }
 0x5a6   :  { %v962_v52 = vsel %vm959_vm2, %v961_v6, %v957_v42  ;;  %v980_v59 = vsel %vm979_vm5, %v2391_v17, %v976_v46  ;;  %v2885_v6 = vperm.slane %v2167_v0, 2 }
 0x5a7   :  { %v990_v57 = vmul.f32 %v988_v36, %v962_v52  ;;  %v985_v41 = vsel %vm982_vm6, %v984_v45, %v980_v59 }
 0x5a8   :  { %v993_v61 = vsub.f32 1.0, %v985_v41  ;;  %v998_v16 = vmul.f32 %v996_v12, %v985_v41 }
 0x5a9   :  { %v991_v60 = vadd.f32 %v990_v57, %v2750_v37 }
 0x5ab   :  { %2392 = vtanh.f32 %v991_v60 }
 0x5b1   :  { %v2393_v1 = vpop.eup %2392 }
 0x5b2   :  { %v994_v8 = vmul.f32 %v2393_v1, %v993_v61 }
 0x5b4   :  { %v999_v37 = vadd.f32 %v998_v16, %v994_v8 }
 0x5b6   :  { %1000 = vst.msk [vmem:[#allocation2 + $0x8] sm:$0xc0] %vm590_vm8, %v999_v37 }
 0x5bd   :  { %v1002_v58 = vld [vmem:[#allocation2 + $0x8] sm:$0xff] }
 0x5be   :  { %v1025_v4 = vpack.c.bf16 %v1002_v58, %v1001_v32 }
 0x5c0   :  { %2192 = vmatmul.msk.bf16.vlgmr.msra.gmra.mxu3 %vm100_vm0, %v1025_v4  ;;  %2193 = vmatmul.msk.bf16.vlgmr.msrb.gmra.mxu0 %vm100_vm0, %v1025_v4 }
 0x5c1   :  { %2194 = vmatmul.msk.bf16.vlgmr.msrb.gmra.mxu1 %vm100_vm0, %v1025_v4  ;;  %1272 = vmatpush.bf16.msra.mxu3 %v2835_v44 }
 0x5c2   :  { %1351 = vmatpush.bf16.msrb.mxu0 %v2807_v3  ;;  %1364 = vmatpush.bf16.msrb.mxu1 %v2819_v30 }
 0x5c5   :  { %1273 = vmatpush.bf16.msra.mxu3 %v2838_v2 }
 0x5c6   :  { %1352 = vmatpush.bf16.msrb.mxu0 %v2810_v33  ;;  %1365 = vmatpush.bf16.msrb.mxu1 %v2824_v40 }
 0x5d0   :  { %1170 = vmatmul.bf16.vlgmr.msrb.gmra.mxu3 %v2529_v38  ;;  %1183 = vmatmul.bf16.vlgmr.msra.gmra.mxu0 %v2529_v38  ;;  %v2867_v38 = vld [vmem:[%s3066_s2 + $0x6] sm:$0x7] }
 0x5d1   :  { %1456 = vmatpush.bf16.msrb.mxu3 %v2807_v3  ;;  %1469 = vmatpush.bf16.msra.mxu0 %v2819_v30  ;;  %v1027_v11 = vperm.slane %v2867_v38, 0  ;;  %v1028_v7 = vperm.slane %v2867_v38, 1  ;;  %v1029_v60 = vperm.slane %v2867_v38, 2 }
 0x5d5   :  { %1457 = vmatpush.bf16.msrb.mxu3 %v2810_v33  ;;  %1470 = vmatpush.bf16.msra.mxu0 %v2824_v40 }
 0x63d   :  { %v1091_v9 = vpop.f32.mrf.mxu0 }
 0x63e   :  { %v2881_v43 = vadd.f32 %v1091_v9, %v1028_v7  ;;  %v1105_v45 = vpop.f32.mrf.mxu1 }
 0x63f   :  { %v2891_v12 = vadd.f32 %v1105_v45, %v1029_v60 }
 0x643   :  { %v1077_v39 = vpop.f32.mrf.mxu3 }
 0x644   :  { %v2872_v13 = vadd.f32 %v1077_v39, %v1027_v11 }
 0x645   :  { %v1093_v15 = vpop.f32.mrf.mxu0 }
 0x646   :  { %v1188_v14 = vadd.f32 %v1159_v34, %v2872_v13  ;;  %v2875_v51 = vadd.f32 %v1093_v15, %v1028_v7  ;;  %v2909_v34 = vpop.f32.mrf.mxu1 }
 0x648   :  { %v2219_v53 = vmul.f32 -1.442695, %v1188_v14 }
 0x64a   :  { %2394 = vpow2.f32 %v2219_v53 }
 0x64b   :  { %v1079_v17 = vpop.f32.mrf.mxu3 }
 0x64c   :  { %v2877_v18 = vadd.f32 %v1079_v17, %v1027_v11 }
 0x64d   :  { %v1184_v19 = vpop.f32.mrf.mxu0 }
 0x64e   :  { %v1185_v57 = vadd.f32 %v1184_v19, %v2885_v6 }
 0x650   :  { %v2395_v21 = vpop.eup %2394 }
 0x651   :  { %v1192_v23 = vadd.f32 1.0, %v2395_v21 }
 0x653   :  { %2396 = vrcp.f32 %v1192_v23  ;;  %v1171_v24 = vpop.f32.mrf.mxu3  ;;  %v1204_v35 = vand.u32 2147483648, %v1192_v23  ;;  %v1202_v36 = vand.u32 2147483647, %v1192_v23  ;;  %vm1198_vm10 = vweird.f32 %v1192_v23 }
 0x654   :  { %v1172_v49 = vadd.f32 %v1171_v24, %v2879_v22 }
 0x655   :  { %v1186_v25 = vpop.f32.mrf.mxu0  ;;  %v1205_v56 = vor.u32 1.1754944e-38, %v1204_v35  ;;  %vm1203_vm12 = vcmp.eq.f32.partialorder %v1202_v36, 8.507059e+37 }
 0x656   :  { %v1208_v26 = vadd.f32 %v1172_v49, %v2881_v43 }
 0x658   :  { %v2220_v27 = vmul.f32 -1.442695, %v1208_v26 }
 0x659   :  { %v2397_v28 = vpop.eup %2396 }
 0x65a   :  { %2398 = vpow2.f32 %v2220_v27  ;;  %v1194_v47 = vmul.f32 %v2397_v28, %v1192_v23  ;;  %vm1199_vm7 = vweird.f32 %v2397_v28 }
 0x65b   :  { %v1173_v29 = vpop.f32.mrf.mxu3  ;;  %vm1200_vm11 = vmor %vm1198_vm10, %vm1199_vm7 }
 0x65c   :  { %v1195_v55 = vsub.f32 1.0, %v1194_v47 }
 0x65e   :  { %v1196_v31 = vmul.f32 %v2397_v28, %v1195_v55 }
 0x660   :  { %v2399_v42 = vpop.eup %2398  ;;  %v1197_v46 = vadd.f32 %v2397_v28, %v1196_v31 }
 0x661   :  { %v1212_v50 = vadd.f32 1.0, %v2399_v42 }
 0x662   :  { %v1201_v52 = vsel %vm1200_vm11, %v2397_v28, %v1197_v46 }
 0x663   :  { %2400 = vrcp.f32 %v1212_v50  ;;  %v1206_v59 = vsel %vm1203_vm12, %v1205_v56, %v1201_v52  ;;  %v1224_v1 = vand.u32 2147483648, %v1212_v50  ;;  %v1222_v8 = vand.u32 2147483647, %v1212_v50 }
 0x664   :  { %v1228_v41 = vmul.f32 %v1206_v59, %v1185_v57  ;;  %vm1218_vm15 = vweird.f32 %v1212_v50 }
 0x665   :  { %v1225_v37 = vor.u32 1.1754944e-38, %v1224_v1  ;;  %vm1223_vm2 = vcmp.eq.f32.partialorder %v1222_v8, 8.507059e+37 }
 0x666   :  { %v1229_v62 = vadd.f32 %v1228_v41, %v2891_v12 }
 0x668   :  { %2402 = vtanh.f32 %v1229_v62 }
 0x669   :  { %v2401_v61 = vpop.eup %2400 }
 0x66a   :  { %v1214_v48 = vmul.f32 %v2401_v61, %v1212_v50  ;;  %vm1219_vm14 = vweird.f32 %v2401_v61 }
 0x66b   :  { %vm1220_vm1 = vmor %vm1218_vm15, %vm1219_vm14 }
 0x66c   :  { %v1215_v63 = vsub.f32 1.0, %v1214_v48 }
 0x66e   :  { %v1216_v54 = vmul.f32 %v2401_v61, %v1215_v63  ;;  %v2403_v20 = vpop.eup %2402 }
 0x670   :  { %v1217_v16 = vadd.f32 %v2401_v61, %v1216_v54 }
 0x672   :  { %v1221_v32 = vsel %vm1220_vm1, %v2401_v61, %v1217_v16 }
 0x673   :  { %v1226_v58 = vsel %vm1223_vm2, %v1225_v37, %v1221_v32 }
 0x674   :  { %v1231_v4 = vsub.f32 1.0, %v1226_v58  ;;  %v1233_v0 = vmul.f32 0.0, %v1226_v58 }
 0x676   :  { %v1232_v5 = vmul.f32 %v2403_v20, %v1231_v4 }
 0x678   :  { %v2894_v9 = vadd.f32 %v1233_v0, %v1232_v5 }
 0x67a   :  { %1235 = vst.msk [vmem:[#allocation2] sm:$0x3] %vm274_vm9, %v2894_v9  ;;  %v1236_v11 = vpack.c.bf16 %v2894_v9, %v2894_v9  ;;  %v1334_v5 = vrot.slane %v2894_v9, 6 }
 0x67c   :  { %2221 = vmatmul.msk.bf16.vlgmr.msra.gmra.mxu1 %vm100_vm0, %v1236_v11  ;;  %2222 = vmatmul.msk.bf16.vlgmr.msra.gmra.mxu2 %vm100_vm0, %v1236_v11 }
 0x67d   :  { %2223 = vmatmul.msk.bf16.vlgmr.msra.gmra.mxu3 %vm100_vm0, %v1236_v11  ;;  %1482 = vmatpush.bf16.msra.mxu1 %v2835_v44 }
 0x67e   :  { %1561 = vmatpush.bf16.msra.mxu2 %v2807_v3  ;;  %1574 = vmatpush.bf16.msra.mxu3 %v2819_v30 }
 0x681   :  { %1483 = vmatpush.bf16.msra.mxu1 %v2838_v2 }
 0x682   :  { %1562 = vmatpush.bf16.msra.mxu2 %v2810_v33  ;;  %1575 = vmatpush.bf16.msra.mxu3 %v2824_v40 }
 0x6f9   :  { %v1249_v39 = vpop.f32.mrf.mxu1 }
 0x6fa   :  { %v1250_v7 = vadd.f32 %v1249_v39, %v2862_v10 }
 0x6fc   :  { %v1280_v15 = vrot.slane %v1250_v7, 6 }
 0x6fe   :  { %v1282_v14 = vadd.f32 %v1280_v15, %v2872_v13 }
 0x6ff   :  { %v1262_v53 = vpop.f32.mrf.mxu2 }
 0x700   :  { %v2224_v17 = vmul.f32 -1.442695, %v1282_v14  ;;  %v1263_v19 = vadd.f32 %v1262_v53, %v2879_v22  ;;  %v1275_v21 = vpop.f32.mrf.mxu3 }
 0x701   :  { %v1251_v23 = vpop.f32.mrf.mxu1  ;;  %v1276_v46 = vadd.f32 %v1275_v21, %v2885_v6 }
 0x702   :  { %2404 = vpow2.f32 %v2224_v17  ;;  %v1303_v24 = vrot.slane %v1263_v19, 6 }
 0x703   :  { %v1326_v48 = vrot.slane %v1276_v46, 6 }
 0x704   :  { %v1305_v49 = vadd.f32 %v1303_v24, %v2881_v43 }
 0x706   :  { %v2225_v25 = vmul.f32 -1.442695, %v1305_v49 }
 0x707   :  { %v1264_v26 = vpop.f32.mrf.mxu2 }
 0x708   :  { %v2405_v27 = vpop.eup %2404  ;;  %2406 = vpow2.f32 %v2225_v25  ;;  %v1277_v28 = vpop.f32.mrf.mxu3 }
 0x709   :  { %v1286_v47 = vadd.f32 1.0, %v2405_v27 }
 0x70b   :  { %2408 = vrcp.f32 %v1286_v47  ;;  %v1298_v42 = vand.u32 2147483648, %v1286_v47  ;;  %v1296_v52 = vand.u32 2147483647, %v1286_v47  ;;  %vm1292_vm5 = vweird.f32 %v1286_v47 }
 0x70d   :  { %v1299_v45 = vor.u32 1.1754944e-38, %v1298_v42  ;;  %vm1297_vm7 = vcmp.eq.f32.partialorder %v1296_v52, 8.507059e+37 }
 0x70e   :  { %v2407_v29 = vpop.eup %2406 }
 0x70f   :  { %v1309_v55 = vadd.f32 1.0, %v2407_v29 }
 0x711   :  { %v2409_v31 = vpop.eup %2408  ;;  %2410 = vrcp.f32 %v1309_v55  ;;  %v1321_v1 = vand.u32 2147483648, %v1309_v55  ;;  %v1319_v8 = vand.u32 2147483647, %v1309_v55  ;;  %vm1315_vm11 = vweird.f32 %v1309_v55 }
 0x712   :  { %v1288_v35 = vmul.f32 %v2409_v31, %v1286_v47  ;;  %vm1293_vm4 = vweird.f32 %v2409_v31 }
 0x713   :  { %vm1294_vm6 = vmor %vm1292_vm5, %vm1293_vm4  ;;  %v1322_v32 = vor.u32 1.1754944e-38, %v1321_v1  ;;  %vm1320_vm14 = vcmp.eq.f32.partialorder %v1319_v8, 8.507059e+37 }
 0x714   :  { %v1289_v36 = vsub.f32 1.0, %v1288_v35 }
 0x716   :  { %v1290_v50 = vmul.f32 %v2409_v31, %v1289_v36 }
 0x717   :  { %v2411_v56 = vpop.eup %2410 }
 0x718   :  { %v1311_v57 = vmul.f32 %v2411_v56, %v1309_v55  ;;  %v1291_v59 = vadd.f32 %v2409_v31, %v1290_v50  ;;  %vm1316_vm10 = vweird.f32 %v2411_v56 }
 0x719   :  { %vm1317_vm12 = vmor %vm1315_vm11, %vm1316_vm10 }
 0x71a   :  { %v1312_v41 = vsub.f32 1.0, %v1311_v57  ;;  %v1295_v61 = vsel %vm1294_vm6, %v2409_v31, %v1291_v59 }
 0x71b   :  { %v1300_v62 = vsel %vm1297_vm7, %v1299_v45, %v1295_v61 }
 0x71c   :  { %v1313_v63 = vmul.f32 %v2411_v56, %v1312_v41  ;;  %v1328_v54 = vmul.f32 %v1326_v48, %v1300_v62 }
 0x71e   :  { %v1314_v16 = vadd.f32 %v2411_v56, %v1313_v63  ;;  %v1329_v37 = vadd.f32 %v1328_v54, %v2891_v12 }
 0x720   :  { %v1318_v58 = vsel %vm1317_vm12, %v2411_v56, %v1314_v16  ;;  %2412 = vtanh.f32 %v1329_v37 }
 0x721   :  { %v1323_v4 = vsel %vm1320_vm14, %v1322_v32, %v1318_v58 }
 0x722   :  { %v1331_v20 = vsub.f32 1.0, %v1323_v4  ;;  %v1336_v39 = vmul.f32 %v1334_v5, %v1323_v4 }
 0x726   :  { %v2413_v0 = vpop.eup %2412 }
 0x727   :  { %v1332_v11 = vmul.f32 %v2413_v0, %v1331_v20 }
 0x729   :  { %v2918_v7 = vadd.f32 %v1336_v39, %v1332_v11 }
 0x72b   :  { %1338 = vst.msk [vmem:[#allocation2] sm:$0xc] %vm378_vm3, %v2918_v7  ;;  %v1339_v15 = vpack.c.bf16 %v2918_v7, %v2918_v7  ;;  %v1439_v39 = vrot.slane %v2918_v7, 6 }
 0x72d   :  { %v1341_v14 = vrot.slane %v1339_v15, 1 }
 0x72f   :  { %2226 = vmatmul.msk.bf16.vlgmr.msrb.gmra.mxu0 %vm100_vm0, %v1341_v14  ;;  %2227 = vmatmul.msk.bf16.vlgmr.msrb.gmra.mxu1 %vm100_vm0, %v1341_v14 }
 0x730   :  { %2228 = vmatmul.msk.bf16.vlgmr.msrb.gmra.mxu2 %vm100_vm0, %v1341_v14  ;;  %1587 = vmatpush.bf16.msrb.mxu0 %v2835_v44 }
 0x731   :  { %1655 = vmatpush.bf16.msrb.mxu1 %v2807_v3  ;;  %1668 = vmatpush.bf16.msrb.mxu2 %v2819_v30 }
 0x734   :  { %1588 = vmatpush.bf16.msrb.mxu0 %v2838_v2 }
 0x735   :  { %1656 = vmatpush.bf16.msrb.mxu1 %v2810_v33  ;;  %1669 = vmatpush.bf16.msrb.mxu2 %v2824_v40 }
 0x7ac   :  { %v1354_v9 = vpop.f32.mrf.mxu0  ;;  %v1367_v53 = vpop.f32.mrf.mxu1 }
 0x7ad   :  { %v1355_v17 = vadd.f32 %v1354_v9, %v2862_v10  ;;  %v1368_v19 = vadd.f32 %v1367_v53, %v2879_v22 }
 0x7af   :  { %v1385_v21 = vrot.slane %v1355_v17, 4  ;;  %v1408_v23 = vrot.slane %v1368_v19, 4 }
 0x7b1   :  { %v1387_v24 = vadd.f32 %v1385_v21, %v2872_v13  ;;  %v1410_v49 = vadd.f32 %v1408_v23, %v2881_v43 }
 0x7b3   :  { %v2229_v25 = vmul.f32 -1.442695, %v1387_v24  ;;  %v2230_v26 = vmul.f32 -1.442695, %v1410_v49  ;;  %v1380_v27 = vpop.f32.mrf.mxu2 }
 0x7b4   :  { %v1356_v28 = vpop.f32.mrf.mxu0  ;;  %v1369_v47 = vpop.f32.mrf.mxu1  ;;  %v1381_v45 = vadd.f32 %v1380_v27, %v2885_v6 }
 0x7b5   :  { %2414 = vpow2.f32 %v2229_v25 }
 0x7b6   :  { %2416 = vpow2.f32 %v2230_v26  ;;  %v1431_v54 = vrot.slane %v1381_v45, 4 }
 0x7bb   :  { %v2415_v29 = vpop.eup %2414  ;;  %v1382_v55 = vpop.f32.mrf.mxu2 }
 0x7bc   :  { %v2417_v31 = vpop.eup %2416  ;;  %v1391_v35 = vadd.f32 1.0, %v2415_v29 }
 0x7bd   :  { %v1414_v36 = vadd.f32 1.0, %v2417_v31 }
 0x7be   :  { %2418 = vrcp.f32 %v1391_v35  ;;  %v1403_v59 = vand.u32 2147483648, %v1391_v35  ;;  %v1401_v61 = vand.u32 2147483647, %v1391_v35  ;;  %vm1397_vm1 = vweird.f32 %v1391_v35 }
 0x7bf   :  { %2420 = vrcp.f32 %v1414_v36  ;;  %v1426_v37 = vand.u32 2147483648, %v1414_v36  ;;  %vm1420_vm6 = vweird.f32 %v1414_v36  ;;  %v1424_v58 = vand.u32 2147483647, %v1414_v36 }
 0x7c0   :  { %v1404_v63 = vor.u32 1.1754944e-38, %v1403_v59  ;;  %vm1402_vm4 = vcmp.eq.f32.partialorder %v1401_v61, 8.507059e+37 }
 0x7c1   :  { %v1427_v5 = vor.u32 1.1754944e-38, %v1426_v37  ;;  %vm1425_vm10 = vcmp.eq.f32.partialorder %v1424_v58, 8.507059e+37 }
 0x7c4   :  { %v2419_v42 = vpop.eup %2418 }
 0x7c5   :  { %v2421_v46 = vpop.eup %2420  ;;  %v1393_v50 = vmul.f32 %v2419_v42, %v1391_v35  ;;  %vm1398_vm15 = vweird.f32 %v2419_v42 }
 0x7c6   :  { %v1416_v52 = vmul.f32 %v2421_v46, %v1414_v36  ;;  %vm1399_vm2 = vmor %vm1397_vm1, %vm1398_vm15  ;;  %vm1421_vm5 = vweird.f32 %v2421_v46 }
 0x7c7   :  { %v1394_v56 = vsub.f32 1.0, %v1393_v50  ;;  %vm1422_vm7 = vmor %vm1420_vm6, %vm1421_vm5 }
 0x7c8   :  { %v1417_v57 = vsub.f32 1.0, %v1416_v52 }
 0x7c9   :  { %v1395_v41 = vmul.f32 %v2419_v42, %v1394_v56 }
 0x7ca   :  { %v1418_v48 = vmul.f32 %v2421_v46, %v1417_v57 }
 0x7cb   :  { %v1396_v62 = vadd.f32 %v2419_v42, %v1395_v41 }
 0x7cc   :  { %v1419_v16 = vadd.f32 %v2421_v46, %v1418_v48 }
 0x7cd   :  { %v1400_v1 = vsel %vm1399_vm2, %v2419_v42, %v1396_v62 }
 0x7ce   :  { %v1405_v8 = vsel %vm1402_vm4, %v1404_v63, %v1400_v1  ;;  %v1423_v20 = vsel %vm1422_vm7, %v2421_v46, %v1419_v16 }
 0x7cf   :  { %v1433_v32 = vmul.f32 %v1431_v54, %v1405_v8  ;;  %v1428_v0 = vsel %vm1425_vm10, %v1427_v5, %v1423_v20 }
 0x7d0   :  { %v1436_v11 = vsub.f32 1.0, %v1428_v0  ;;  %v1441_v9 = vmul.f32 %v1439_v39, %v1428_v0 }
 0x7d1   :  { %v1434_v4 = vadd.f32 %v1433_v32, %v2891_v12 }
 0x7d3   :  { %2422 = vtanh.f32 %v1434_v4 }
 0x7d9   :  { %v2423_v15 = vpop.eup %2422 }
 0x7da   :  { %v1437_v14 = vmul.f32 %v2423_v15, %v1436_v11 }
 0x7dc   :  { %v2940_v53 = vadd.f32 %v1441_v9, %v1437_v14 }
 0x7de   :  { %1443 = vst.msk [vmem:[#allocation2] sm:$0x30] %vm484_vm13, %v2940_v53  ;;  %v1444_v17 = vpack.c.bf16 %v2940_v53, %v2940_v53  ;;  %v1544_v39 = vrot.slane %v2940_v53, 6 }
 0x7e0   :  { %v1446_v19 = vrot.slane %v1444_v17, 2 }
 0x7e2   :  { %2231 = vmatmul.msk.bf16.vlgmr.msrb.gmra.mxu3 %vm100_vm0, %v1446_v19  ;;  %2232 = vmatmul.msk.bf16.vlgmr.msra.gmra.mxu0 %vm100_vm0, %v1446_v19 }
 0x7e3   :  { %2233 = vmatmul.msk.bf16.vlgmr.msra.gmra.mxu1 %vm100_vm0, %v1446_v19  ;;  %1681 = vmatpush.bf16.msrb.mxu3 %v2835_v44 }
 0x7e4   :  { %1760 = vmatpush.bf16.msra.mxu0 %v2807_v3  ;;  %1773 = vmatpush.bf16.msra.mxu1 %v2819_v30 }
 0x7e7   :  { %1682 = vmatpush.bf16.msrb.mxu3 %v2838_v2 }
 0x7e8   :  { %1761 = vmatpush.bf16.msra.mxu0 %v2810_v33  ;;  %1774 = vmatpush.bf16.msra.mxu1 %v2824_v40 }
 0x85f   :  { %v1472_v7 = vpop.f32.mrf.mxu0 }
 0x860   :  { %v1473_v21 = vadd.f32 %v1472_v7, %v2879_v22  ;;  %v1485_v23 = vpop.f32.mrf.mxu1 }
 0x861   :  { %v1486_v61 = vadd.f32 %v1485_v23, %v2885_v6 }
 0x862   :  { %v1513_v24 = vrot.slane %v1473_v21, 2 }
 0x863   :  { %v1536_v54 = vrot.slane %v1486_v61, 2 }
 0x864   :  { %v1515_v49 = vadd.f32 %v1513_v24, %v2881_v43 }
 0x865   :  { %v1459_v25 = vpop.f32.mrf.mxu3 }
 0x866   :  { %v2235_v26 = vmul.f32 -1.442695, %v1515_v49  ;;  %v1460_v27 = vadd.f32 %v1459_v25, %v2862_v10 }
 0x867   :  { %v1474_v28 = vpop.f32.mrf.mxu0 }
 0x868   :  { %2424 = vpow2.f32 %v2235_v26  ;;  %v1490_v47 = vrot.slane %v1460_v27, 2  ;;  %v1487_v29 = vpop.f32.mrf.mxu1 }
 0x86a   :  { %v1492_v55 = vadd.f32 %v1490_v47, %v2872_v13 }
 0x86c   :  { %v2234_v31 = vmul.f32 -1.442695, %v1492_v55 }
 0x86d   :  { %v1461_v35 = vpop.f32.mrf.mxu3 }
 0x86e   :  { %v2425_v36 = vpop.eup %2424  ;;  %2426 = vpow2.f32 %v2234_v31 }
 0x86f   :  { %v1519_v42 = vadd.f32 1.0, %v2425_v36 }
 0x871   :  { %2428 = vrcp.f32 %v1519_v42  ;;  %v1531_v32 = vand.u32 2147483648, %v1519_v42  ;;  %vm1525_vm2 = vweird.f32 %v1519_v42  ;;  %v1529_v4 = vand.u32 2147483647, %v1519_v42 }
 0x873   :  { %v1532_v0 = vor.u32 1.1754944e-38, %v1531_v32  ;;  %vm1530_vm5 = vcmp.eq.f32.partialorder %v1529_v4, 8.507059e+37 }
 0x874   :  { %v2427_v46 = vpop.eup %2426 }
 0x875   :  { %v1496_v50 = vadd.f32 1.0, %v2427_v46 }
 0x877   :  { %2430 = vrcp.f32 %v1496_v50  ;;  %v2429_v43 = vpop.eup %2428  ;;  %v1508_v41 = vand.u32 2147483648, %v1496_v50  ;;  %v1506_v13 = vand.u32 2147483647, %v1496_v50  ;;  %vm1502_vm12 = vweird.f32 %v1496_v50 }
 0x878   :  { %v1521_v52 = vmul.f32 %v2429_v43, %v1519_v42  ;;  %vm1526_vm1 = vweird.f32 %v2429_v43 }
 0x879   :  { %v1509_v1 = vor.u32 1.1754944e-38, %v1508_v41  ;;  %vm1507_vm15 = vcmp.eq.f32.partialorder %v1506_v13, 8.507059e+37  ;;  %vm1527_vm4 = vmor %vm1525_vm2, %vm1526_vm1 }
 0x87a   :  { %v1522_v59 = vsub.f32 1.0, %v1521_v52 }
 0x87c   :  { %v1523_v62 = vmul.f32 %v2429_v43, %v1522_v59 }
 0x87d   :  { %v2431_v56 = vpop.eup %2430 }
 0x87e   :  { %v1498_v57 = vmul.f32 %v2431_v56, %v1496_v50  ;;  %vm1503_vm11 = vweird.f32 %v2431_v56  ;;  %v1524_v16 = vadd.f32 %v2429_v43, %v1523_v62  ;;  %v2985_v62 = vadd.f32 %v2909_v34, %v1029_v60 }
 0x87f   :  { %vm1504_vm14 = vmor %vm1502_vm12, %vm1503_vm11 }
 0x880   :  { %v1499_v45 = vsub.f32 1.0, %v1498_v57  ;;  %v1528_v5 = vsel %vm1527_vm4, %v2429_v43, %v1524_v16 }
 0x881   :  { %v1533_v11 = vsel %vm1530_vm5, %v1532_v0, %v1528_v5 }
 0x882   :  { %v1500_v48 = vmul.f32 %v2431_v56, %v1499_v45  ;;  %v1541_v15 = vsub.f32 1.0, %v1533_v11  ;;  %v1546_v17 = vmul.f32 %v1544_v39, %v1533_v11 }
 0x884   :  { %v1501_v63 = vadd.f32 %v2431_v56, %v1500_v48 }
 0x886   :  { %v1505_v8 = vsel %vm1504_vm14, %v2431_v56, %v1501_v63 }
 0x887   :  { %v1510_v37 = vsel %vm1507_vm15, %v1509_v1, %v1505_v8 }
 0x888   :  { %v1538_v58 = vmul.f32 %v1536_v54, %v1510_v37 }
 0x88a   :  { %v1539_v20 = vadd.f32 %v1538_v58, %v2891_v12 }
 0x88c   :  { %2432 = vtanh.f32 %v1539_v20 }
 0x892   :  { %v2433_v14 = vpop.eup %2432 }
 0x893   :  { %v1542_v9 = vmul.f32 %v2433_v14, %v1541_v15 }
 0x895   :  { %v2962_v19 = vadd.f32 %v1546_v17, %v1542_v9 }
 0x897   :  { %1548 = vst.msk [vmem:[#allocation2] sm:$0xc0] %vm590_vm8, %v2962_v19  ;;  %v1549_v7 = vpack.c.bf16 %v2962_v19, %v2962_v19  ;;  %v1640_v4 = vrot.slane %v2962_v19, 6 }
 0x899   :  { %v1551_v12 = vrot.slane %v1549_v7, 3 }
 0x89b   :  { %2236 = vmatmul.msk.bf16.vlgmr.msra.gmra.mxu2 %vm100_vm0, %v1551_v12  ;;  %2237 = vmatmul.msk.bf16.vlgmr.msra.gmra.mxu3 %vm100_vm0, %v1551_v12 }
 0x89c   :  { %2238 = vmatmul.msk.bf16.vlgmr.msrb.gmra.mxu0 %vm100_vm0, %v1551_v12  ;;  %1786 = vmatpush.bf16.msra.mxu2 %v2835_v44 }
 0x89d   :  { %1865 = vmatpush.bf16.msra.mxu3 %v2807_v3  ;;  %1878 = vmatpush.bf16.msrb.mxu0 %v2819_v30 }
 0x8a0   :  { %1787 = vmatpush.bf16.msra.mxu2 %v2838_v2 }
 0x8a1   :  { %1866 = vmatpush.bf16.msra.mxu3 %v2810_v33  ;;  %1879 = vmatpush.bf16.msrb.mxu0 %v2824_v40 }
 0x919   :  { %v1590_v53 = vpop.f32.mrf.mxu0 }
 0x91a   :  { %v1591_v41 = vadd.f32 %v1590_v53, %v2885_v6 }
 0x91e   :  { %v1564_v21 = vpop.f32.mrf.mxu2  ;;  %v1577_v23 = vpop.f32.mrf.mxu3 }
 0x91f   :  { %v1565_v24 = vadd.f32 %v1564_v21, %v2862_v10  ;;  %v1578_v49 = vadd.f32 %v1577_v23, %v2879_v22 }
 0x921   :  { %v1594_v25 = vadd.f32 %v1565_v24, %v2877_v18  ;;  %v1614_v26 = vadd.f32 %v1578_v49, %v2875_v51  ;;  %v1592_v3 = vpop.f32.mrf.mxu0 }
 0x923   :  { %v2239_v27 = vmul.f32 -1.442695, %v1594_v25  ;;  %v2240_v30 = vmul.f32 -1.442695, %v1614_v26 }
 0x925   :  { %2434 = vpow2.f32 %v2239_v27 }
 0x926   :  { %2436 = vpow2.f32 %v2240_v30  ;;  %v1566_v28 = vpop.f32.mrf.mxu2  ;;  %v1579_v33 = vpop.f32.mrf.mxu3 }
 0x92b   :  { %v2435_v47 = vpop.eup %2434 }
 0x92c   :  { %v2437_v40 = vpop.eup %2436  ;;  %v1598_v29 = vadd.f32 1.0, %v2435_v47 }
 0x92d   :  { %v1618_v55 = vadd.f32 1.0, %v2437_v40 }
 0x92e   :  { %2438 = vrcp.f32 %v1598_v29  ;;  %v1610_v50 = vand.u32 2147483648, %v1598_v29  ;;  %v1608_v56 = vand.u32 2147483647, %v1598_v29  ;;  %vm1604_vm7 = vweird.f32 %v1598_v29 }
 0x92f   :  { %2440 = vrcp.f32 %v1618_v55  ;;  %v1630_v1 = vand.u32 2147483648, %v1618_v55  ;;  %vm1624_vm14 = vweird.f32 %v1618_v55  ;;  %v1628_v54 = vand.u32 2147483647, %v1618_v55 }
 0x930   :  { %v1611_v45 = vor.u32 1.1754944e-38, %v1610_v50  ;;  %vm1609_vm11 = vcmp.eq.f32.partialorder %v1608_v56, 8.507059e+37 }
 0x931   :  { %v1631_v37 = vor.u32 1.1754944e-38, %v1630_v1  ;;  %vm1629_vm1 = vcmp.eq.f32.partialorder %v1628_v54, 8.507059e+37 }
 0x934   :  { %v2439_v31 = vpop.eup %2438 }
 0x935   :  { %v2441_v35 = vpop.eup %2440  ;;  %v1600_v36 = vmul.f32 %v2439_v31, %v1598_v29  ;;  %vm1605_vm6 = vweird.f32 %v2439_v31 }
 0x936   :  { %v1620_v42 = vmul.f32 %v2441_v35, %v1618_v55  ;;  %vm1606_vm10 = vmor %vm1604_vm7, %vm1605_vm6  ;;  %vm1625_vm12 = vweird.f32 %v2441_v35 }
 0x937   :  { %v1601_v46 = vsub.f32 1.0, %v1600_v36  ;;  %vm1626_vm15 = vmor %vm1624_vm14, %vm1625_vm12 }
 0x938   :  { %v1621_v43 = vsub.f32 1.0, %v1620_v42 }
 0x939   :  { %v1602_v52 = vmul.f32 %v2439_v31, %v1601_v46 }
 0x93a   :  { %v1622_v57 = vmul.f32 %v2441_v35, %v1621_v43 }
 0x93b   :  { %v1603_v59 = vadd.f32 %v2439_v31, %v1602_v52 }
 0x93c   :  { %v1623_v13 = vadd.f32 %v2441_v35, %v1622_v57 }
 0x93d   :  { %v1607_v61 = vsel %vm1606_vm10, %v2439_v31, %v1603_v59 }
 0x93e   :  { %v1612_v48 = vsel %vm1609_vm11, %v1611_v45, %v1607_v61  ;;  %v1627_v16 = vsel %vm1626_vm15, %v2441_v35, %v1623_v13 }
 0x93f   :  { %v1634_v63 = vmul.f32 %v1612_v48, %v1591_v41  ;;  %v1632_v32 = vsel %vm1629_vm1, %v1631_v37, %v1627_v16 }
 0x940   :  { %v1637_v58 = vsub.f32 1.0, %v1632_v32  ;;  %v1642_v5 = vmul.f32 %v1640_v4, %v1632_v32 }
 0x941   :  { %v1635_v8 = vadd.f32 %v1634_v63, %v2985_v62 }
 0x943   :  { %2442 = vtanh.f32 %v1635_v8 }
 0x949   :  { %v2443_v20 = vpop.eup %2442 }
 0x94a   :  { %v1638_v38 = vmul.f32 %v2443_v20, %v1637_v58 }
 0x94c   :  { %v2989_v60 = vadd.f32 %v1642_v5, %v1638_v38 }
 0x94e   :  { %1644 = vst.msk [vmem:[#allocation2 + $0x8] sm:$0x3] %vm274_vm9, %v2989_v60  ;;  %v1645_v34 = vpack.c.bf16 %v2989_v60, %v2989_v60  ;;  %v1743_v13 = vrot.slane %v2989_v60, 6 }
 0x950   :  { %2241 = vmatmul.msk.bf16.vlgmr.msrb.gmra.mxu1 %vm100_vm0, %v1645_v34  ;;  %2242 = vmatmul.msk.bf16.vlgmr.msrb.gmra.mxu2 %vm100_vm0, %v1645_v34 }
 0x951   :  { %2243 = vmatmul.msk.bf16.vlgmr.msrb.gmra.mxu3 %vm100_vm0, %v1645_v34  ;;  %1891 = vmatpush.bf16.msrb.mxu1 %v2835_v44 }
 0x955   :  { %1892 = vmatpush.bf16.msrb.mxu1 %v2838_v2 }
 0x9cd   :  { %v1658_v0 = vpop.f32.mrf.mxu1 }
 0x9ce   :  { %v1659_v11 = vadd.f32 %v1658_v0, %v2862_v10 }
 0x9d0   :  { %v1689_v39 = vrot.slane %v1659_v11, 6 }
 0x9d2   :  { %v1691_v15 = vadd.f32 %v1689_v39, %v2877_v18 }
 0x9d3   :  { %v1671_v14 = vpop.f32.mrf.mxu2 }
 0x9d4   :  { %v2244_v9 = vmul.f32 -1.442695, %v1691_v15  ;;  %v1672_v17 = vadd.f32 %v1671_v14, %v2879_v22  ;;  %v1684_v19 = vpop.f32.mrf.mxu3 }
 0x9d5   :  { %v1660_v7 = vpop.f32.mrf.mxu1  ;;  %v1685_v28 = vadd.f32 %v1684_v19, %v2885_v6 }
 0x9d6   :  { %2444 = vpow2.f32 %v2244_v9  ;;  %v1712_v12 = vrot.slane %v1672_v17, 6 }
 0x9d7   :  { %v1735_v42 = vrot.slane %v1685_v28, 6 }
 0x9d8   :  { %v1714_v53 = vadd.f32 %v1712_v12, %v2875_v51 }
 0x9da   :  { %v2245_v21 = vmul.f32 -1.442695, %v1714_v53 }
 0x9db   :  { %v1673_v44 = vpop.f32.mrf.mxu2 }
 0x9dc   :  { %v2445_v23 = vpop.eup %2444  ;;  %2446 = vpow2.f32 %v2245_v21  ;;  %v1686_v2 = vpop.f32.mrf.mxu3 }
 0x9dd   :  { %v1695_v24 = vadd.f32 1.0, %v2445_v23 }
 0x9df   :  { %2448 = vrcp.f32 %v1695_v24  ;;  %v1707_v30 = vand.u32 2147483648, %v1695_v24  ;;  %v1705_v47 = vand.u32 2147483647, %v1695_v24  ;;  %vm1701_vm4 = vweird.f32 %v1695_v24 }
 0x9e1   :  { %v1708_v31 = vor.u32 1.1754944e-38, %v1707_v30  ;;  %vm1706_vm6 = vcmp.eq.f32.partialorder %v1705_v47, 8.507059e+37 }
 0x9e2   :  { %v2447_v49 = vpop.eup %2446 }
 0x9e3   :  { %v1718_v25 = vadd.f32 1.0, %v2447_v49 }
 0x9e5   :  { %v2449_v26 = vpop.eup %2448  ;;  %2450 = vrcp.f32 %v1718_v25  ;;  %v1730_v43 = vand.u32 2147483648, %v1718_v25  ;;  %v1728_v56 = vand.u32 2147483647, %v1718_v25  ;;  %vm1724_vm10 = vweird.f32 %v1718_v25 }
 0x9e6   :  { %v1697_v3 = vmul.f32 %v2449_v26, %v1695_v24  ;;  %vm1702_vm2 = vweird.f32 %v2449_v26 }
 0x9e7   :  { %vm1703_vm5 = vmor %vm1701_vm4, %vm1702_vm2  ;;  %v1731_v45 = vor.u32 1.1754944e-38, %v1730_v43  ;;  %vm1729_vm12 = vcmp.eq.f32.partialorder %v1728_v56, 8.507059e+37 }
 0x9e8   :  { %v1698_v27 = vsub.f32 1.0, %v1697_v3 }
 0x9ea   :  { %v1699_v33 = vmul.f32 %v2449_v26, %v1698_v27 }
 0x9eb   :  { %v2451_v40 = vpop.eup %2450 }
 0x9ec   :  { %v1720_v29 = vmul.f32 %v2451_v40, %v1718_v25  ;;  %v1700_v55 = vadd.f32 %v2449_v26, %v1699_v33  ;;  %vm1725_vm7 = vweird.f32 %v2451_v40 }
 0x9ed   :  { %vm1726_vm11 = vmor %vm1724_vm10, %vm1725_vm7 }
 0x9ee   :  { %v1721_v35 = vsub.f32 1.0, %v1720_v29  ;;  %v1704_v36 = vsel %vm1703_vm5, %v2449_v26, %v1700_v55 }
 0x9ef   :  { %v1709_v46 = vsel %vm1706_vm6, %v1708_v31, %v1704_v36 }
 0x9f0   :  { %v1722_v50 = vmul.f32 %v2451_v40, %v1721_v35  ;;  %v1737_v52 = vmul.f32 %v1735_v42, %v1709_v46 }
 0x9f2   :  { %v1723_v57 = vadd.f32 %v2451_v40, %v1722_v50  ;;  %v1738_v59 = vadd.f32 %v1737_v52, %v2985_v62 }
 0x9f4   :  { %v1727_v41 = vsel %vm1726_vm11, %v2451_v40, %v1723_v57  ;;  %2452 = vtanh.f32 %v1738_v59 }
 0x9f5   :  { %v1732_v61 = vsel %vm1729_vm12, %v1731_v45, %v1727_v41 }
 0x9f6   :  { %v1740_v48 = vsub.f32 1.0, %v1732_v61  ;;  %v1745_v54 = vmul.f32 %v1743_v13, %v1732_v61 }
 0x9fa   :  { %v2453_v63 = vpop.eup %2452 }
 0x9fb   :  { %v1741_v1 = vmul.f32 %v2453_v63, %v1740_v48 }
 0x9fd   :  { %v3007_v8 = vadd.f32 %v1745_v54, %v1741_v1 }
 0x9ff   :  { %1747 = vst.msk [vmem:[#allocation2 + $0x8] sm:$0xc] %vm378_vm3, %v3007_v8  ;;  %v1748_v16 = vpack.c.bf16 %v3007_v8, %v3007_v8  ;;  %v1848_v52 = vrot.slane %v3007_v8, 6 }
 0xa01   :  { %v1750_v37 = vrot.slane %v1748_v16, 1 }
 0xa03   :  { %2246 = vmatmul.msk.bf16.vlgmr.msra.gmra.mxu0 %vm100_vm0, %v1750_v37  ;;  %2247 = vmatmul.msk.bf16.vlgmr.msra.gmra.mxu1 %vm100_vm0, %v1750_v37 }
 0xa04   :  { %2248 = vmatmul.msk.bf16.vlgmr.msra.gmra.mxu2 %vm100_vm0, %v1750_v37 }
 0xa80   :  { %v1763_v32 = vpop.f32.mrf.mxu0  ;;  %v1776_v58 = vpop.f32.mrf.mxu1 }
 0xa81   :  { %v1764_v4 = vadd.f32 %v1763_v32, %v2862_v10  ;;  %v1777_v20 = vadd.f32 %v1776_v58, %v2879_v22 }
 0xa83   :  { %v1794_v38 = vrot.slane %v1764_v4, 4  ;;  %v1817_v5 = vrot.slane %v1777_v20, 4 }
 0xa85   :  { %v1796_v60 = vadd.f32 %v1794_v38, %v2877_v18  ;;  %v1819_v34 = vadd.f32 %v1817_v5, %v2875_v51 }
 0xa87   :  { %v2249_v0 = vmul.f32 -1.442695, %v1796_v60  ;;  %v2250_v11 = vmul.f32 -1.442695, %v1819_v34  ;;  %v1789_v39 = vpop.f32.mrf.mxu2 }
 0xa88   :  { %v1765_v15 = vpop.f32.mrf.mxu0  ;;  %v1778_v14 = vpop.f32.mrf.mxu1  ;;  %v1790_v25 = vadd.f32 %v1789_v39, %v2885_v6 }
 0xa89   :  { %2454 = vpow2.f32 %v2249_v0 }
 0xa8a   :  { %2456 = vpow2.f32 %v2250_v11  ;;  %v1840_v47 = vrot.slane %v1790_v25, 4  ;;  %v2303_v11 = vld [vmem:[%s3067_s3] sm:$0xff] }
 0xa8f   :  { %v2455_v9 = vpop.eup %2454  ;;  %v1791_v17 = vpop.f32.mrf.mxu2 }
 0xa90   :  { %v2457_v19 = vpop.eup %2456  ;;  %v1800_v7 = vadd.f32 1.0, %v2455_v9 }
 0xa91   :  { %v1823_v12 = vadd.f32 1.0, %v2457_v19 }
 0xa92   :  { %2458 = vrcp.f32 %v1800_v7  ;;  %v1812_v49 = vand.u32 2147483648, %v1800_v7  ;;  %v1810_v3 = vand.u32 2147483647, %v1800_v7  ;;  %vm1806_vm14 = vweird.f32 %v1800_v7 }
 0xa93   :  { %2460 = vrcp.f32 %v1823_v12  ;;  %v1835_v55 = vand.u32 2147483648, %v1823_v12  ;;  %vm1829_vm4 = vweird.f32 %v1823_v12  ;;  %v1833_v35 = vand.u32 2147483647, %v1823_v12 }
 0xa94   :  { %v1813_v28 = vor.u32 1.1754944e-38, %v1812_v49  ;;  %vm1811_vm1 = vcmp.eq.f32.partialorder %v1810_v3, 8.507059e+37 }
 0xa95   :  { %v1836_v46 = vor.u32 1.1754944e-38, %v1835_v55  ;;  %vm1834_vm6 = vcmp.eq.f32.partialorder %v1833_v35, 8.507059e+37 }
 0xa98   :  { %v2459_v53 = vpop.eup %2458 }
 0xa99   :  { %v2461_v21 = vpop.eup %2460  ;;  %v1802_v44 = vmul.f32 %v2459_v53, %v1800_v7  ;;  %vm1807_vm3 = vweird.f32 %v2459_v53 }
 0xa9a   :  { %v1825_v23 = vmul.f32 %v2461_v21, %v1823_v12  ;;  %vm1808_vm15 = vmor %vm1806_vm14, %vm1807_vm3  ;;  %vm1830_vm2 = vweird.f32 %v2461_v21 }
 0xa9b   :  { %v1803_v2 = vsub.f32 1.0, %v1802_v44  ;;  %vm1831_vm5 = vmor %vm1829_vm4, %vm1830_vm2 }
 0xa9c   :  { %v1826_v24 = vsub.f32 1.0, %v1825_v23 }
 0xa9d   :  { %v1804_v26 = vmul.f32 %v2459_v53, %v1803_v2 }
 0xa9e   :  { %v1827_v27 = vmul.f32 %v2461_v21, %v1826_v24 }
 0xa9f   :  { %v1805_v30 = vadd.f32 %v2459_v53, %v1804_v26 }
 0xaa0   :  { %v1828_v29 = vadd.f32 %v2461_v21, %v1827_v27 }
 0xaa1   :  { %v1809_v33 = vsel %vm1808_vm15, %v2459_v53, %v1805_v30  ;;  %v2306_v30 = vld [vmem:[%s3067_s3 + $0x18] sm:$0xff] }
 0xaa2   :  { %v1814_v40 = vsel %vm1811_vm1, %v1813_v28, %v1809_v33  ;;  %v1832_v42 = vsel %vm1831_vm5, %v2461_v21, %v1828_v29  ;;  %2052 = vmatpush.bf16.msrb.mxu3 %v2306_v30  ;;  %v2305_v33 = vld [vmem:[%s3067_s3 + $0x10] sm:$0xff] }
 0xaa3   :  { %v1842_v31 = vmul.f32 %v1840_v47, %v1814_v40  ;;  %v1837_v50 = vsel %vm1834_vm6, %v1836_v46, %v1832_v42  ;;  %v1958_v40 = vld [vmem:[#allocation2] sm:$0xff] }
 0xaa4   :  { %v1845_v43 = vsub.f32 1.0, %v1837_v50  ;;  %v1850_v59 = vmul.f32 %v1848_v52, %v1837_v50  ;;  %v1964_v50 = vrot.slane %v1958_v40, 4  ;;  %v1967_v52 = vrot.slane %v1958_v40, 6 }
 0xaa5   :  { %v1843_v36 = vadd.f32 %v1842_v31, %v2985_v62  ;;  %v1961_v31 = vrot.slane %v1958_v40, 2 }
 0xaa6   :  { %2053 = vmatpush.bf16.msrb.mxu3 %v2305_v33 }
 0xaa7   :  { %2462 = vtanh.f32 %v1843_v36  ;;  %v1963_v46 = vadd.f32 %v1961_v31, %v1958_v40 }
 0xaad   :  { %v2463_v56 = vpop.eup %2462 }
 0xaae   :  { %v1846_v57 = vmul.f32 %v2463_v56, %v1845_v43  ;;  %v1966_v43 = vadd.f32 %v1964_v50, %v1963_v46 }
 0xab0   :  { %v3023_v45 = vadd.f32 %v1850_v59, %v1846_v57  ;;  %v1969_v56 = vadd.f32 %v1967_v52, %v1966_v43 }
 0xab2   :  { %1852 = vst.msk [vmem:[#allocation2 + $0x8] sm:$0x30] %vm484_vm13, %v3023_v45  ;;  %v1853_v41 = vpack.c.bf16 %v3023_v45, %v3023_v45  ;;  %v1953_v29 = vrot.slane %v3023_v45, 6 }
 0xab4   :  { %v1855_v61 = vrot.slane %v1853_v41, 2 }
 0xab6   :  { %2251 = vmatmul.msk.bf16.vlgmr.msra.gmra.mxu3 %vm100_vm0, %v1855_v61  ;;  %2252 = vmatmul.msk.bf16.vlgmr.msrb.gmra.mxu0 %vm100_vm0, %v1855_v61 }
 0xab7   :  { %2253 = vmatmul.msk.bf16.vlgmr.msrb.gmra.mxu1 %vm100_vm0, %v1855_v61 }
 0xb33   :  { %v1881_v48 = vpop.f32.mrf.mxu0 }
 0xb34   :  { %v1882_v13 = vadd.f32 %v1881_v48, %v2879_v22  ;;  %v1894_v63 = vpop.f32.mrf.mxu1 }
 0xb35   :  { %v1895_v19 = vadd.f32 %v1894_v63, %v2885_v6 }
 0xb36   :  { %v1922_v1 = vrot.slane %v1882_v13, 2 }
 0xb37   :  { %v1945_v23 = vrot.slane %v1895_v19, 2 }
 0xb38   :  { %v1924_v54 = vadd.f32 %v1922_v1, %v2875_v51  ;;  %v2304_v51 = vld [vmem:[%s3067_s3 + $0x8] sm:$0xff] }
 0xb39   :  { %v1868_v8 = vpop.f32.mrf.mxu3  ;;  %2012 = vmatpush.bf16.msrb.mxu2 %v2304_v51 }
 0xb3a   :  { %v2255_v16 = vmul.f32 -1.442695, %v1924_v54  ;;  %v1869_v37 = vadd.f32 %v1868_v8, %v2862_v10  ;;  %v2312_v8 = vld [vmem:[%s3068_s4] ss:$0 sm:$0xff] }
 0xb3b   :  { %v1883_v32 = vpop.f32.mrf.mxu0 }
 0xb3c   :  { %2464 = vpow2.f32 %v2255_v16  ;;  %v1899_v58 = vrot.slane %v1869_v37, 2  ;;  %v1896_v4 = vpop.f32.mrf.mxu1 }
 0xb3d   :  { %2013 = vmatpush.bf16.msrb.mxu2 %v2303_v11 }
 0xb3e   :  { %v1901_v20 = vadd.f32 %v1899_v58, %v2877_v18 }
 0xb40   :  { %v2254_v38 = vmul.f32 -1.442695, %v1901_v20  ;;  %v2313_v20 = vld [vmem:[%s3068_s4 + $0x1] ss:$0 sm:$0xff] }
 0xb41   :  { %v1870_v5 = vpop.f32.mrf.mxu3 }
 0xb42   :  { %v2465_v60 = vpop.eup %2464  ;;  %2466 = vpow2.f32 %v2254_v38 }
 0xb43   :  { %v1928_v34 = vadd.f32 1.0, %v2465_v60 }
 0xb45   :  { %2468 = vrcp.f32 %v1928_v34  ;;  %v1940_v25 = vand.u32 2147483648, %v1928_v34  ;;  %vm1934_vm3 = vweird.f32 %v1928_v34  ;;  %v1938_v3 = vand.u32 2147483647, %v1928_v34 }
 0xb47   :  { %v1941_v28 = vor.u32 1.1754944e-38, %v1940_v25  ;;  %vm1939_vm15 = vcmp.eq.f32.partialorder %v1938_v3, 8.507059e+37 }
 0xb48   :  { %v2467_v22 = vpop.eup %2466 }
 0xb49   :  { %v1905_v0 = vadd.f32 1.0, %v2467_v22 }
 0xb4b   :  { %2470 = vrcp.f32 %v1905_v0  ;;  %v2469_v10 = vpop.eup %2468  ;;  %v1917_v17 = vand.u32 2147483648, %v1905_v0  ;;  %v1915_v12 = vand.u32 2147483647, %v1905_v0  ;;  %vm1911_vm7 = vweird.f32 %v1905_v0 }
 0xb4c   :  { %v1930_v18 = vmul.f32 %v2469_v10, %v1928_v34  ;;  %vm1935_vm12 = vweird.f32 %v2469_v10 }
 0xb4d   :  { %v1918_v44 = vor.u32 1.1754944e-38, %v1917_v17  ;;  %vm1916_vm11 = vcmp.eq.f32.partialorder %v1915_v12, 8.507059e+37  ;;  %vm1936_vm14 = vmor %vm1934_vm3, %vm1935_vm12 }
 0xb4e   :  { %v1931_v14 = vsub.f32 1.0, %v1930_v18 }
 0xb50   :  { %v1932_v53 = vmul.f32 %v2469_v10, %v1931_v14 }
 0xb51   :  { %v2471_v39 = vpop.eup %2470 }
 0xb52   :  { %v1907_v15 = vmul.f32 %v2471_v39, %v1905_v0  ;;  %vm1912_vm13 = vweird.f32 %v2471_v39  ;;  %v1933_v24 = vadd.f32 %v2469_v10, %v1932_v53 }
 0xb53   :  { %vm1913_vm10 = vmor %vm1911_vm7, %vm1912_vm13 }
 0xb54   :  { %v1908_v9 = vsub.f32 1.0, %v1907_v15  ;;  %v1937_v27 = vsel %vm1936_vm14, %v2469_v10, %v1933_v24 }
 0xb55   :  { %v1942_v47 = vsel %vm1939_vm15, %v1941_v28, %v1937_v27 }
 0xb56   :  { %v1909_v7 = vmul.f32 %v2471_v39, %v1908_v9  ;;  %v1950_v55 = vsub.f32 1.0, %v1942_v47  ;;  %v1955_v35 = vmul.f32 %v1953_v29, %v1942_v47 }
 0xb58   :  { %v1910_v21 = vadd.f32 %v2471_v39, %v1909_v7 }
 0xb5a   :  { %v1914_v2 = vsel %vm1913_vm10, %v2471_v39, %v1910_v21 }
 0xb5b   :  { %v1919_v49 = vsel %vm1916_vm11, %v1918_v44, %v1914_v2 }
 0xb5c   :  { %v1947_v26 = vmul.f32 %v1945_v23, %v1919_v49 }
 0xb5e   :  { %v1948_v6 = vadd.f32 %v1947_v26, %v2985_v62 }
 0xb60   :  { %2472 = vtanh.f32 %v1948_v6 }
 0xb66   :  { %v2473_v62 = vpop.eup %2472 }
 0xb67   :  { %v1951_v36 = vmul.f32 %v2473_v62, %v1950_v55 }
 0xb69   :  { %v1956_v42 = vadd.f32 %v1955_v35, %v1951_v36 }
 0xb6b   :  { %1957 = vst.msk [vmem:[#allocation2 + $0x8] sm:$0xc0] %vm590_vm8, %v1956_v42 }
 0xb72   :  { %v1959_v57 = vld [vmem:[#allocation2 + $0x8] sm:$0xff] }
 0xb73   :  { %v1970_v59 = vadd.f32 %v1969_v56, %v1959_v57  ;;  %v1972_v41 = vrot.slane %v1959_v57, 2  ;;  %v1975_v48 = vrot.slane %v1959_v57, 4  ;;  %v1978_v13 = vrot.slane %v1959_v57, 6 }
 0xb75   :  { %v1974_v61 = vadd.f32 %v1972_v41, %v1970_v59 }
 0xb77   :  { %v1977_v45 = vadd.f32 %v1975_v48, %v1974_v61 }
 0xb79   :  { %v1980_v63 = vadd.f32 %v1978_v13, %v1977_v45 }
 0xb7b   :  { %v1981_v1 = vmul.f32 0.125, %v1980_v63 }
 0xb7d   :  { %v1982_v54 = vpack.c.bf16 %v1981_v1, %v1981_v1 }
 0xb7f   :  { %2264 = vmatmul.msk.bf16.vlgmr.msrb.gmra.mxu2 %vm100_vm0, %v1982_v54 }
 0xc02   :  { %v2015_v16 = vpop.f32.mrf.mxu2 }
 0xc03   :  { %v2016_v37 = vadd.f32 %v2312_v8, %v2015_v16 }
 0xc05   :  { %v2019_v32 = vmax.f32 %v2016_v37, 0.0 }
 0xc07   :  { %v2020_v58 = vpack.c.bf16 %v2019_v32, %v2019_v32 }
 0xc09   :  { %2278 = vmatmul.msk.bf16.vlgmr.msrb.gmra.mxu3 %vm100_vm0, %v2020_v58 }
 0xc0a   :  { %v2017_v4 = vpop.f32.mrf.mxu2 }
 0xc8c   :  { %v2055_v38 = vpop.f32.mrf.mxu3 }
 0xc8d   :  { %v2056_v5 = vadd.f32 %v2313_v20, %v2055_v38 }
 0xc8f   :  { %2059 = vst.msk [vmem:[#allocation6] sm:$0x3] %vm274_vm9, %v2056_v5 }
 0xc90   :  { %2070 = dma.vmem_to_hbm [thread:$0]  %s2066_s21, 32, %s2068_s24, [#allocation5]  }
 0xc94   :  { %v2057_v60 = vpop.f32.mrf.mxu3 }
 0xc95   :  { %2524 = dma.done.wait [#allocation5], 32  }
 0xc96   :  { %2525 = vsyncadd [#allocation5], 4294967264 }
 0xc97   :  { %2075 = vsyncpa [#allocation4], 1 }
 0xc98   :  { %2076 = vsyncpa [#allocation5], 1 }

</bundles_post_ra>
